<compile_context>
chip_gen: v6e
topology: v6e:2x2x1
jax: 0.10.0
libtpu: 0.0.40
codegen_flags: <defaults>
</compile_context>

<pallas_src>
import numpy as np
import jax
import jax.numpy as jnp
from jax import lax
from jax.experimental import pallas as pl
from jax.experimental.pallas import tpu as pltpu

BN_EPS = 1e-5
VMEM_LIMIT = 64 * 1024 * 1024   # sized against v7x's 64 MiB physical VMEM


# ----------------------------- Pallas kernels ------------------------------ #

def _conv3x3_bn_relu(x, pad_ref, patch_ref, w_ref, scale_ref, shift_ref,
                     out_dtype):
    """One Conv2d(3x3, pad=1) + folded BN + ReLU layer, im2col style.

    x         : (H, W, Cin)     bf16 activation value
    pad_ref   : (H+2, W+2, Cin) bf16 VMEM scratch (zero halo)
    patch_ref : (H*W, 9*Cin)    bf16 VMEM scratch (im2col patch matrix)
    w_ref     : (9*Cin, Cout)   bf16 weights, rows in (kh, kw, cin) order
    scale_ref : (1, Cout) f32   gamma / sqrt(var + eps)
    shift_ref : (1, Cout) f32   beta + (conv_bias - mean) * scale
    """
    H, W, Cin = x.shape
    Cout = w_ref.shape[-1]

    # Zero-pad inside VMEM (never materialize a padded copy in HBM).
    pad_ref[...] = jnp.zeros_like(pad_ref)
    pad_ref[pl.ds(1, H), pl.ds(1, W), :] = x

    # im2col: 9 shifted windows written at static lane offsets; then a single
    # K = 9*Cin matmul keeps the MXU full (vs. nine short K=Cin pushes).
    for t in range(9):
        dh, dw = divmod(t, 3)
        patch_ref[:, pl.ds(t * Cin, Cin)] = (
            pad_ref[pl.ds(dh, H), pl.ds(dw, W), :].reshape(H * W, Cin))

    acc = jnp.dot(patch_ref[...], w_ref[...],
                  preferred_element_type=jnp.float32)
    y = jnp.maximum(acc * scale_ref[...] + shift_ref[...], 0.0)
    return y.reshape(H, W, Cout).astype(out_dtype)


def conv_stack_kernel(x_ref, w1_ref, s1_ref, t1_ref,
                      w2_ref, s2_ref, t2_ref,
                      w3_ref, s3_ref, t3_ref, o_ref,
                      pad1, patch1, pad2, patch2, pad3, patch3):
    """Fused Conv(1->32)+BN+ReLU -> Conv(32->64)+BN+ReLU -> Conv(64->128)+BN+ReLU
    for one batch element; intermediates stay in VMEM."""
    y = _conv3x3_bn_relu(x_ref[0], pad1, patch1, w1_ref, s1_ref, t1_ref,
                         jnp.bfloat16)
    y = _conv3x3_bn_relu(y, pad2, patch2, w2_ref, s2_ref, t2_ref,
                         jnp.bfloat16)
    y = _conv3x3_bn_relu(y, pad3, patch3, w3_ref, s3_ref, t3_ref, o_ref.dtype)
    o_ref[0] = y


def fc_head_kernel(x_ref, w1_ref, b1_ref, w2_ref, b2_ref, o_ref, acc_ref):
    """Linear(D,128) -> Sigmoid -> Linear(128,32), K-tiled over D."""
    k = pl.program_id(0)

    @pl.when(k == 0)
    def _init():
        acc_ref[...] = jnp.zeros_like(acc_ref)

    acc_ref[...] += jnp.dot(x_ref[...], w1_ref[...],
                            preferred_element_type=jnp.float32)

    @pl.when(k == pl.num_programs(0) - 1)
    def _finalize():
        z = acc_ref[...] + b1_ref[...]
        h = pl.reciprocal(1.0 + jnp.exp(-z))       # sigmoid (EUP recip slot)
        o_ref[...] = jnp.dot(h, w2_ref[...],
                             preferred_element_type=jnp.float32) + b2_ref[...]


# ------------------------------ Wrappers ----------------------------------- #

def _whole(a):
    """Whole-array block with a constant index map (small resident params)."""
    return pl.BlockSpec(a.shape, lambda *_, nd=a.ndim: (0,) * nd)


def conv_stack(x_nhwc, folded):
    B, H, W, Cin = x_nhwc.shape
    (w1f, s1, t1), (w2f, s2, t2), (w3f, s3, t3) = folded
    Cout = w3f.shape[-1]

    scratch = []
    for cin in (Cin, w1f.shape[-1], w2f.shape[-1]):     # per-layer in-channels
        scratch.append(pltpu.VMEM((H + 2, W + 2, cin), jnp.bfloat16))
        scratch.append(pltpu.VMEM((H * W, 9 * cin), jnp.bfloat16))

    return pl.pallas_call(
        conv_stack_kernel,
        out_shape=jax.ShapeDtypeStruct((B, H, W, Cout), jnp.bfloat16),
        grid_spec=pltpu.PrefetchScalarGridSpec(
            num_scalar_prefetch=0,
            grid=(B,),
            in_specs=[pl.BlockSpec((1, H, W, Cin), lambda b: (b, 0, 0, 0)),
                      _whole(w1f), _whole(s1), _whole(t1),
                      _whole(w2f), _whole(s2), _whole(t2),
                      _whole(w3f), _whole(s3), _whole(t3)],
            out_specs=pl.BlockSpec((1, H, W, Cout), lambda b: (b, 0, 0, 0)),
            scratch_shapes=scratch),
        compiler_params=pltpu.CompilerParams(
            dimension_semantics=("parallel",),
            vmem_limit_bytes=VMEM_LIMIT),
    )(x_nhwc, w1f, s1, t1, w2f, s2, t2, w3f, s3, t3)


def _pick_k_tile(D, max_tile=4096):
    for cand in (4096, 2048, 1024, 512, 256, 128):
        if cand <= max_tile and D % cand == 0:
            return cand
    return 128   # D is always a multiple of 128 (channels-last flatten)


def fc_head(flat, w1, b1, w2, b2):
    B, D = flat.shape
    Hd = w1.shape[-1]            # 128
    Co = w2.shape[-1]            # 32
    tk = _pick_k_tile(D)

    return pl.pallas_call(
        fc_head_kernel,
        out_shape=jax.ShapeDtypeStruct((B, Co), jnp.float32),
        grid_spec=pltpu.PrefetchScalarGridSpec(
            num_scalar_prefetch=0,
            grid=(D // tk,),
            in_specs=[pl.BlockSpec((B, tk), lambda k: (0, k)),
                      pl.BlockSpec((tk, Hd), lambda k: (k, 0)),
                      _whole(b1), _whole(w2), _whole(b2)],
            out_specs=pl.BlockSpec((B, Co), lambda k: (0, 0)),
            scratch_shapes=[pltpu.VMEM((B, Hd), jnp.float32)]),
        compiler_params=pltpu.CompilerParams(
            dimension_semantics=("arbitrary",),
            vmem_limit_bytes=VMEM_LIMIT),
    )(flat, w1, b1, w2, b2)


def pallas_forward(x_nchw, params):
    x = jnp.transpose(x_nchw, (0, 2, 3, 1)).astype(jnp.bfloat16)  # NCHW->NHWC
    B, H, W, _ = x.shape

    # Fold conv bias + BN running stats into per-channel scale/shift and
    # flatten the 3x3 weights (HWIO) to (9*Cin, Cout) for the im2col matmul.
    folded = []
    for (w, b, gamma, beta, mean, var) in params["convs"]:
        scale = (gamma / jnp.sqrt(var + BN_EPS)).astype(jnp.float32)
        shift = (beta + (b - mean) * scale).astype(jnp.float32)
        kh, kw, cin, cout = w.shape
        folded.append((w.reshape(kh * kw * cin, cout).astype(jnp.bfloat16),
                       scale.reshape(1, cout), shift.reshape(1, cout)))

    conv_out = conv_stack(x, folded)                   # (B, H, W, 128) bf16
    C = conv_out.shape[-1]
    D = H * W * C

    # torch flattens NCHW as (C,H,W); fold that permutation into fc1's rows
    # once, so the NHWC conv output feeds the FC head with a free reshape.
    w_fc1 = (params["w1"].reshape(C, H, W, params["w1"].shape[-1])
             .transpose(1, 2, 0, 3).reshape(D, -1).astype(jnp.bfloat16))
    flat = conv_out.reshape(B, D)

    return fc_head(flat, w_fc1,
                   params["b1"].reshape(1, -1).astype(jnp.float32),
                   params["w2"].astype(jnp.float32),
                   params["b2"].reshape(1, -1).astype(jnp.float32))


# ------------------------- Pure-JAX reference ------------------------------ #

def ref_forward(x_nchw, params):
    x = jnp.transpose(x_nchw, (0, 2, 3, 1)).astype(jnp.float32)
    for (w, b, gamma, beta, mean, var) in params["convs"]:
        y = lax.conv_general_dilated(
            x, w, (1, 1), "SAME",
            dimension_numbers=("NHWC", "HWIO", "NHWC")) + b
        y = (y - mean) / jnp.sqrt(var + BN_EPS) * gamma + beta
        x = jnp.maximum(y, 0.0)
    B = x.shape[0]
    flat = jnp.transpose(x, (0, 3, 1, 2)).reshape(B, -1)   # torch view(B,-1)
    h = jax.nn.sigmoid(flat @ params["w1"] + params["b1"])
    return h @ params["w2"] + params["b2"]


# ------------------------------ Params ------------------------------------- #

def init_params(key, in_c, H, W):
    chans = [in_c, 32, 64, 128]
    convs = []
    for i in range(3):
        key, kw, kb, kg, kbt, km, kv = jax.random.split(key, 7)
        cin, cout = chans[i], chans[i + 1]
        w = 0.05 * jax.random.normal(kw, (3, 3, cin, cout), jnp.float32)
        b = 0.05 * jax.random.normal(kb, (cout,), jnp.float32)
        gamma = 1.0 + 0.1 * jax.random.normal(kg, (cout,), jnp.float32)
        beta = 0.1 * jax.random.normal(kbt, (cout,), jnp.float32)
        mean = 0.1 * jax.random.normal(km, (cout,), jnp.float32)
        var = 1.0 + 0.1 * jnp.abs(jax.random.normal(kv, (cout,), jnp.float32))
        convs.append((w, b, gamma, beta, mean, var))
    D = 128 * H * W
    key, k1, k2, k3, k4 = jax.random.split(key, 5)
    return {
        "convs": convs,
        "w1": 0.01 * jax.random.normal(k1, (D, 128), jnp.float32),
        "b1": 0.01 * jax.random.normal(k2, (128,), jnp.float32),
        "w2": 0.01 * jax.random.normal(k3, (128, 32), jnp.float32),
        "b2": 0.01 * jax.random.normal(k4, (32,), jnp.float32),
    }


# -------------------------------- Main -------------------------------------- #

if __name__ == "__main__":
    key = jax.random.PRNGKey(0)
    B, Cin, H, W = 2, 1, 4, 16          # small MFCC-like instance (Cin=1)
    key, kx = jax.random.split(key)
    x = jax.random.normal(kx, (B, Cin, H, W), jnp.float32)   # NCHW like torch

    params = init_params(key, Cin, H, W)

    out = jax.block_until_ready(pallas_forward(x, params))
    ref = jax.block_until_ready(ref_forward(x, params))

    assert out.shape == (B, 32), out.shape
    np.testing.assert_allclose(np.asarray(out), np.asarray(ref),
                               rtol=1e-2, atol=1e-2)
    print("KERNEL_OK")
</pallas_src>

<mosaic_0001>
module attributes {stable_mosaic.version = 11 : i64} {
  func.func @conv_stack_kernel(%arg0: i32, %arg1: memref<1x4x16x1xbf16, #tpu.memory_space<vmem>>, %arg2: memref<9x32xbf16, #tpu.memory_space<vmem>>, %arg3: memref<1x32xf32, #tpu.memory_space<vmem>>, %arg4: memref<1x32xf32, #tpu.memory_space<vmem>>, %arg5: memref<288x64xbf16, #tpu.memory_space<vmem>>, %arg6: memref<1x64xf32, #tpu.memory_space<vmem>>, %arg7: memref<1x64xf32, #tpu.memory_space<vmem>>, %arg8: memref<576x128xbf16, #tpu.memory_space<vmem>>, %arg9: memref<1x128xf32, #tpu.memory_space<vmem>>, %arg10: memref<1x128xf32, #tpu.memory_space<vmem>>, %arg11: memref<1x4x16x128xbf16, #tpu.memory_space<vmem>>, %arg12: memref<6x18x1xbf16, #tpu.memory_space<vmem>>, %arg13: memref<64x9xbf16, #tpu.memory_space<vmem>>, %arg14: memref<6x18x32xbf16, #tpu.memory_space<vmem>>, %arg15: memref<64x288xbf16, #tpu.memory_space<vmem>>, %arg16: memref<6x18x64xbf16, #tpu.memory_space<vmem>>, %arg17: memref<64x576xbf16, #tpu.memory_space<vmem>>) attributes {dimension_semantics = [#tpu.dimension_semantics<parallel>], iteration_bounds = array<i64: 2>, scalar_prefetch = 0 : i64, scratch_operands = 6 : i64, tpu.core_type = #tpu.core_type<tc>, window_params = [{transform_indices = @transform_0, window_bounds = array<i64: 1, 4, 16, 1>}, {pipeline_mode = #tpu.pipeline_mode<synchronous>, transform_indices = @transform_1, window_bounds = array<i64: 9, 32>}, {pipeline_mode = #tpu.pipeline_mode<synchronous>, transform_indices = @transform_2, window_bounds = array<i64: 1, 32>}, {pipeline_mode = #tpu.pipeline_mode<synchronous>, transform_indices = @transform_3, window_bounds = array<i64: 1, 32>}, {pipeline_mode = #tpu.pipeline_mode<synchronous>, transform_indices = @transform_4, window_bounds = array<i64: 288, 64>}, {pipeline_mode = #tpu.pipeline_mode<synchronous>, transform_indices = @transform_5, window_bounds = array<i64: 1, 64>}, {pipeline_mode = #tpu.pipeline_mode<synchronous>, transform_indices = @transform_6, window_bounds = array<i64: 1, 64>}, {pipeline_mode = #tpu.pipeline_mode<synchronous>, transform_indices = @transform_7, window_bounds = array<i64: 576, 128>}, {pipeline_mode = #tpu.pipeline_mode<synchronous>, transform_indices = @transform_8, window_bounds = array<i64: 1, 128>}, {pipeline_mode = #tpu.pipeline_mode<synchronous>, transform_indices = @transform_9, window_bounds = array<i64: 1, 128>}, {transform_indices = @transform_10, window_bounds = array<i64: 1, 4, 16, 128>}]} {
    %c0 = arith.constant 0 : index
    %c0_0 = arith.constant 0 : index
    %c0_1 = arith.constant 0 : index
    %c0_2 = arith.constant 0 : index
    %0 = vector.load %arg1[%c0, %c0_0, %c0_1, %c0_2] : memref<1x4x16x1xbf16, #tpu.memory_space<vmem>>, vector<1x4x16x1xbf16>
    %1 = vector.shape_cast %0 : vector<1x4x16x1xbf16> to vector<4x16x1xbf16>
    %cst = arith.constant 0.000000e+00 : bf16
    %2 = vector.broadcast %cst : bf16 to vector<6x18x1xbf16>
    %c0_3 = arith.constant 0 : index
    %c0_4 = arith.constant 0 : index
    %c0_5 = arith.constant 0 : index
    %3 = vector.load %arg12[%c0_3, %c0_4, %c0_5] : memref<6x18x1xbf16, #tpu.memory_space<vmem>>, vector<6x18x1xbf16>
    tpu.vector_store %arg12[%c0_3, %c0_4, %c0_5], %2 {strides = array<i32>} : memref<6x18x1xbf16, #tpu.memory_space<vmem>>, vector<6x18x1xbf16>,
    %c1 = arith.constant 1 : index
    %c1_6 = arith.constant 1 : index
    %c0_7 = arith.constant 0 : index
    %4 = vector.load %arg12[%c1, %c1_6, %c0_7] : memref<6x18x1xbf16, #tpu.memory_space<vmem>>, vector<4x16x1xbf16>
    tpu.vector_store %arg12[%c1, %c1_6, %c0_7], %1 {strides = array<i32>} : memref<6x18x1xbf16, #tpu.memory_space<vmem>>, vector<4x16x1xbf16>,
    %c0_8 = arith.constant 0 : index
    %c0_9 = arith.constant 0 : index
    %c0_10 = arith.constant 0 : index
    %5 = vector.load %arg12[%c0_8, %c0_9, %c0_10] : memref<6x18x1xbf16, #tpu.memory_space<vmem>>, vector<4x16x1xbf16>
    %6 = vector.shape_cast %5 : vector<4x16x1xbf16> to vector<64x1xbf16>
    %c0_11 = arith.constant 0 : index
    %c0_12 = arith.constant 0 : index
    %7 = vector.load %arg13[%c0_11, %c0_12] : memref<64x9xbf16, #tpu.memory_space<vmem>>, vector<64x1xbf16>
    tpu.vector_store %arg13[%c0_11, %c0_12], %6 {strides = array<i32>} : memref<64x9xbf16, #tpu.memory_space<vmem>>, vector<64x1xbf16>,
    %c0_13 = arith.constant 0 : index
    %c1_14 = arith.constant 1 : index
    %c0_15 = arith.constant 0 : index
    %8 = vector.load %arg12[%c0_13, %c1_14, %c0_15] : memref<6x18x1xbf16, #tpu.memory_space<vmem>>, vector<4x16x1xbf16>
    %9 = vector.shape_cast %8 : vector<4x16x1xbf16> to vector<64x1xbf16>
    %c0_16 = arith.constant 0 : index
    %c1_17 = arith.constant 1 : index
    %10 = vector.load %arg13[%c0_16, %c1_17] : memref<64x9xbf16, #tpu.memory_space<vmem>>, vector<64x1xbf16>
    tpu.vector_store %arg13[%c0_16, %c1_17], %9 {strides = array<i32>} : memref<64x9xbf16, #tpu.memory_space<vmem>>, vector<64x1xbf16>,
    %c0_18 = arith.constant 0 : index
    %c2 = arith.constant 2 : index
    %c0_19 = arith.constant 0 : index
    %11 = vector.load %arg12[%c0_18, %c2, %c0_19] : memref<6x18x1xbf16, #tpu.memory_space<vmem>>, vector<4x16x1xbf16>
    %12 = vector.shape_cast %11 : vector<4x16x1xbf16> to vector<64x1xbf16>
    %c0_20 = arith.constant 0 : index
    %c2_21 = arith.constant 2 : index
    %13 = vector.load %arg13[%c0_20, %c2_21] : memref<64x9xbf16, #tpu.memory_space<vmem>>, vector<64x1xbf16>
    tpu.vector_store %arg13[%c0_20, %c2_21], %12 {strides = array<i32>} : memref<64x9xbf16, #tpu.memory_space<vmem>>, vector<64x1xbf16>,
    %c1_22 = arith.constant 1 : index
    %c0_23 = arith.constant 0 : index
    %c0_24 = arith.constant 0 : index
    %14 = vector.load %arg12[%c1_22, %c0_23, %c0_24] : memref<6x18x1xbf16, #tpu.memory_space<vmem>>, vector<4x16x1xbf16>
    %15 = vector.shape_cast %14 : vector<4x16x1xbf16> to vector<64x1xbf16>
    %c0_25 = arith.constant 0 : index
    %c3 = arith.constant 3 : index
    %16 = vector.load %arg13[%c0_25, %c3] : memref<64x9xbf16, #tpu.memory_space<vmem>>, vector<64x1xbf16>
    tpu.vector_store %arg13[%c0_25, %c3], %15 {strides = array<i32>} : memref<64x9xbf16, #tpu.memory_space<vmem>>, vector<64x1xbf16>,
    %c1_26 = arith.constant 1 : index
    %c1_27 = arith.constant 1 : index
    %c0_28 = arith.constant 0 : index
    %17 = vector.load %arg12[%c1_26, %c1_27, %c0_28] : memref<6x18x1xbf16, #tpu.memory_space<vmem>>, vector<4x16x1xbf16>
    %18 = vector.shape_cast %17 : vector<4x16x1xbf16> to vector<64x1xbf16>
    %c0_29 = arith.constant 0 : index
    %c4 = arith.constant 4 : index
    %19 = vector.load %arg13[%c0_29, %c4] : memref<64x9xbf16, #tpu.memory_space<vmem>>, vector<64x1xbf16>
    tpu.vector_store %arg13[%c0_29, %c4], %18 {strides = array<i32>} : memref<64x9xbf16, #tpu.memory_space<vmem>>, vector<64x1xbf16>,
    %c1_30 = arith.constant 1 : index
    %c2_31 = arith.constant 2 : index
    %c0_32 = arith.constant 0 : index
    %20 = vector.load %arg12[%c1_30, %c2_31, %c0_32] : memref<6x18x1xbf16, #tpu.memory_space<vmem>>, vector<4x16x1xbf16>
    %21 = vector.shape_cast %20 : vector<4x16x1xbf16> to vector<64x1xbf16>
    %c0_33 = arith.constant 0 : index
    %c5 = arith.constant 5 : index
    %22 = vector.load %arg13[%c0_33, %c5] : memref<64x9xbf16, #tpu.memory_space<vmem>>, vector<64x1xbf16>
    tpu.vector_store %arg13[%c0_33, %c5], %21 {strides = array<i32>} : memref<64x9xbf16, #tpu.memory_space<vmem>>, vector<64x1xbf16>,
    %c2_34 = arith.constant 2 : index
    %c0_35 = arith.constant 0 : index
    %c0_36 = arith.constant 0 : index
    %23 = vector.load %arg12[%c2_34, %c0_35, %c0_36] : memref<6x18x1xbf16, #tpu.memory_space<vmem>>, vector<4x16x1xbf16>
    %24 = vector.shape_cast %23 : vector<4x16x1xbf16> to vector<64x1xbf16>
    %c0_37 = arith.constant 0 : index
    %c6 = arith.constant 6 : index
    %25 = vector.load %arg13[%c0_37, %c6] : memref<64x9xbf16, #tpu.memory_space<vmem>>, vector<64x1xbf16>
    tpu.vector_store %arg13[%c0_37, %c6], %24 {strides = array<i32>} : memref<64x9xbf16, #tpu.memory_space<vmem>>, vector<64x1xbf16>,
    %c2_38 = arith.constant 2 : index
    %c1_39 = arith.constant 1 : index
    %c0_40 = arith.constant 0 : index
    %26 = vector.load %arg12[%c2_38, %c1_39, %c0_40] : memref<6x18x1xbf16, #tpu.memory_space<vmem>>, vector<4x16x1xbf16>
    %27 = vector.shape_cast %26 : vector<4x16x1xbf16> to vector<64x1xbf16>
    %c0_41 = arith.constant 0 : index
    %c7 = arith.constant 7 : index
    %28 = vector.load %arg13[%c0_41, %c7] : memref<64x9xbf16, #tpu.memory_space<vmem>>, vector<64x1xbf16>
    tpu.vector_store %arg13[%c0_41, %c7], %27 {strides = array<i32>} : memref<64x9xbf16, #tpu.memory_space<vmem>>, vector<64x1xbf16>,
    %c2_42 = arith.constant 2 : index
    %c2_43 = arith.constant 2 : index
    %c0_44 = arith.constant 0 : index
    %29 = vector.load %arg12[%c2_42, %c2_43, %c0_44] : memref<6x18x1xbf16, #tpu.memory_space<vmem>>, vector<4x16x1xbf16>
    %30 = vector.shape_cast %29 : vector<4x16x1xbf16> to vector<64x1xbf16>
    %c0_45 = arith.constant 0 : index
    %c8 = arith.constant 8 : index
    %31 = vector.load %arg13[%c0_45, %c8] : memref<64x9xbf16, #tpu.memory_space<vmem>>, vector<64x1xbf16>
    tpu.vector_store %arg13[%c0_45, %c8], %30 {strides = array<i32>} : memref<64x9xbf16, #tpu.memory_space<vmem>>, vector<64x1xbf16>,
    %c0_46 = arith.constant 0 : index
    %c0_47 = arith.constant 0 : index
    %32 = vector.load %arg13[%c0_46, %c0_47] : memref<64x9xbf16, #tpu.memory_space<vmem>>, vector<64x9xbf16>
    %c0_48 = arith.constant 0 : index
    %c0_49 = arith.constant 0 : index
    %33 = vector.load %arg2[%c0_48, %c0_49] : memref<9x32xbf16, #tpu.memory_space<vmem>>, vector<9x32xbf16>
    %cst_50 = arith.constant dense<0.000000e+00> : vector<64x32xf32>
    %34 = tpu.matmul %32, %33, %cst_50 {dimension_numbers = #tpu.dot_dimension_numbers<[1], [0], [0], [1], [0, 0, 1, 1], [], []>} : vector<64x9xbf16>, vector<9x32xbf16>, vector<64x32xf32> -> vector<64x32xf32>
    %c0_51 = arith.constant 0 : index
    %c0_52 = arith.constant 0 : index
    %35 = vector.load %arg3[%c0_51, %c0_52] : memref<1x32xf32, #tpu.memory_space<vmem>>, vector<1x32xf32>
    %36 = vector.broadcast %35 : vector<1x32xf32> to vector<64x32xf32>
    %37 = arith.mulf %34, %36 : vector<64x32xf32>
    %c0_53 = arith.constant 0 : index
    %c0_54 = arith.constant 0 : index
    %38 = vector.load %arg4[%c0_53, %c0_54] : memref<1x32xf32, #tpu.memory_space<vmem>>, vector<1x32xf32>
    %39 = vector.broadcast %38 : vector<1x32xf32> to vector<64x32xf32>
    %40 = arith.addf %37, %39 : vector<64x32xf32>
    %cst_55 = arith.constant 0.000000e+00 : f32
    %41 = vector.broadcast %cst_55 : f32 to vector<64x32xf32>
    %42 = arith.maximumf %40, %41 : vector<64x32xf32>
    %43 = vector.shape_cast %42 : vector<64x32xf32> to vector<4x16x32xf32>
    %44 = arith.truncf %43 : vector<4x16x32xf32> to vector<4x16x32xbf16>
    %cst_56 = arith.constant 0.000000e+00 : bf16
    %45 = vector.broadcast %cst_56 : bf16 to vector<6x18x32xbf16>
    %c0_57 = arith.constant 0 : index
    %c0_58 = arith.constant 0 : index
    %c0_59 = arith.constant 0 : index
    %46 = vector.load %arg14[%c0_57, %c0_58, %c0_59] : memref<6x18x32xbf16, #tpu.memory_space<vmem>>, vector<6x18x32xbf16>
    tpu.vector_store %arg14[%c0_57, %c0_58, %c0_59], %45 {strides = array<i32>} : memref<6x18x32xbf16, #tpu.memory_space<vmem>>, vector<6x18x32xbf16>,
    %c1_60 = arith.constant 1 : index
    %c1_61 = arith.constant 1 : index
    %c0_62 = arith.constant 0 : index
    %47 = vector.load %arg14[%c1_60, %c1_61, %c0_62] : memref<6x18x32xbf16, #tpu.memory_space<vmem>>, vector<4x16x32xbf16>
    tpu.vector_store %arg14[%c1_60, %c1_61, %c0_62], %44 {strides = array<i32>} : memref<6x18x32xbf16, #tpu.memory_space<vmem>>, vector<4x16x32xbf16>,
    %c0_63 = arith.constant 0 : index
    %c0_64 = arith.constant 0 : index
    %c0_65 = arith.constant 0 : index
    %48 = vector.load %arg14[%c0_63, %c0_64, %c0_65] : memref<6x18x32xbf16, #tpu.memory_space<vmem>>, vector<4x16x32xbf16>
    %49 = vector.shape_cast %48 : vector<4x16x32xbf16> to vector<64x32xbf16>
    %c0_66 = arith.constant 0 : index
    %c0_67 = arith.constant 0 : index
    %50 = vector.load %arg15[%c0_66, %c0_67] : memref<64x288xbf16, #tpu.memory_space<vmem>>, vector<64x32xbf16>
    tpu.vector_store %arg15[%c0_66, %c0_67], %49 {strides = array<i32>} : memref<64x288xbf16, #tpu.memory_space<vmem>>, vector<64x32xbf16>,
    %c0_68 = arith.constant 0 : index
    %c1_69 = arith.constant 1 : index
    %c0_70 = arith.constant 0 : index
    %51 = vector.load %arg14[%c0_68, %c1_69, %c0_70] : memref<6x18x32xbf16, #tpu.memory_space<vmem>>, vector<4x16x32xbf16>
    %52 = vector.shape_cast %51 : vector<4x16x32xbf16> to vector<64x32xbf16>
    %c0_71 = arith.constant 0 : index
    %c32 = arith.constant 32 : index
    %53 = vector.load %arg15[%c0_71, %c32] : memref<64x288xbf16, #tpu.memory_space<vmem>>, vector<64x32xbf16>
    tpu.vector_store %arg15[%c0_71, %c32], %52 {strides = array<i32>} : memref<64x288xbf16, #tpu.memory_space<vmem>>, vector<64x32xbf16>,
    %c0_72 = arith.constant 0 : index
    %c2_73 = arith.constant 2 : index
    %c0_74 = arith.constant 0 : index
    %54 = vector.load %arg14[%c0_72, %c2_73, %c0_74] : memref<6x18x32xbf16, #tpu.memory_space<vmem>>, vector<4x16x32xbf16>
    %55 = vector.shape_cast %54 : vector<4x16x32xbf16> to vector<64x32xbf16>
    %c0_75 = arith.constant 0 : index
    %c64 = arith.constant 64 : index
    %56 = vector.load %arg15[%c0_75, %c64] : memref<64x288xbf16, #tpu.memory_space<vmem>>, vector<64x32xbf16>
    tpu.vector_store %arg15[%c0_75, %c64], %55 {strides = array<i32>} : memref<64x288xbf16, #tpu.memory_space<vmem>>, vector<64x32xbf16>,
    %c1_76 = arith.constant 1 : index
    %c0_77 = arith.constant 0 : index
    %c0_78 = arith.constant 0 : index
    %57 = vector.load %arg14[%c1_76, %c0_77, %c0_78] : memref<6x18x32xbf16, #tpu.memory_space<vmem>>, vector<4x16x32xbf16>
    %58 = vector.shape_cast %57 : vector<4x16x32xbf16> to vector<64x32xbf16>
    %c0_79 = arith.constant 0 : index
    %c96 = arith.constant 96 : index
    %59 = vector.load %arg15[%c0_79, %c96] : memref<64x288xbf16, #tpu.memory_space<vmem>>, vector<64x32xbf16>
    tpu.vector_store %arg15[%c0_79, %c96], %58 {strides = array<i32>} : memref<64x288xbf16, #tpu.memory_space<vmem>>, vector<64x32xbf16>,
    %c1_80 = arith.constant 1 : index
    %c1_81 = arith.constant 1 : index
    %c0_82 = arith.constant 0 : index
    %60 = vector.load %arg14[%c1_80, %c1_81, %c0_82] : memref<6x18x32xbf16, #tpu.memory_space<vmem>>, vector<4x16x32xbf16>
    %61 = vector.shape_cast %60 : vector<4x16x32xbf16> to vector<64x32xbf16>
    %c0_83 = arith.constant 0 : index
    %c128 = arith.constant 128 : index
    %62 = vector.load %arg15[%c0_83, %c128] : memref<64x288xbf16, #tpu.memory_space<vmem>>, vector<64x32xbf16>
    tpu.vector_store %arg15[%c0_83, %c128], %61 {strides = array<i32>} : memref<64x288xbf16, #tpu.memory_space<vmem>>, vector<64x32xbf16>,
    %c1_84 = arith.constant 1 : index
    %c2_85 = arith.constant 2 : index
    %c0_86 = arith.constant 0 : index
    %63 = vector.load %arg14[%c1_84, %c2_85, %c0_86] : memref<6x18x32xbf16, #tpu.memory_space<vmem>>, vector<4x16x32xbf16>
    %64 = vector.shape_cast %63 : vector<4x16x32xbf16> to vector<64x32xbf16>
    %c0_87 = arith.constant 0 : index
    %c160 = arith.constant 160 : index
    %65 = vector.load %arg15[%c0_87, %c160] : memref<64x288xbf16, #tpu.memory_space<vmem>>, vector<64x32xbf16>
    tpu.vector_store %arg15[%c0_87, %c160], %64 {strides = array<i32>} : memref<64x288xbf16, #tpu.memory_space<vmem>>, vector<64x32xbf16>,
    %c2_88 = arith.constant 2 : index
    %c0_89 = arith.constant 0 : index
    %c0_90 = arith.constant 0 : index
    %66 = vector.load %arg14[%c2_88, %c0_89, %c0_90] : memref<6x18x32xbf16, #tpu.memory_space<vmem>>, vector<4x16x32xbf16>
    %67 = vector.shape_cast %66 : vector<4x16x32xbf16> to vector<64x32xbf16>
    %c0_91 = arith.constant 0 : index
    %c192 = arith.constant 192 : index
    %68 = vector.load %arg15[%c0_91, %c192] : memref<64x288xbf16, #tpu.memory_space<vmem>>, vector<64x32xbf16>
    tpu.vector_store %arg15[%c0_91, %c192], %67 {strides = array<i32>} : memref<64x288xbf16, #tpu.memory_space<vmem>>, vector<64x32xbf16>,
    %c2_92 = arith.constant 2 : index
    %c1_93 = arith.constant 1 : index
    %c0_94 = arith.constant 0 : index
    %69 = vector.load %arg14[%c2_92, %c1_93, %c0_94] : memref<6x18x32xbf16, #tpu.memory_space<vmem>>, vector<4x16x32xbf16>
    %70 = vector.shape_cast %69 : vector<4x16x32xbf16> to vector<64x32xbf16>
    %c0_95 = arith.constant 0 : index
    %c224 = arith.constant 224 : index
    %71 = vector.load %arg15[%c0_95, %c224] : memref<64x288xbf16, #tpu.memory_space<vmem>>, vector<64x32xbf16>
    tpu.vector_store %arg15[%c0_95, %c224], %70 {strides = array<i32>} : memref<64x288xbf16, #tpu.memory_space<vmem>>, vector<64x32xbf16>,
    %c2_96 = arith.constant 2 : index
    %c2_97 = arith.constant 2 : index
    %c0_98 = arith.constant 0 : index
    %72 = vector.load %arg14[%c2_96, %c2_97, %c0_98] : memref<6x18x32xbf16, #tpu.memory_space<vmem>>, vector<4x16x32xbf16>
    %73 = vector.shape_cast %72 : vector<4x16x32xbf16> to vector<64x32xbf16>
    %c0_99 = arith.constant 0 : index
    %c256 = arith.constant 256 : index
    %74 = vector.load %arg15[%c0_99, %c256] : memref<64x288xbf16, #tpu.memory_space<vmem>>, vector<64x32xbf16>
    tpu.vector_store %arg15[%c0_99, %c256], %73 {strides = array<i32>} : memref<64x288xbf16, #tpu.memory_space<vmem>>, vector<64x32xbf16>,
    %c0_100 = arith.constant 0 : index
    %c0_101 = arith.constant 0 : index
    %75 = vector.load %arg15[%c0_100, %c0_101] : memref<64x288xbf16, #tpu.memory_space<vmem>>, vector<64x288xbf16>
    %c0_102 = arith.constant 0 : index
    %c0_103 = arith.constant 0 : index
    %76 = vector.load %arg5[%c0_102, %c0_103] : memref<288x64xbf16, #tpu.memory_space<vmem>>, vector<288x64xbf16>
    %cst_104 = arith.constant dense<0.000000e+00> : vector<64x64xf32>
    %77 = tpu.matmul %75, %76, %cst_104 {dimension_numbers = #tpu.dot_dimension_numbers<[1], [0], [0], [1], [0, 0, 1, 1], [], []>} : vector<64x288xbf16>, vector<288x64xbf16>, vector<64x64xf32> -> vector<64x64xf32>
    %c0_105 = arith.constant 0 : index
    %c0_106 = arith.constant 0 : index
    %78 = vector.load %arg6[%c0_105, %c0_106] : memref<1x64xf32, #tpu.memory_space<vmem>>, vector<1x64xf32>
    %79 = vector.broadcast %78 : vector<1x64xf32> to vector<64x64xf32>
    %80 = arith.mulf %77, %79 : vector<64x64xf32>
    %c0_107 = arith.constant 0 : index
    %c0_108 = arith.constant 0 : index
    %81 = vector.load %arg7[%c0_107, %c0_108] : memref<1x64xf32, #tpu.memory_space<vmem>>, vector<1x64xf32>
    %82 = vector.broadcast %81 : vector<1x64xf32> to vector<64x64xf32>
    %83 = arith.addf %80, %82 : vector<64x64xf32>
    %cst_109 = arith.constant 0.000000e+00 : f32
    %84 = vector.broadcast %cst_109 : f32 to vector<64x64xf32>
    %85 = arith.maximumf %83, %84 : vector<64x64xf32>
    %86 = vector.shape_cast %85 : vector<64x64xf32> to vector<4x16x64xf32>
    %87 = arith.truncf %86 : vector<4x16x64xf32> to vector<4x16x64xbf16>
    %cst_110 = arith.constant 0.000000e+00 : bf16
    %88 = vector.broadcast %cst_110 : bf16 to vector<6x18x64xbf16>
    %c0_111 = arith.constant 0 : index
    %c0_112 = arith.constant 0 : index
    %c0_113 = arith.constant 0 : index
    %89 = vector.load %arg16[%c0_111, %c0_112, %c0_113] : memref<6x18x64xbf16, #tpu.memory_space<vmem>>, vector<6x18x64xbf16>
    tpu.vector_store %arg16[%c0_111, %c0_112, %c0_113], %88 {strides = array<i32>} : memref<6x18x64xbf16, #tpu.memory_space<vmem>>, vector<6x18x64xbf16>,
    %c1_114 = arith.constant 1 : index
    %c1_115 = arith.constant 1 : index
    %c0_116 = arith.constant 0 : index
    %90 = vector.load %arg16[%c1_114, %c1_115, %c0_116] : memref<6x18x64xbf16, #tpu.memory_space<vmem>>, vector<4x16x64xbf16>
    tpu.vector_store %arg16[%c1_114, %c1_115, %c0_116], %87 {strides = array<i32>} : memref<6x18x64xbf16, #tpu.memory_space<vmem>>, vector<4x16x64xbf16>,
    %c0_117 = arith.constant 0 : index
    %c0_118 = arith.constant 0 : index
    %c0_119 = arith.constant 0 : index
    %91 = vector.load %arg16[%c0_117, %c0_118, %c0_119] : memref<6x18x64xbf16, #tpu.memory_space<vmem>>, vector<4x16x64xbf16>
    %92 = vector.shape_cast %91 : vector<4x16x64xbf16> to vector<64x64xbf16>
    %c0_120 = arith.constant 0 : index
    %c0_121 = arith.constant 0 : index
    %93 = vector.load %arg17[%c0_120, %c0_121] : memref<64x576xbf16, #tpu.memory_space<vmem>>, vector<64x64xbf16>
    tpu.vector_store %arg17[%c0_120, %c0_121], %92 {strides = array<i32>} : memref<64x576xbf16, #tpu.memory_space<vmem>>, vector<64x64xbf16>,
    %c0_122 = arith.constant 0 : index
    %c1_123 = arith.constant 1 : index
    %c0_124 = arith.constant 0 : index
    %94 = vector.load %arg16[%c0_122, %c1_123, %c0_124] : memref<6x18x64xbf16, #tpu.memory_space<vmem>>, vector<4x16x64xbf16>
    %95 = vector.shape_cast %94 : vector<4x16x64xbf16> to vector<64x64xbf16>
    %c0_125 = arith.constant 0 : index
    %c64_126 = arith.constant 64 : index
    %96 = vector.load %arg17[%c0_125, %c64_126] : memref<64x576xbf16, #tpu.memory_space<vmem>>, vector<64x64xbf16>
    tpu.vector_store %arg17[%c0_125, %c64_126], %95 {strides = array<i32>} : memref<64x576xbf16, #tpu.memory_space<vmem>>, vector<64x64xbf16>,
    %c0_127 = arith.constant 0 : index
    %c2_128 = arith.constant 2 : index
    %c0_129 = arith.constant 0 : index
    %97 = vector.load %arg16[%c0_127, %c2_128, %c0_129] : memref<6x18x64xbf16, #tpu.memory_space<vmem>>, vector<4x16x64xbf16>
    %98 = vector.shape_cast %97 : vector<4x16x64xbf16> to vector<64x64xbf16>
    %c0_130 = arith.constant 0 : index
    %c128_131 = arith.constant 128 : index
    %99 = vector.load %arg17[%c0_130, %c128_131] : memref<64x576xbf16, #tpu.memory_space<vmem>>, vector<64x64xbf16>
    tpu.vector_store %arg17[%c0_130, %c128_131], %98 {strides = array<i32>} : memref<64x576xbf16, #tpu.memory_space<vmem>>, vector<64x64xbf16>,
    %c1_132 = arith.constant 1 : index
    %c0_133 = arith.constant 0 : index
    %c0_134 = arith.constant 0 : index
    %100 = vector.load %arg16[%c1_132, %c0_133, %c0_134] : memref<6x18x64xbf16, #tpu.memory_space<vmem>>, vector<4x16x64xbf16>
    %101 = vector.shape_cast %100 : vector<4x16x64xbf16> to vector<64x64xbf16>
    %c0_135 = arith.constant 0 : index
    %c192_136 = arith.constant 192 : index
    %102 = vector.load %arg17[%c0_135, %c192_136] : memref<64x576xbf16, #tpu.memory_space<vmem>>, vector<64x64xbf16>
    tpu.vector_store %arg17[%c0_135, %c192_136], %101 {strides = array<i32>} : memref<64x576xbf16, #tpu.memory_space<vmem>>, vector<64x64xbf16>,
    %c1_137 = arith.constant 1 : index
    %c1_138 = arith.constant 1 : index
    %c0_139 = arith.constant 0 : index
    %103 = vector.load %arg16[%c1_137, %c1_138, %c0_139] : memref<6x18x64xbf16, #tpu.memory_space<vmem>>, vector<4x16x64xbf16>
    %104 = vector.shape_cast %103 : vector<4x16x64xbf16> to vector<64x64xbf16>
    %c0_140 = arith.constant 0 : index
    %c256_141 = arith.constant 256 : index
    %105 = vector.load %arg17[%c0_140, %c256_141] : memref<64x576xbf16, #tpu.memory_space<vmem>>, vector<64x64xbf16>
    tpu.vector_store %arg17[%c0_140, %c256_141], %104 {strides = array<i32>} : memref<64x576xbf16, #tpu.memory_space<vmem>>, vector<64x64xbf16>,
    %c1_142 = arith.constant 1 : index
    %c2_143 = arith.constant 2 : index
    %c0_144 = arith.constant 0 : index
    %106 = vector.load %arg16[%c1_142, %c2_143, %c0_144] : memref<6x18x64xbf16, #tpu.memory_space<vmem>>, vector<4x16x64xbf16>
    %107 = vector.shape_cast %106 : vector<4x16x64xbf16> to vector<64x64xbf16>
    %c0_145 = arith.constant 0 : index
    %c320 = arith.constant 320 : index
    %108 = vector.load %arg17[%c0_145, %c320] : memref<64x576xbf16, #tpu.memory_space<vmem>>, vector<64x64xbf16>
    tpu.vector_store %arg17[%c0_145, %c320], %107 {strides = array<i32>} : memref<64x576xbf16, #tpu.memory_space<vmem>>, vector<64x64xbf16>,
    %c2_146 = arith.constant 2 : index
    %c0_147 = arith.constant 0 : index
    %c0_148 = arith.constant 0 : index
    %109 = vector.load %arg16[%c2_146, %c0_147, %c0_148] : memref<6x18x64xbf16, #tpu.memory_space<vmem>>, vector<4x16x64xbf16>
    %110 = vector.shape_cast %109 : vector<4x16x64xbf16> to vector<64x64xbf16>
    %c0_149 = arith.constant 0 : index
    %c384 = arith.constant 384 : index
    %111 = vector.load %arg17[%c0_149, %c384] : memref<64x576xbf16, #tpu.memory_space<vmem>>, vector<64x64xbf16>
    tpu.vector_store %arg17[%c0_149, %c384], %110 {strides = array<i32>} : memref<64x576xbf16, #tpu.memory_space<vmem>>, vector<64x64xbf16>,
    %c2_150 = arith.constant 2 : index
    %c1_151 = arith.constant 1 : index
    %c0_152 = arith.constant 0 : index
    %112 = vector.load %arg16[%c2_150, %c1_151, %c0_152] : memref<6x18x64xbf16, #tpu.memory_space<vmem>>, vector<4x16x64xbf16>
    %113 = vector.shape_cast %112 : vector<4x16x64xbf16> to vector<64x64xbf16>
    %c0_153 = arith.constant 0 : index
    %c448 = arith.constant 448 : index
    %114 = vector.load %arg17[%c0_153, %c448] : memref<64x576xbf16, #tpu.memory_space<vmem>>, vector<64x64xbf16>
    tpu.vector_store %arg17[%c0_153, %c448], %113 {strides = array<i32>} : memref<64x576xbf16, #tpu.memory_space<vmem>>, vector<64x64xbf16>,
    %c2_154 = arith.constant 2 : index
    %c2_155 = arith.constant 2 : index
    %c0_156 = arith.constant 0 : index
    %115 = vector.load %arg16[%c2_154, %c2_155, %c0_156] : memref<6x18x64xbf16, #tpu.memory_space<vmem>>, vector<4x16x64xbf16>
    %116 = vector.shape_cast %115 : vector<4x16x64xbf16> to vector<64x64xbf16>
    %c0_157 = arith.constant 0 : index
    %c512 = arith.constant 512 : index
    %117 = vector.load %arg17[%c0_157, %c512] : memref<64x576xbf16, #tpu.memory_space<vmem>>, vector<64x64xbf16>
    tpu.vector_store %arg17[%c0_157, %c512], %116 {strides = array<i32>} : memref<64x576xbf16, #tpu.memory_space<vmem>>, vector<64x64xbf16>,
    %c0_158 = arith.constant 0 : index
    %c0_159 = arith.constant 0 : index
    %118 = vector.load %arg17[%c0_158, %c0_159] : memref<64x576xbf16, #tpu.memory_space<vmem>>, vector<64x576xbf16>
    %c0_160 = arith.constant 0 : index
    %c0_161 = arith.constant 0 : index
    %119 = vector.load %arg8[%c0_160, %c0_161] : memref<576x128xbf16, #tpu.memory_space<vmem>>, vector<576x128xbf16>
    %cst_162 = arith.constant dense<0.000000e+00> : vector<64x128xf32>
    %120 = tpu.matmul %118, %119, %cst_162 {dimension_numbers = #tpu.dot_dimension_numbers<[1], [0], [0], [1], [0, 0, 1, 1], [], []>} : vector<64x576xbf16>, vector<576x128xbf16>, vector<64x128xf32> -> vector<64x128xf32>
    %c0_163 = arith.constant 0 : index
    %c0_164 = arith.constant 0 : index
    %121 = vector.load %arg9[%c0_163, %c0_164] : memref<1x128xf32, #tpu.memory_space<vmem>>, vector<1x128xf32>
    %122 = vector.broadcast %121 : vector<1x128xf32> to vector<64x128xf32>
    %123 = arith.mulf %120, %122 : vector<64x128xf32>
    %c0_165 = arith.constant 0 : index
    %c0_166 = arith.constant 0 : index
    %124 = vector.load %arg10[%c0_165, %c0_166] : memref<1x128xf32, #tpu.memory_space<vmem>>, vector<1x128xf32>
    %125 = vector.broadcast %124 : vector<1x128xf32> to vector<64x128xf32>
    %126 = arith.addf %123, %125 : vector<64x128xf32>
    %cst_167 = arith.constant 0.000000e+00 : f32
    %127 = vector.broadcast %cst_167 : f32 to vector<64x128xf32>
    %128 = arith.maximumf %126, %127 : vector<64x128xf32>
    %129 = vector.shape_cast %128 : vector<64x128xf32> to vector<4x16x128xf32>
    %130 = arith.truncf %129 : vector<4x16x128xf32> to vector<4x16x128xbf16>
    %c0_168 = arith.constant 0 : index
    %c0_169 = arith.constant 0 : index
    %c0_170 = arith.constant 0 : index
    %c0_171 = arith.constant 0 : index
    %131 = vector.load %arg11[%c0_168, %c0_169, %c0_170, %c0_171] : memref<1x4x16x128xbf16, #tpu.memory_space<vmem>>, vector<1x4x16x128xbf16>
    %132 = vector.shape_cast %131 : vector<1x4x16x128xbf16> to vector<4x16x128xbf16>
    %133 = vector.shape_cast %130 : vector<4x16x128xbf16> to vector<1x4x16x128xbf16>
    tpu.vector_store %arg11[%c0_168, %c0_169, %c0_170, %c0_171], %133 {strides = array<i32>} : memref<1x4x16x128xbf16, #tpu.memory_space<vmem>>, vector<1x4x16x128xbf16>,
    return
  }
  func.func @transform_0(%arg0: i32) -> (i32, i32, i32, i32) {
    %c0_i32 = arith.constant 0 : i32
    %c0_i32_0 = arith.constant 0 : i32
    %c0_i32_1 = arith.constant 0 : i32
    %c0_i32_2 = arith.constant 0 : i32
    return %arg0, %c0_i32, %c0_i32_0, %c0_i32_1 : i32, i32, i32, i32
  }
  func.func @transform_1(%arg0: i32) -> (i32, i32) {
    %c0_i32 = arith.constant 0 : i32
    %c0_i32_0 = arith.constant 0 : i32
    %c0_i32_1 = arith.constant 0 : i32
    return %c0_i32, %c0_i32_0 : i32, i32
  }
  func.func @transform_2(%arg0: i32) -> (i32, i32) {
    %c0_i32 = arith.constant 0 : i32
    %c0_i32_0 = arith.constant 0 : i32
    %c0_i32_1 = arith.constant 0 : i32
    return %c0_i32, %c0_i32_0 : i32, i32
  }
  func.func @transform_3(%arg0: i32) -> (i32, i32) {
    %c0_i32 = arith.constant 0 : i32
    %c0_i32_0 = arith.constant 0 : i32
    %c0_i32_1 = arith.constant 0 : i32
    return %c0_i32, %c0_i32_0 : i32, i32
  }
  func.func @transform_4(%arg0: i32) -> (i32, i32) {
    %c0_i32 = arith.constant 0 : i32
    %c0_i32_0 = arith.constant 0 : i32
    %c0_i32_1 = arith.constant 0 : i32
    return %c0_i32, %c0_i32_0 : i32, i32
  }
  func.func @transform_5(%arg0: i32) -> (i32, i32) {
    %c0_i32 = arith.constant 0 : i32
    %c0_i32_0 = arith.constant 0 : i32
    %c0_i32_1 = arith.constant 0 : i32
    return %c0_i32, %c0_i32_0 : i32, i32
  }
  func.func @transform_6(%arg0: i32) -> (i32, i32) {
    %c0_i32 = arith.constant 0 : i32
    %c0_i32_0 = arith.constant 0 : i32
    %c0_i32_1 = arith.constant 0 : i32
    return %c0_i32, %c0_i32_0 : i32, i32
  }
  func.func @transform_7(%arg0: i32) -> (i32, i32) {
    %c0_i32 = arith.constant 0 : i32
    %c0_i32_0 = arith.constant 0 : i32
    %c0_i32_1 = arith.constant 0 : i32
    return %c0_i32, %c0_i32_0 : i32, i32
  }
  func.func @transform_8(%arg0: i32) -> (i32, i32) {
    %c0_i32 = arith.constant 0 : i32
    %c0_i32_0 = arith.constant 0 : i32
    %c0_i32_1 = arith.constant 0 : i32
    return %c0_i32, %c0_i32_0 : i32, i32
  }
  func.func @transform_9(%arg0: i32) -> (i32, i32) {
    %c0_i32 = arith.constant 0 : i32
    %c0_i32_0 = arith.constant 0 : i32
    %c0_i32_1 = arith.constant 0 : i32
    return %c0_i32, %c0_i32_0 : i32, i32
  }
  func.func @transform_10(%arg0: i32) -> (i32, i32, i32, i32) {
    %c0_i32 = arith.constant 0 : i32
    %c0_i32_0 = arith.constant 0 : i32
    %c0_i32_1 = arith.constant 0 : i32
    %c0_i32_2 = arith.constant 0 : i32
    return %arg0, %c0_i32, %c0_i32_0, %c0_i32_1 : i32, i32, i32, i32
  }
}

</mosaic_0001>

<bundles_post_ra>
// kernel: tpu_custom_call.1
= control target key start
LH: loop header
LB: loop body
LE: loop exit
PB: predicated region body
PF: predicated region fallthrough
CT: control target
= control target key end

     0   :  { %15 = vsyncpa [#allocation9], 0  ;;  %s6690_s0 = inlined_call_operand.vmem [shape: bf16[2,4,16,1], index: 0, kind: input, shape index: {}]   ;;  %s6691_s1 = inlined_call_operand.vmem [shape: bf16[9,32], index: 1, kind: input, shape index: {}]   ;;  %s6692_s2 = inlined_call_operand.vmem [shape: f32[1,32], index: 2, kind: input, shape index: {}]   ;;  %s6693_s3 = inlined_call_operand.vmem [shape: f32[1,32], index: 3, kind: input, shape index: {}]   ;;  %s6694_s4 = inlined_call_operand.vmem [shape: bf16[288,64], index: 4, kind: input, shape index: {}]   ;;  %s6695_s5 = inlined_call_operand.vmem [shape: f32[1,64], index: 5, kind: input, shape index: {}]   ;;  %s6696_s6 = inlined_call_operand.vmem [shape: f32[1,64], index: 6, kind: input, shape index: {}]   ;;  %s6697_s7 = inlined_call_operand.vmem [shape: bf16[576,128], index: 7, kind: input, shape index: {}]   ;;  %s6698_s8 = inlined_call_operand.vmem [shape: f32[1,128], index: 8, kind: input, shape index: {}]   ;;  %s6699_s9 = inlined_call_operand.vmem [shape: f32[1,128], index: 9, kind: input, shape index: {}]   ;;  %s6700_s10 = inlined_call_operand.hbm [shape: bf16[2,4,16,128], index: 10, kind: output, shape index: {}]  }
   0x1   :  { %17 = vsyncpa [#allocation9 + $0x1], 0  ;;  %s5101_s13 = smov 0   ;;  %s5103_s14 = smov 0  }
   0x2   :  { %s5105_s15 = smov 0   ;;  %s5107_s16 = smov 0  }
   0x3 LB: > { %s5122_s17 = sadd.s32 4294967295, %s5030_s16   ;;  %s4412_s18 = sadd.s32 4294967294, %s5030_s16   ;;  %s5030_s16 = sphi %s5107_s16, %s6728_s16   ;;  %s5026_s15 = sphi %s5105_s15, %s6727_s15   ;;  %s5022_s14 = sphi %s5103_s14, %s6726_s14   ;;  %s5018_s13 = sphi %s5101_s13, %s6725_s13  }
   0x4   : > { %s5126_s19 = sadd.s32 1, %s5030_s16   ;;  %s245_s20 = sadd.s32 1, %s5026_s15 }
   0x5   : > { %s242_s21 = ssub.s32 %s5030_s16, %s5126_s19  ;;  %p255_p0 = scmp.ne.s32.totalorder %s5026_s15, %s5022_s14 }
   0x6   : > { %p243_p1 = scmp.eq.s32.totalorder %s242_s21, 0  ;;  %p256_p2 = scmp.eq.s32.totalorder %s5122_s17, 1 }
   0x7   : > { %p261_p3 = scmp.ne.s32.totalorder %s5022_s14, %s5018_s13  ;;  %p262_p4 = scmp.eq.s32.totalorder %s4412_s18, 1 }
   0x8   : > { %s5137_s22 = scalar_select %p243_p1, %s5026_s15, %s245_s20  }
   0x9   : > { %p5139_p5 = por %p256_p2, %p255_p0  ;;  %p5143_p6 = por %p262_p4, %p261_p3 }
   0xa   : > { %p4415_p7 = scmp.ge.s32.totalorder %s5030_s16, 1  ;;  %p315_p8 = scmp.lt.s32.totalorder %s5030_s16, 3 }
   0xc   : > { %p316_p9 = pnand %p4415_p7, %p315_p8 }
   0xd   : > { %p353_p10 = scmp.lt.s32.totalorder (!%p316_p9), %s5122_s17, 1  ;;  %s5033_s30 = smov (!%p316_p9), 2  }
   0xe   : > { %319 = sbr.rel (%p316_p9) target bundleno = 1308 (0x51c), region = 60  ;;  %s5034_s11 = smov (!%p316_p9), 1  }
   0xf   : > { %s5035_s12 = smov (!%p316_p9), 3   ;;  %s6702_s18 = smov (!%p316_p9), 4  }
  0x10   : > { %s5037_s20 = smov (!%p316_p9), 5   ;;  %s5038_s21 = smov (!%p316_p9), 6  }
  0x13   : > { %vm367_vm0 = vcmask 3072   ;;  %v5032_v0 = vmov 0   ;;  %vm370_vm1 = vcmask 0   ;;  %vm688_vm2 = vcmask 1042432   ;;  %s354_s25 = scalar_select %p353_p10, %s5122_s17, 1 }
  0x14   : > { %368 = vst.msk [vmem:[#allocation2] sm:$0xf] %vm367_vm0, %v5032_v0  ;;  %369 = vst.msk [vmem:[#allocation2 + $0x4] sm:$0xf] %vm367_vm0, %v5032_v0  ;;  %vm689_vm3 = vcmask 1046532   ;;  %vm1351_vm14 = vcmask 1043456  }
  0x15   : > { %372 = vst.msk [vmem:[#allocation2 + $0xc] sm:$0xf] %vm367_vm0, %v5032_v0  ;;  %373 = vst.msk [vmem:[#allocation2 + $0x10] sm:$0xf] %vm367_vm0, %v5032_v0  ;;  %vm532_vm4 = vsmask.f32 3328 }
  0x16   : > { %375 = vst.msk [vmem:[#allocation2 + $0x18] sm:$0xf] %vm367_vm0, %v5032_v0  ;;  %376 = vst.msk [vmem:[#allocation2 + $0x1c] sm:$0xf] %vm367_vm0, %v5032_v0  ;;  %vm533_vm5 = vsmask.f32 7440 }
  0x17   : > { %378 = vst.msk [vmem:[#allocation2 + $0x24] sm:$0xf] %vm367_vm0, %v5032_v0  ;;  %379 = vst.msk [vmem:[#allocation2 + $0x28] sm:$0xf] %vm367_vm0, %v5032_v0  ;;  %s4593_s26 = sshll.u32 %s354_s25, 5  ;;  %s5039_s25 = smov 7  }
  0x18   : > { %381 = vst.msk [vmem:[#allocation2 + $0x30] sm:$0xf] %vm367_vm0, %v5032_v0  ;;  %382 = vst.msk [vmem:[#allocation2 + $0x34] sm:$0xf] %vm367_vm0, %v5032_v0  ;;  %s5190_s29 = scalar_lea.vmem %s6690_s0, %s4593_s26  ;;  %vm387_vm6 = vsmask.f32 256 }
  0x19   : > { %384 = vst.msk [vmem:[#allocation2 + $0x3c] sm:$0xf] %vm367_vm0, %v5032_v0  ;;  %385 = vst.msk [vmem:[#allocation2 + $0x40] sm:$0xf] %vm367_vm0, %v5032_v0  ;;  %v359_v2 = vld [vmem:[%s5190_s29] sm:$0xf] }
  0x1a   : > { %371 = vst.msk [vmem:[#allocation2 + $0x8] sm:$0x1] %vm370_vm1, %v5032_v0  ;;  %374 = vst.msk [vmem:[#allocation2 + $0x14] sm:$0x1] %vm370_vm1, %v5032_v0  ;;  %vm388_vm8 = vsmask.f32 4368 }
  0x1b   : > { %377 = vst.msk [vmem:[#allocation2 + $0x20] sm:$0x1] %vm370_vm1, %v5032_v0  ;;  %380 = vst.msk [vmem:[#allocation2 + $0x2c] sm:$0x1] %vm370_vm1, %v5032_v0  ;;  %vm472_vm9 = vsmask.f32 7938 }
  0x1c   : > { %383 = vst.msk [vmem:[#allocation2 + $0x38] sm:$0x1] %vm370_vm1, %v5032_v0  ;;  %386 = vst.msk [vmem:[#allocation2 + $0x44] sm:$0x1] %vm370_vm1, %v5032_v0  ;;  %v664_v3 = vld [vmem:[#allocation2] sm:$0xe] }
  0x1d   : > { %vm5192_vm7 = vmor %vm688_vm2, %vm689_vm3  ;;  %v665_v4 = vld [vmem:[#allocation2 + $0x4] sm:$0xf]  ;;  %v520_v5 = vld [vmem:[#allocation2] sm:$0xf]  ;;  %v4419_v7 = vrot.slane %v664_v3, 9  ;;  %v391_v24 = vshrl.u32 %v359_v2, 16 }
  0x1e   : > { %v360_v6 = vld [vmem:[%s5190_s29 + $0x4] sm:$0xf]  ;;  %v693_v8 = vrot.slane %v665_v4, 5  ;;  %v536_v12 = vshrl.u32 %v520_v5, 16  ;;  %v539_v13 = vshll.u32 %v520_v5, 16  ;;  %vm5208_vm10 = vmor %vm532_vm4, %vm533_vm5  ;;  %v394_v44 = vshll.u32 %v359_v2, 16 }
  0x1f   : > { %v521_v10 = vld [vmem:[#allocation2 + $0x4] sm:$0xf]  ;;  %v361_v20 = vld [vmem:[%s5190_s29 + $0x8] sm:$0xf]  ;;  %v362_v25 = vld [vmem:[%s5190_s29 + $0xc] sm:$0xf] }
  0x20   : > { %v545_v14 = vshll.u32 %v521_v10, 16  ;;  %v694_v16 = vsel %vm5192_vm7, %v4419_v7, %v693_v8  ;;  %v695_v17 = vrot.slane %v693_v8, 4  ;;  %v549_v18 = vshrl.u32 %v521_v10, 16  ;;  %vm5214_vm11 = vmor %vm387_vm6, %vm388_vm8  ;;  %v474_v40 = vld [vmem:[#allocation2 + $0xc] sm:$0xf]  ;;  %s5040_s26 = smov 8  }
  0x21   : > { %v666_v9 = vld [vmem:[#allocation2 + $0x8] sm:$0x1]  ;;  %719 = vrot.lane.b32.xlu0 %v694_v16, %s5033_s30  ;;  %v538_v21 = vrot.slane %v536_v12, 4  ;;  %v541_v22 = vrot.slane %v539_v13, 5  ;;  %v399_v29 = vshrl.u32 %v360_v6, 16  ;;  %v393_v32 = vrot.slane %v391_v24, 7  ;;  %vm5220_vm12 = vmand %vm367_vm0, %vm472_vm9 }
  0x22   : > { %v696_v11 = vrot.slane %v666_v9, 5  ;;  %v522_v15 = vld [vmem:[#allocation2 + $0x8] sm:$0x1]  ;;  %v547_v23 = vrot.slane %v545_v14, 5  ;;  %v551_v27 = vrot.slane %v549_v18, 4  ;;  %v402_v33 = vshll.u32 %v360_v6, 16  ;;  %vm5226_vm13 = vmand %vm370_vm1, %vm387_vm6 }
  0x23   : > { %v555_v19 = vshll.u32 %v522_v15, 16  ;;  %v542_v31 = vor.u32 %v541_v22, %v538_v21  ;;  %v408_v34 = vshrl.u32 %v361_v20, 16  ;;  %v401_v37 = vrot.slane %v399_v29, 7  ;;  %v480_v46 = vld [vmem:[#allocation2 + $0x14] sm:$0x1] }
  0x24   : > { %v697_v26 = vsel %vm5192_vm7, %v695_v17, %v696_v11  ;;  %v552_v35 = vor.u32 %v551_v27, %v547_v23  ;;  %v416_v38 = vshrl.u32 %v362_v25, 16  ;;  %v419_v39 = vshll.u32 %v362_v25, 16  ;;  %v363_v52 = vld [vmem:[%s5190_s29 + $0x10] sm:$0xf]  ;;  %v487_v57 = vld [vmem:[#allocation2 + $0x20] sm:$0x1] }
  0x25   : > { %v557_v28 = vrot.slane %v555_v19, 5  ;;  %721 = vrot.lane.b32.xlu1 %v697_v26, %s5033_s30  ;;  %v543_v41 = vrot.slane %v542_v31, 4  ;;  %v397_v42 = vrot.slane %v393_v32, 4  ;;  %v410_v43 = vrot.slane %v408_v34, 7  ;;  %v364_v58 = vld [vmem:[%s5190_s29 + $0x14] sm:$0xf] }
  0x26   : > { %v553_v47 = vrot.slane %v552_v35, 4  ;;  %v404_v48 = vor.u32 %v402_v33, %v401_v37  ;;  %v406_v49 = vrot.slane %v401_v37, 4  ;;  %v418_v50 = vrot.slane %v416_v38, 7  ;;  %v483_v63 = vld [vmem:[#allocation2 + $0x18] sm:$0xf] }
  0x27   : > { %v548_v53 = vsel %vm5208_vm10, %v543_v41, %v547_v23  ;;  %v414_v54 = vrot.slane %v410_v43, 4  ;;  %v396_v55 = vor.u32 %v394_v44, %v393_v32  ;;  %v411_v56 = vshll.u32 %v361_v20, 16  ;;  %v365_v2 = vld [vmem:[%s5190_s29 + $0x18] sm:$0xf]  ;;  %v366_v7 = vld [vmem:[%s5190_s29 + $0x1c] sm:$0xf] }
  0x28   : > { %631 = vrot.lane.b32.xlu0 %v548_v53, %s5034_s11  ;;  %v558_v59 = vsel %vm5208_vm10, %v553_v47, %v557_v28  ;;  %v405_v60 = vsel %vm5214_vm11, %v397_v42, %v404_v48  ;;  %v421_v61 = vor.u32 %v419_v39, %v418_v50  ;;  %v423_v62 = vrot.slane %v418_v50, 4  ;;  %v504_v16 = vld [vmem:[#allocation2] sm:$0xf]  ;;  %v490_v17 = vld [vmem:[#allocation2 + $0x24] sm:$0xf]  ;;  %s5042_s29 = smov 32  }
  0x29   : > { %477 = vst.msk [vmem:[#allocation2 + $0x10] sm:$0xf] %vm367_vm0, %v405_v60  ;;  %v475_v3 = vsel %vm5220_vm12, %v396_v55, %v474_v40  ;;  %v481_v4 = vsel %vm5226_vm13, %v406_v49, %v480_v46  ;;  %v413_v5 = vor.u32 %v411_v56, %v410_v43  ;;  %v425_v6 = vshrl.u32 %v363_v52, 16  ;;  %512 = vst.msk [vmem:[#allocation3] sm:$0xf] %vm367_vm0, %v504_v16 }
  0x2a   : > { %v422_v8 = vsel %vm5214_vm11, %v414_v54, %v421_v61  ;;  %476 = vst [vmem:[#allocation2 + $0xc] sm:$0xf] %v475_v3  ;;  %482 = vst [vmem:[#allocation2 + $0x14] sm:$0x1] %v481_v4  ;;  %v488_v9 = vsel %vm5226_vm13, %v423_v62, %v487_v57  ;;  %v428_v10 = vshll.u32 %v363_v52, 16  ;;  %v433_v11 = vshrl.u32 %v364_v58, 16 }
  0x2b   : > { %486 = vst.msk [vmem:[#allocation2 + $0x1c] sm:$0xf] %vm367_vm0, %v422_v8  ;;  %v484_v12 = vsel %vm5220_vm12, %v413_v5, %v483_v63  ;;  %489 = vst [vmem:[#allocation2 + $0x20] sm:$0x1] %v488_v9  ;;  %v427_v13 = vrot.slane %v425_v6, 7  ;;  %v436_v14 = vshll.u32 %v364_v58, 16 }
  0x2c   : > { %v442_v15 = vshrl.u32 %v365_v2, 16  ;;  %633 = vrot.lane.b32.xlu0 %v558_v59, %s5034_s11  ;;  %485 = vst [vmem:[#allocation2 + $0x18] sm:$0xf] %v484_v12  ;;  %v435_v18 = vrot.slane %v433_v11, 7  ;;  %v445_v19 = vshll.u32 %v365_v2, 16  ;;  %v450_v20 = vshrl.u32 %v366_v7, 16 }
  0x2d   : > { %v453_v21 = vshll.u32 %v366_v7, 16  ;;  %v430_v22 = vor.u32 %v428_v10, %v427_v13  ;;  %v431_v23 = vrot.slane %v427_v13, 4  ;;  %v494_v24 = vld [vmem:[#allocation2 + $0x2c] sm:$0x1]  ;;  %v497_v28 = vld [vmem:[#allocation2 + $0x30] sm:$0xf] }
  0x2e   : > { %v444_v25 = vrot.slane %v442_v15, 7  ;;  %v438_v26 = vor.u32 %v436_v14, %v435_v18  ;;  %v440_v27 = vrot.slane %v435_v18, 4  ;;  %v5255_v29 = vrot.slane %v450_v20, 7  ;;  %v505_v34 = vld [vmem:[#allocation2 + $0x4] sm:$0xf] }
  0x2f   : > { %v491_v31 = vsel %vm5220_vm12, %v430_v22, %v490_v17  ;;  %513 = vst.msk [vmem:[#allocation3 + $0x4] sm:$0xf] %vm367_vm0, %v505_v34  ;;  %vm1352_vm15 = vcmask 1044480   ;;  %vm743_vm1 = vcmask 19472   ;;  %vm792_vm2 = vcmask 27672  }
  0x30   : > { %v447_v32 = vor.u32 %v445_v19, %v444_v25  ;;  %v448_v33 = vrot.slane %v444_v25, 4  ;;  %v753_v35 = vld [vmem:[#allocation2 + $0x10] sm:$0xf]  ;;  %492 = vst [vmem:[#allocation2 + $0x24] sm:$0xf] %v491_v31  ;;  %v439_v39 = vsel %vm5214_vm11, %v431_v23, %v438_v26  ;;  %v495_v40 = vsel %vm5226_vm13, %v440_v27, %v494_v24 }
  0x31   : > { %v668_v37 = vld [vmem:[#allocation2 + $0x10] sm:$0xf]  ;;  %v455_v41 = vor.u32 %v453_v21, %v5255_v29  ;;  %770 = vrot.lane.b32.xlu1 %v753_v35, %s5035_s12  ;;  %v752_v42 = vld [vmem:[#allocation2 + $0xc] sm:$0xf]  ;;  %v669_v43 = vld [vmem:[#allocation2 + $0x14] sm:$0x1] }
  0x32   : > { %v524_v38 = vld [vmem:[#allocation2 + $0x10] sm:$0xf]  ;;  %v700_v44 = vrot.slane %v668_v37, 5  ;;  %493 = vst.msk [vmem:[#allocation2 + $0x28] sm:$0xf] %vm367_vm0, %v439_v39  ;;  %v498_v47 = vsel %vm5220_vm12, %v447_v32, %v497_v28  ;;  %768 = vrot.lane.b32.xlu0 %v752_v42, %s5035_s12  ;;  %v703_v49 = vrot.slane %v669_v43, 5 }
  0x33   : > { %v569_v46 = vshll.u32 %v524_v38, 16  ;;  %496 = vst [vmem:[#allocation2 + $0x2c] sm:$0x1] %v495_v40  ;;  %v755_v48 = vld [vmem:[#allocation2 + $0x1c] sm:$0xf]  ;;  %v573_v52 = vshrl.u32 %v524_v38, 16  ;;  %v456_v53 = vsel %vm5214_vm11, %v448_v33, %v455_v41 }
  0x34   : > { %v523_v50 = vld [vmem:[#allocation2 + $0xc] sm:$0xf]  ;;  %499 = vst [vmem:[#allocation2 + $0x30] sm:$0xf] %v498_v47  ;;  %v702_v54 = vrot.slane %v700_v44, 4  ;;  %vm933_vm3 = vcmask 35872  }
  0x35   : > { %v754_v55 = vld [vmem:[#allocation2 + $0x18] sm:$0xf]  ;;  %v560_v56 = vshrl.u32 %v523_v50, 16  ;;  %v563_v57 = vshll.u32 %v523_v50, 16  ;;  %v571_v58 = vrot.slane %v569_v46, 5  ;;  %v575_v60 = vrot.slane %v573_v52, 4  ;;  %774 = vrot.lane.b32.xlu1 %v755_v48, %s5035_s12 }
  0x36   : > { %500 = vst.msk [vmem:[#allocation2 + $0x34] sm:$0xf] %vm367_vm0, %v456_v53  ;;  %v667_v59 = vld [vmem:[#allocation2 + $0xc] sm:$0xe]  ;;  %v525_v45 = vld [vmem:[#allocation2 + $0x14] sm:$0x1]  ;;  %v704_v61 = vsel %vm5192_vm7, %v702_v54, %v703_v49  ;;  %772 = vrot.lane.b32.xlu0 %v754_v55, %s5035_s12 }
  0x37   : > { %v562_v62 = vrot.slane %v560_v56, 4  ;;  %v565_v63 = vrot.slane %v563_v57, 5  ;;  %v4420_v2 = vrot.slane %v667_v59, 9  ;;  %v801_v3 = vld [vmem:[#allocation2 + $0xc] sm:$0xf]  ;;  %v576_v4 = vor.u32 %v575_v60, %v571_v58 }
  0x38   : > { %v579_v5 = vshll.u32 %v525_v45, 16  ;;  %v802_v6 = vld [vmem:[#allocation2 + $0x10] sm:$0xf]  ;;  %v814_v7 = vshrl.u32 %v801_v3, 16  ;;  %v817_v8 = vshll.u32 %v801_v3, 16  ;;  %vm1018_vm4 = vcmask 44072  }
  0x39   : > { %v566_v9 = vor.u32 %v565_v63, %v562_v62  ;;  %v701_v10 = vsel %vm5192_vm7, %v4420_v2, %v700_v44  ;;  %v823_v11 = vshll.u32 %v802_v6, 16  ;;  %v827_v12 = vshrl.u32 %v802_v6, 16  ;;  %v803_v13 = vld [vmem:[#allocation2 + $0x14] sm:$0x1]  ;;  %v804_v14 = vld [vmem:[#allocation2 + $0x18] sm:$0xf]  ;;  %725 = vrot.lane.b32.xlu1 %v704_v61, %s5033_s30 }
  0x3a   : > { %v577_v15 = vrot.slane %v576_v4, 4  ;;  %v581_v16 = vrot.slane %v579_v5, 5  ;;  %v816_v17 = vrot.slane %v814_v7, 4  ;;  %v819_v18 = vrot.slane %v817_v8, 5  ;;  %v805_v19 = vld [vmem:[#allocation2 + $0x1c] sm:$0xf]  ;;  %723 = vrot.lane.b32.xlu0 %v701_v10, %s5033_s30 }
  0x3b   : > { %v567_v20 = vrot.slane %v566_v9, 4  ;;  %v825_v21 = vrot.slane %v823_v11, 5  ;;  %v829_v22 = vrot.slane %v827_v12, 4  ;;  %v833_v23 = vshll.u32 %v803_v13, 16  ;;  %v806_v32 = vld [vmem:[#allocation2 + $0x20] sm:$0x1] }
  0x3c   : > { %v820_v24 = vor.u32 %v819_v18, %v816_v17  ;;  %v838_v25 = vshrl.u32 %v804_v14, 16  ;;  %v841_v26 = vshll.u32 %v804_v14, 16  ;;  %v847_v31 = vshll.u32 %v805_v19, 16  ;;  %v942_v42 = vld [vmem:[#allocation2 + $0xc] sm:$0xe] }
  0x3d   : > { %v572_v27 = vsel %vm5208_vm10, %v567_v20, %v571_v58  ;;  %v830_v28 = vor.u32 %v829_v22, %v825_v21  ;;  %v851_v37 = vshrl.u32 %v805_v19, 16  ;;  %v582_v38 = vsel %vm5208_vm10, %v577_v15, %v581_v16  ;;  %v943_v48 = vld [vmem:[#allocation2 + $0x10] sm:$0xf]  ;;  %v945_v53 = vld [vmem:[#allocation2 + $0x18] sm:$0xe] }
  0x3e   : > { %v821_v33 = vrot.slane %v820_v24, 4  ;;  %v840_v34 = vrot.slane %v838_v25, 4  ;;  %v843_v35 = vrot.slane %v841_v26, 5  ;;  %635 = vrot.lane.b32.xlu1 %v572_v27, %s5034_s11  ;;  %v835_v40 = vrot.slane %v833_v23, 5  ;;  %v1077_v55 = vld [vmem:[#allocation2 + $0x18] sm:$0xf] }
  0x3f   : > { %v831_v39 = vrot.slane %v830_v28, 4  ;;  %v849_v41 = vrot.slane %v847_v31, 5  ;;  %v853_v46 = vrot.slane %v851_v37, 4  ;;  %v857_v47 = vshll.u32 %v806_v32, 16  ;;  %v944_v45 = vld [vmem:[#allocation2 + $0x14] sm:$0x1] }
  0x40   : > { %v826_v43 = vsel %vm5208_vm10, %v821_v33, %v825_v21  ;;  %v844_v44 = vor.u32 %v843_v35, %v840_v34  ;;  %v4423_v52 = vrot.slane %v942_v42, 9  ;;  %v968_v54 = vrot.slane %v943_v48, 5  ;;  %v946_v60 = vld [vmem:[#allocation2 + $0x1c] sm:$0xf]  ;;  %v1080_v6 = vld [vmem:[#allocation2 + $0x24] sm:$0xf] }
  0x41   : > { %909 = vrot.lane.b32.xlu0 %v826_v43, %s6702_s18  ;;  %v854_v50 = vor.u32 %v853_v46, %v849_v41  ;;  %v836_v56 = vsel %vm5208_vm10, %v831_v39, %v835_v40  ;;  %v859_v59 = vrot.slane %v857_v47, 5  ;;  %v4424_v61 = vrot.slane %v945_v53, 9  ;;  %v947_v8 = vld [vmem:[#allocation2 + $0x20] sm:$0x1]  ;;  %v1078_v9 = vld [vmem:[#allocation2 + $0x1c] sm:$0xf] }
  0x42   : > { %v845_v49 = vrot.slane %v844_v44, 4  ;;  %637 = vrot.lane.b32.xlu1 %v582_v38, %s5034_s11  ;;  %v969_v62 = vsel %vm5192_vm7, %v4423_v52, %v968_v54  ;;  %v1090_v63 = vshrl.u32 %v1077_v55, 16  ;;  %v1093_v2 = vshll.u32 %v1077_v55, 16  ;;  %v1081_v11 = vld [vmem:[#allocation2 + $0x28] sm:$0xf] }
  0x43   : > { %v855_v58 = vrot.slane %v854_v50, 4  ;;  %v970_v3 = vrot.slane %v968_v54, 4  ;;  %v971_v4 = vrot.slane %v944_v45, 5  ;;  %v975_v5 = vrot.slane %v946_v60, 5  ;;  %v1079_v21 = vld [vmem:[#allocation2 + $0x20] sm:$0x1] }
  0x44   : > { %v850_v57 = vsel %vm5208_vm10, %v845_v49, %v849_v41  ;;  %v1092_v12 = vrot.slane %v1090_v63, 4  ;;  %v1095_v13 = vrot.slane %v1093_v2, 5  ;;  %v1114_v14 = vshrl.u32 %v1080_v6, 16  ;;  %v5307_v24 = vld [vmem:[#allocation2 + $0x3c] sm:$0xf] }
  0x45   : > { %913 = vrot.lane.b32.xlu0 %v850_v57, %s6702_s18  ;;  %v860_v7 = vsel %vm5208_vm10, %v855_v58, %v859_v59  ;;  %v976_v10 = vsel %vm5192_vm7, %v4424_v61, %v975_v5  ;;  %v1117_v15 = vshll.u32 %v1080_v6, 16  ;;  %v972_v16 = vsel %vm5192_vm7, %v970_v3, %v971_v4  ;;  %v1028_v25 = vld [vmem:[#allocation2 + $0x18] sm:$0xf]  ;;  %v1082_v38 = vld [vmem:[#allocation2 + $0x2c] sm:$0x1] }
  0x46   : > { %911 = vrot.lane.b32.xlu1 %v836_v56, %s6702_s18  ;;  %v978_v17 = vrot.slane %v947_v8, 5  ;;  %v1099_v18 = vshll.u32 %v1078_v9, 16  ;;  %v977_v19 = vrot.slane %v975_v5, 4  ;;  %v1103_v20 = vshrl.u32 %v1078_v9, 16  ;;  %v526_v31 = vld [vmem:[#allocation2 + $0x18] sm:$0xf] }
  0x47   : > { %v1123_v22 = vshll.u32 %v1081_v11, 16  ;;  %v1127_v23 = vshrl.u32 %v1081_v11, 16  ;;  %v1096_v26 = vor.u32 %v1095_v13, %v1092_v12  ;;  %v1116_v27 = vrot.slane %v1114_v14, 4  ;;  %v527_v40 = vld [vmem:[#allocation2 + $0x1c] sm:$0xf] }
  0x48   : > { %v1119_v28 = vrot.slane %v1117_v15, 5  ;;  %v1101_v32 = vrot.slane %v1099_v18, 5  ;;  %v1109_v33 = vshll.u32 %v1079_v21, 16  ;;  %v979_v34 = vsel %vm5192_vm7, %v977_v19, %v978_v17  ;;  %v1030_v46 = vld [vmem:[#allocation2 + $0x24] sm:$0xf] }
  0x49   : > { %994 = vrot.lane.b32.xlu0 %v969_v62, %s5037_s20  ;;  %v1105_v35 = vrot.slane %v1103_v20, 4  ;;  %v5312_v37 = vrot.slane %v1123_v22, 5  ;;  %v1129_v39 = vrot.slane %v1127_v23, 4  ;;  %v584_v41 = vshrl.u32 %v526_v31, 16  ;;  %v529_v49 = vld [vmem:[#allocation2 + $0x24] sm:$0xf] }
  0x4a   : > { %915 = vrot.lane.b32.xlu1 %v860_v7, %s6702_s18  ;;  %v587_v42 = vshll.u32 %v526_v31, 16  ;;  %v1162_v43 = vshrl.u32 %v5307_v24, 16  ;;  %v1165_v44 = vshll.u32 %v5307_v24, 16  ;;  %v1097_v47 = vrot.slane %v1096_v26, 4  ;;  %v1218_v54 = vld [vmem:[#allocation2 + $0x18] sm:$0xe] }
  0x4b   : > { %v1120_v48 = vor.u32 %v1119_v28, %v1116_v27  ;;  %v457_v50 = vrot.slane %v5255_v29, 4  ;;  %v5319_v52 = vrot.slane %v1109_v33, 5  ;;  %v1133_v53 = vshll.u32 %v1082_v38, 16  ;;  %v1219_v55 = vld [vmem:[#allocation2 + $0x1c] sm:$0xf] }
  0x4c   : > { %v1029_v56 = vld [vmem:[#allocation2 + $0x1c] sm:$0xf]  ;;  %v1106_v57 = vor.u32 %v1105_v35, %v1101_v32  ;;  %v1130_v58 = vor.u32 %v1129_v39, %v5312_v37  ;;  %v593_v59 = vshll.u32 %v527_v40, 16  ;;  %v597_v45 = vshrl.u32 %v527_v40, 16  ;;  %v1031_v2 = vld [vmem:[#allocation2 + $0x28] sm:$0xf] }
  0x4d   : > { %998 = vrot.lane.b32.xlu0 %v976_v10, %s5037_s20  ;;  %v586_v60 = vrot.slane %v584_v41, 4  ;;  %v589_v61 = vrot.slane %v587_v42, 5  ;;  %v608_v62 = vshrl.u32 %v529_v49, 16  ;;  %v611_v63 = vshll.u32 %v529_v49, 16  ;;  %v5325_v7 = vld [vmem:[#allocation2 + $0x20] sm:$0x1] }
  0x4e   : > { %996 = vrot.lane.b32.xlu1 %v972_v16, %s5037_s20  ;;  %v1102_v3 = vsel %vm5208_vm10, %v1097_v47, %v1101_v32  ;;  %v1121_v4 = vrot.slane %v1120_v48, 4  ;;  %v4427_v5 = vrot.slane %v1218_v54, 9  ;;  %v1244_v6 = vrot.slane %v1219_v55, 5  ;;  %v528_v8 = vld [vmem:[#allocation2 + $0x20] sm:$0x1] }
  0x4f   : > { %v5328_v9 = vld [vmem:[#allocation2 + $0x24] sm:$0xe]  ;;  %v5330_v10 = vld [vmem:[#allocation2 + $0x28] sm:$0xf]  ;;  %v1107_v11 = vrot.slane %v1106_v57, 4  ;;  %v5332_v12 = vrot.slane %v1133_v53, 5  ;;  %v590_v17 = vor.u32 %v589_v61, %v586_v60 }
  0x50   : > { %v5334_v13 = vrot.slane %v593_v59, 5  ;;  %v599_v14 = vrot.slane %v597_v45, 4  ;;  %v530_v15 = vld [vmem:[#allocation2 + $0x28] sm:$0xf]  ;;  %v1131_v16 = vrot.slane %v1130_v58, 4  ;;  %v610_v18 = vrot.slane %v608_v62, 4 }
  0x51   : > { %1044 = vrot.lane.b32.xlu0 %v1028_v25, %s5038_s21  ;;  %v613_v19 = vrot.slane %v611_v63, 5  ;;  %v531_v20 = vld [vmem:[#allocation2 + $0x2c] sm:$0x1]  ;;  %v1126_v21 = vsel %vm5208_vm10, %v1121_v4, %v5312_v37  ;;  %v1247_v22 = vrot.slane %v5325_v7, 5  ;;  %v603_v23 = vshll.u32 %v528_v8, 16 }
  0x52   : > { %1000 = vrot.lane.b32.xlu1 %v979_v34, %s5037_s20  ;;  %v1251_v25 = vrot.slane %v5330_v10, 5  ;;  %v5342_v26 = vld [vmem:[#allocation2 + $0x2c] sm:$0x1]  ;;  %v1245_v27 = vsel %vm5192_vm7, %v4427_v5, %v1244_v6  ;;  %v1246_v28 = vrot.slane %v1244_v6, 4  ;;  %v617_v31 = vshll.u32 %v530_v15, 16 }
  0x53   : > { %v621_v32 = vshrl.u32 %v530_v15, 16  ;;  %v807_v33 = vld [vmem:[#allocation2 + $0x24] sm:$0xf]  ;;  %v1112_v34 = vsel %vm5208_vm10, %v1107_v11, %v5319_v52  ;;  %v600_v35 = vor.u32 %v599_v14, %v5334_v13  ;;  %v4428_v37 = vrot.slane %v5328_v9, 9  ;;  %v5352_v39 = vld [vmem:[#allocation2 + $0x1c] sm:$0xf] }
  0x54   : > { %v627_v38 = vshll.u32 %v531_v20, 16  ;;  %v501_v40 = vld [vmem:[#allocation2 + $0x38] sm:$0x1]  ;;  %v1136_v41 = vsel %vm5208_vm10, %v1131_v16, %v5332_v12  ;;  %v591_v42 = vrot.slane %v590_v17, 4  ;;  %v614_v47 = vor.u32 %v613_v19, %v610_v18  ;;  %v5359_v48 = vld [vmem:[#allocation2 + $0x18] sm:$0xe] }
  0x55   : > { %1048 = vrot.lane.b32.xlu0 %v1030_v46, %s5038_s21  ;;  %v1254_v46 = vrot.slane %v5342_v26, 5  ;;  %v5361_v49 = vld [vmem:[#allocation2 + $0x20] sm:$0x1]  ;;  %v5363_v52 = vrot.slane %v603_v23, 5  ;;  %v5367_v53 = vrot.slane %v1251_v25, 4  ;;  %v862_v55 = vshrl.u32 %v807_v33, 16 }
  0x56   : > { %1046 = vrot.lane.b32.xlu1 %v1029_v56, %s5038_s21  ;;  %v5369_v54 = vld [vmem:[#allocation2 + $0x24] sm:$0xe]  ;;  %v865_v56 = vshll.u32 %v807_v33, 16  ;;  %v5372_v57 = vrot.slane %v617_v31, 5  ;;  %v623_v58 = vrot.slane %v621_v32, 4  ;;  %v707_v59 = vrot.slane %v5352_v39, 5 }
  0x57   : > { %v5375_v45 = vld [vmem:[#allocation2 + $0x28] sm:$0xf]  ;;  %v502_v61 = vsel %vm5226_vm13, %v457_v50, %v501_v40  ;;  %v5381_v62 = vrot.slane %v600_v35, 4  ;;  %v5383_v63 = vrot.slane %v627_v38, 5  ;;  %v810_v4 = vld [vmem:[#allocation2 + $0x30] sm:$0xf]  ;;  %v1248_v5 = vsel %vm5192_vm7, %v1246_v28, %v1247_v22 }
  0x58   : > { %v808_v60 = vld [vmem:[#allocation2 + $0x28] sm:$0xf]  ;;  %503 = vst [vmem:[#allocation2 + $0x38] sm:$0x1] %v502_v61  ;;  %v596_v51 = vsel %vm5208_vm10, %v591_v42, %v5334_v13  ;;  %v5393_v29 = vrot.slane %v614_v47, 4  ;;  %v4422_v50 = vrot.slane %v5369_v54, 9  ;;  %v624_v14 = vor.u32 %v623_v58, %v5372_v57 }
  0x59   : > { %1185 = vrot.lane.b32.xlu0 %v1102_v3, %s5039_s25  ;;  %v710_v3 = vrot.slane %v5361_v49, 5  ;;  %v809_v6 = vld [vmem:[#allocation2 + $0x2c] sm:$0x1]  ;;  %v811_v7 = vld [vmem:[#allocation2 + $0x34] sm:$0xf]  ;;  %v864_v8 = vrot.slane %v862_v55, 4  ;;  %v1252_v22 = vsel %vm5192_vm7, %v4428_v37, %v1251_v25  ;;  %v606_v10 = vsel %vm5208_vm10, %v5381_v62, %v5363_v52 }
  0x5a   : > { %1050 = vrot.lane.b32.xlu1 %v1031_v2, %s5038_s21  ;;  %v4421_v2 = vrot.slane %v5359_v48, 9  ;;  %v867_v9 = vrot.slane %v865_v56, 5  ;;  %v871_v11 = vshll.u32 %v808_v60, 16  ;;  %v875_v12 = vshrl.u32 %v808_v60, 16  ;;  %v5402_v16 = vld [vmem:[#allocation2 + $0x2c] sm:$0x1] }
  0x5b   : > { %v5400_v15 = vrot.slane %v707_v59, 4  ;;  %v886_v13 = vshrl.u32 %v810_v4, 16  ;;  %v889_v17 = vshll.u32 %v810_v4, 16  ;;  %v714_v18 = vrot.slane %v5375_v45, 5  ;;  %v1083_v23 = vld [vmem:[#allocation2 + $0x30] sm:$0xf] }
  0x5c   : > { %v881_v19 = vshll.u32 %v809_v6, 16  ;;  %v895_v20 = vshll.u32 %v811_v7, 16  ;;  %v507_v28 = vld [vmem:[#allocation2 + $0x10] sm:$0xf]  ;;  %v717_v31 = vrot.slane %v5402_v16, 5  ;;  %v868_v32 = vor.u32 %v867_v9, %v864_v8 }
  0x5d   : > { %1189 = vrot.lane.b32.xlu0 %v1126_v21, %s5039_s25  ;;  %v899_v21 = vshrl.u32 %v811_v7, 16  ;;  %v5411_v33 = vrot.slane %v871_v11, 5  ;;  %515 = vst.msk [vmem:[#allocation3 + $0xc] sm:$0xf] %vm367_vm0, %v507_v28  ;;  %v508_v35 = vld [vmem:[#allocation2 + $0x18] sm:$0xf]  ;;  %v620_v62 = vsel %vm5208_vm10, %v5393_v29, %v5372_v57  ;;  %v1255_v29 = vsel %vm5192_vm7, %v5367_v53, %v1254_v46 }
  0x5e   : > { %1187 = vrot.lane.b32.xlu1 %v1112_v34, %s5039_s25  ;;  %v877_v34 = vrot.slane %v875_v12, 4  ;;  %v888_v25 = vrot.slane %v886_v13, 4  ;;  %v891_v37 = vrot.slane %v889_v17, 5  ;;  %v5420_v38 = vld [vmem:[#allocation2 + $0x24] sm:$0xe]  ;;  %v5425_v42 = vrot.slane %v895_v20, 5 }
  0x5f   : > { %v5422_v40 = vld [vmem:[#allocation2 + $0x28] sm:$0xf]  ;;  %516 = vst.msk [vmem:[#allocation3 + $0x10] sm:$0xf] %vm367_vm0, %v508_v35  ;;  %v901_v47 = vrot.slane %v899_v21, 4  ;;  %v1138_v56 = vshrl.u32 %v1083_v23, 16  ;;  %v708_v26 = vsel %vm5192_vm7, %v4421_v2, %v707_v59 }
  0x60   : > { %v5427_v55 = vld [vmem:[#allocation2 + $0x34] sm:$0xf]  ;;  %v5432_v52 = vrot.slane %v714_v18, 4  ;;  %v5434_v58 = vrot.slane %v881_v19, 5  ;;  %v509_v61 = vld [vmem:[#allocation2 + $0x1c] sm:$0xf]  ;;  %v892_v9 = vor.u32 %v891_v37, %v888_v25  ;;  %v715_v37 = vsel %vm5192_vm7, %v4422_v50, %v714_v18 }
  0x61   : > { %1270 = vrot.lane.b32.xlu0 %v1245_v27, %s5040_s26  ;;  %v506_v27 = vld [vmem:[#allocation2 + $0xc] sm:$0xf]  ;;  %v1084_v60 = vld [vmem:[#allocation2 + $0x34] sm:$0xf]  ;;  %v5440_v4 = vrot.slane %v868_v32, 4  ;;  %v1141_v6 = vshll.u32 %v1083_v23, 16  ;;  %v902_v17 = vor.u32 %v901_v47, %v5425_v42 }
  0x62   : > { %1191 = vrot.lane.b32.xlu1 %v1136_v41, %s5039_s25  ;;  %514 = vst.msk [vmem:[#allocation3 + $0x8] sm:$0xf] %vm367_vm0, %v506_v27  ;;  %v625_v41 = vrot.slane %v624_v14, 4  ;;  %517 = vst.msk [vmem:[#allocation3 + $0x14] sm:$0xf] %vm367_vm0, %v509_v61  ;;  %v4425_v11 = vrot.slane %v5420_v38, 9  ;;  %v718_v49 = vsel %vm5192_vm7, %v5432_v52, %v717_v31 }
  0x63   : > { %v510_v7 = vld [vmem:[#allocation2 + $0x24] sm:$0xf]  ;;  %v511_v8 = vld [vmem:[#allocation2 + $0x28] sm:$0xf]  ;;  %v982_v12 = vrot.slane %v5422_v40, 5  ;;  %v989_v57 = vrot.slane %v5427_v55, 5  ;;  %v874_v16 = vsel %vm5208_vm10, %v5440_v4, %v5411_v33 }
  0x64   : > { %v5449_v14 = vld [vmem:[#allocation2 + $0x30] sm:$0xe]  ;;  %518 = vst.msk [vmem:[#allocation3 + $0x18] sm:$0xf] %vm367_vm0, %v510_v7  ;;  %519 = vst.msk [vmem:[#allocation3 + $0x1c] sm:$0xf] %vm367_vm0, %v511_v8  ;;  %v630_v23 = vsel %vm5208_vm10, %v625_v41, %v5383_v63 }
  0x65   : > { %639 = vrot.lane.b32.xlu0 %v596_v51, %s5034_s11  ;;  %v5443_v51 = vld [vmem:[#allocation2 + $0x2c] sm:$0x1]  ;;  %v812_v13 = vld [vmem:[#allocation2 + $0x38] sm:$0x1]  ;;  %v1140_v19 = vrot.slane %v1138_v56, 4  ;;  %v1147_v20 = vshll.u32 %v1084_v60, 16 }
  0x66   : > { %1272 = vrot.lane.b32.xlu1 %v1248_v5, %s5040_s26  ;;  %v878_v5 = vor.u32 %v877_v34, %v5411_v33  ;;  %v5460_v21 = vld [vmem:[#allocation2 + $0x40] sm:$0xf]  ;;  %v1143_v46 = vrot.slane %v1141_v6, 5  ;;  %v1151_v53 = vshrl.u32 %v1084_v60, 16  ;;  %v893_v28 = vrot.slane %v892_v9, 4 }
  0x67   : > { %v985_v32 = vrot.slane %v5443_v51, 5  ;;  %v4426_v34 = vrot.slane %v5449_v14, 9  ;;  %v903_v35 = vrot.slane %v902_v17, 4  ;;  %v984_v39 = vrot.slane %v982_v12, 4  ;;  %v4872_v24 = vld [vmem:[%s6691_s1] sm:$0x1f]  }
  0x68   : > { %v879_v27 = vrot.slane %v878_v5, 4  ;;  %v991_v48 = vrot.slane %v989_v57, 4  ;;  %v5485_v63 = vrot.slane %v1162_v43, 4  ;;  %v5489_v2 = vrot.slane %v1165_v44, 5  ;;  %v756_v44 = vld [vmem:[#allocation2 + $0x24] sm:$0xf] }
  0x69   : > { %1274 = vrot.lane.b32.xlu0 %v1252_v22, %s5040_s26  ;;  %v5463_v22 = vld [vmem:[#allocation2 + $0x38] sm:$0x1]  ;;  %v1171_v25 = vshll.u32 %v5460_v21, 16  ;;  %v1144_v41 = vor.u32 %v1143_v46, %v1140_v19  ;;  %v5498_v47 = vrot.slane %v1147_v20, 5  ;;  %v1153_v56 = vrot.slane %v1151_v53, 4 }
  0x6a   : > { %641 = vrot.lane.b32.xlu1 %v606_v10, %s5034_s11  ;;  %v905_v10 = vshll.u32 %v812_v13, 16  ;;  %v992_v59 = vrot.slane %v5463_v22, 5  ;;  %v711_v43 = vsel %vm5192_vm7, %v5400_v15, %v710_v3  ;;  %v1175_v45 = vshrl.u32 %v5460_v21, 16  ;;  %v758_v3 = vld [vmem:[#allocation2 + $0x30] sm:$0xf] }
  0x6b   : > { %v5041_v50 = vmov 65535   ;;  %v1145_v60 = vrot.slane %v1144_v41, 4  ;;  %v757_v15 = vld [vmem:[#allocation2 + $0x28] sm:$0xf]  ;;  %v759_v5 = vld [vmem:[#allocation2 + $0x34] sm:$0xf]  ;;  %v898_v31 = vsel %vm5208_vm10, %v893_v28, %v5425_v42  ;;  %v884_v52 = vsel %vm5208_vm10, %v879_v27, %v5434_v58 }
  0x6c   : > { %v907_v54 = vrot.slane %v905_v10, 5  ;;  %v1353_v18 = vsel %vm1351_vm14, 4294967295, %v5041_v50  ;;  %v983_v33 = vsel %vm5192_vm7, %v4425_v11, %v982_v12  ;;  %v990_v58 = vsel %vm5192_vm7, %v4426_v34, %v989_v57  ;;  %v1032_v40 = vld [vmem:[#allocation2 + $0x30] sm:$0xf]  ;;  %v1085_v4 = vld [vmem:[#allocation2 + $0x38] sm:$0x1] }
  0x6d   : > { %643 = vrot.lane.b32.xlu0 %v620_v62, %s5034_s11  ;;  %v1354_v61 = vsel %vm1352_vm15, %v1353_v18, 0  ;;  %v986_v38 = vsel %vm5192_vm7, %v984_v39, %v985_v32  ;;  %v993_v51 = vsel %vm5192_vm7, %v991_v48, %v992_v59  ;;  %v1034_v6 = vld [vmem:[#allocation2 + $0x3c] sm:$0xf]  ;;  %v1168_v55 = vor.u32 %v5489_v2, %v5485_v63  ;;  %v1033_v7 = vld [vmem:[#allocation2 + $0x34] sm:$0xf] }
  0x6e   : > { %1276 = vrot.lane.b32.xlu1 %v1255_v29, %s5040_s26  ;;  %v1356_v62 = vand.u32 %v4872_v24, %v1354_v61  ;;  %v908_v42 = vsel %vm5208_vm10, %v903_v35, %v907_v54  ;;  %v1154_v8 = vor.u32 %v1153_v56, %v5498_v47  ;;  %v1157_v9 = vshll.u32 %v1085_v4, 16  ;;  %v1088_v14 = vld [vmem:[#allocation2 + $0x44] sm:$0x1]  ;;  %v1224_v17 = vld [vmem:[#allocation2 + $0x30] sm:$0xe] }
  0x6f   : > { %v1173_v11 = vrot.slane %v1171_v25, 5  ;;  %v1177_v12 = vrot.slane %v1175_v45, 4  ;;  %v1150_v29 = vsel %vm5208_vm10, %v1145_v60, %v5498_v47  ;;  %v1169_v13 = vrot.slane %v1168_v55, 4  ;;  %v1035_v19 = vld [vmem:[#allocation2 + $0x40] sm:$0xf] }
  0x70   : > { %4781 = vmatprep.subr.bf16.mxu0 %v1356_v62  ;;  %v1155_v20 = vrot.slane %v1154_v8, 4  ;;  %v1159_v21 = vrot.slane %v1157_v9, 5  ;;  %vm655_vm0 = vcmask 11272   ;;  %v4429_v53 = vrot.slane %v1224_v17, 9  ;;  %v1227_v27 = vld [vmem:[#allocation2 + $0x3c] sm:$0xe] }
  0x71   : > { %727 = vrot.lane.b32.xlu0 %v708_v26, %s5033_s30  ;;  %4782 = vmatpush3.bf16.msra.mxu0 %v1356_v62  ;;  %v1178_v22 = vor.u32 %v1177_v12, %v1173_v11  ;;  %v1225_v26 = vld [vmem:[#allocation2 + $0x34] sm:$0xf]  ;;  %v1174_v46 = vsel %vm5208_vm10, %v1169_v13, %v1173_v11  ;;  %v1226_v39 = vld [vmem:[#allocation2 + $0x38] sm:$0x1]  ;;  %v1228_v48 = vld [vmem:[#allocation2 + $0x40] sm:$0xf] }
  0x72   : > { %645 = vrot.lane.b32.xlu1 %v630_v23, %s5034_s11  ;;  %v1181_v23 = vshll.u32 %v1088_v14, 16  ;;  %v1160_v28 = vsel %vm5208_vm10, %v1155_v20, %v1159_v21  ;;  %v1258_v10 = vrot.slane %v1225_v26, 5  ;;  %v4430_v63 = vrot.slane %v1227_v27, 9  ;;  %v1229_v24 = vld [vmem:[#allocation2 + $0x44] sm:$0x1]  ;;  %s5044_s11 = smov 96  }
  0x73   : > { %v1179_v34 = vrot.slane %v1178_v22, 4  ;;  %v1261_v47 = vrot.slane %v1226_v39, 5  ;;  %v1265_v56 = vrot.slane %v1228_v48, 5  ;;  %v1268_v45 = vrot.slane %v1229_v24, 5 }
  0x74   : > { %v1183_v35 = vrot.slane %v1181_v23, 5  ;;  %v1259_v59 = vsel %vm5192_vm7, %v4429_v53, %v1258_v10  ;;  %v1260_v41 = vrot.slane %v1258_v10, 4  ;;  %vm1068_vm5 = vcmask 52272  }
  0x75   : > { %731 = vrot.lane.b32.xlu0 %v715_v37, %s5033_s30  ;;  %v1267_v54 = vrot.slane %v1265_v56, 4  ;;  %vm1209_vm8 = vcmask 60472   ;;  %vm1294_vm12 = vcmask 68672   ;;  %vm1338_vm13 = vcmask 72704  }
  0x76   : > { %729 = vrot.lane.b32.xlu1 %v711_v43, %s5033_s30  ;;  %v1184_v25 = vsel %vm5208_vm10, %v1179_v34, %v1183_v35  ;;  %v1266_v43 = vsel %vm5192_vm7, %v4430_v63, %v1265_v56  ;;  %vm1465_vm14 = vcmask 257024   ;;  %vm1468_vm15 = vcmask 253952  }
  0x77   : > { %v1269_v60 = vsel %vm5192_vm7, %v1267_v54, %v1268_v45  ;;  %1473 = vst.msk [vmem:[#allocation4 + $0x18] sm:$0xf] %vm1465_vm14, %v5032_v0  ;;  %1466 = vst.msk [vmem:[#allocation4] sm:$0xf] %vm1465_vm14, %v5032_v0 }
  0x78   : > { %1467 = vst.msk [vmem:[#allocation4 + $0x4] sm:$0xf] %vm1465_vm14, %v5032_v0  ;;  %1470 = vst.msk [vmem:[#allocation4 + $0xc] sm:$0xf] %vm1465_vm14, %v5032_v0 }
  0x79   : > { %776 = vrot.lane.b32.xlu0 %v756_v44, %s5035_s12  ;;  %v1262_v44 = vsel %vm5192_vm7, %v1260_v41, %v1261_v47  ;;  %1471 = vst.msk [vmem:[#allocation4 + $0x10] sm:$0xf] %vm1465_vm14, %v5032_v0  ;;  %1474 = vst.msk [vmem:[#allocation4 + $0x1c] sm:$0xf] %vm1465_vm14, %v5032_v0 }
  0x7a   : > { %733 = vrot.lane.b32.xlu1 %v718_v49, %s5033_s30  ;;  %1476 = vst.msk [vmem:[#allocation4 + $0x24] sm:$0xf] %vm1465_vm14, %v5032_v0  ;;  %1477 = vst.msk [vmem:[#allocation4 + $0x28] sm:$0xf] %vm1465_vm14, %v5032_v0  ;;  %s6701_s30 = smov 64  }
  0x7b   : > { %1479 = vst.msk [vmem:[#allocation4 + $0x30] sm:$0xf] %vm1465_vm14, %v5032_v0  ;;  %1480 = vst.msk [vmem:[#allocation4 + $0x34] sm:$0xf] %vm1465_vm14, %v5032_v0 }
  0x7c   : > { %1482 = vst.msk [vmem:[#allocation4 + $0x3c] sm:$0xf] %vm1465_vm14, %v5032_v0  ;;  %1483 = vst.msk [vmem:[#allocation4 + $0x40] sm:$0xf] %vm1465_vm14, %v5032_v0 }
  0x7d   : > { %780 = vrot.lane.b32.xlu0 %v758_v3, %s5035_s12  ;;  %1475 = vst.msk [vmem:[#allocation4 + $0x20] sm:$0x1] %vm1468_vm15, %v5032_v0  ;;  %1469 = vst.msk [vmem:[#allocation4 + $0x8] sm:$0x1] %vm1468_vm15, %v5032_v0 }
  0x7e   : > { %778 = vrot.lane.b32.xlu1 %v757_v15, %s5035_s12  ;;  %1472 = vst.msk [vmem:[#allocation4 + $0x14] sm:$0x1] %vm1468_vm15, %v5032_v0  ;;  %1478 = vst.msk [vmem:[#allocation4 + $0x2c] sm:$0x1] %vm1468_vm15, %v5032_v0 }
  0x7f   : > { %1481 = vst.msk [vmem:[#allocation4 + $0x38] sm:$0x1] %vm1468_vm15, %v5032_v0  ;;  %1484 = vst.msk [vmem:[#allocation4 + $0x44] sm:$0x1] %vm1468_vm15, %v5032_v0 }
  0x81   : > { %917 = vrot.lane.b32.xlu0 %v874_v16, %s6702_s18 }
  0x82   : > { %782 = vrot.lane.b32.xlu1 %v759_v5, %s5035_s12 }
  0x85   : > { %921 = vrot.lane.b32.xlu0 %v898_v31, %s6702_s18 }
  0x86   : > { %919 = vrot.lane.b32.xlu1 %v884_v52, %s6702_s18 }
  0x89   : > { %1002 = vrot.lane.b32.xlu0 %v983_v33, %s5037_s20 }
  0x8a   : > { %923 = vrot.lane.b32.xlu1 %v908_v42, %s6702_s18 }
  0x8d   : > { %1006 = vrot.lane.b32.xlu0 %v990_v58, %s5037_s20 }
  0x8e   : > { %1004 = vrot.lane.b32.xlu1 %v986_v38, %s5037_s20 }
  0x91   : > { %1052 = vrot.lane.b32.xlu0 %v1032_v40, %s5038_s21 }
  0x92   : > { %1008 = vrot.lane.b32.xlu1 %v993_v51, %s5037_s20 }
  0x93   : > { %v720_v57 = vpop.permute.xlu0 %719 }
  0x95   : > { %1056 = vrot.lane.b32.xlu0 %v1034_v6, %s5038_s21 }
  0x96   : > { %1054 = vrot.lane.b32.xlu1 %v1033_v7, %s5038_s21 }
  0x97   : > { %v722_v2 = vpop.permute.xlu1 %721 }
  0x99   : > { %1193 = vrot.lane.b32.xlu0 %v1150_v29, %s5039_s25 }
  0x9a   : > { %1058 = vrot.lane.b32.xlu1 %v1035_v19, %s5038_s21  ;;  %v632_v32 = vpop.permute.xlu0 %631 }
  0x9b   : > { %656 = vst.msk [vmem:[#allocation3] sm:$0xf] %vm655_vm0, %v632_v32 }
  0x9c   : > { %744 = vst.msk [vmem:[#allocation3] sm:$0xf] %vm743_vm1, %v720_v57 }
  0x9d   : > { %1197 = vrot.lane.b32.xlu0 %v1174_v46, %s5039_s25 }
  0x9e   : > { %1195 = vrot.lane.b32.xlu1 %v1160_v28, %s5039_s25  ;;  %v634_v37 = vpop.permute.xlu0 %633 }
  0x9f   : > { %657 = vst.msk [vmem:[#allocation3 + $0x4] sm:$0xf] %vm655_vm0, %v634_v37 }
  0xa0   : > { %745 = vst.msk [vmem:[#allocation3 + $0x4] sm:$0xf] %vm743_vm1, %v722_v2 }
  0xa1   : > { %1278 = vrot.lane.b32.xlu0 %v1259_v59, %s5040_s26 }
  0xa2   : > { %1199 = vrot.lane.b32.xlu1 %v1184_v25, %s5039_s25  ;;  %s350_s25 = sand.u32 1, %s5022_s14  }
  0xa3   : > { %v771_v50 = vpop.permute.xlu1 %770 }
  0xa4   : > { %794 = vst.msk [vmem:[#allocation3 + $0x4] sm:$0xf] %vm792_vm2, %v771_v50  ;;  %v769_v18 = vpop.permute.xlu0 %768 }
  0xa5   : > { %1282 = vrot.lane.b32.xlu0 %v1266_v43, %s5040_s26  ;;  %793 = vst.msk [vmem:[#allocation3] sm:$0xf] %vm792_vm2, %v769_v18 }
  0xa6   : > { %1280 = vrot.lane.b32.xlu1 %v1262_v44, %s5040_s26 }
  0xa7   : > { %v775_v61 = vpop.permute.xlu1 %774 }
  0xa8   : > { %v773_v62 = vpop.permute.xlu0 %772 }
  0xaa   : > { %1284 = vrot.lane.b32.xlu1 %v1269_v60, %s5040_s26  ;;  %s4618_s26 = sshll.u32 %s5122_s17, 9  ;;  %s4337_s17 = scalar_lea.sflag [#allocation9], %s350_s25 }
  0xab   : > { %v726_v49 = vpop.permute.xlu1 %725  ;;  %s6644_s20 = scalar_lea.hbm %s6700_s10, %s4618_s26 }
  0xac   : > { %v724_v3 = vpop.permute.xlu0 %723 }
  0xb0   : > { %v636_v15 = vpop.permute.xlu1 %635 }
  0xb1   : > { %658 = vst.msk [vmem:[#allocation3 + $0x8] sm:$0xf] %vm655_vm0, %v636_v15 }
  0xb2   : > { %746 = vst.msk [vmem:[#allocation3 + $0x8] sm:$0xf] %vm743_vm1, %v724_v3 }
  0xb3   : > { %v910_v5 = vpop.permute.xlu0 %909  ;;  %795 = vst.msk [vmem:[#allocation3 + $0x8] sm:$0xf] %vm792_vm2, %v773_v62 }
  0xb4   : > { %934 = vst.msk [vmem:[#allocation3] sm:$0xf] %vm933_vm3, %v910_v5  ;;  %v638_v16 = vpop.permute.xlu1 %637 }
  0xb5   : > { %659 = vst.msk [vmem:[#allocation3 + $0xc] sm:$0xf] %vm655_vm0, %v638_v16 }
  0xb6   : > { %747 = vst.msk [vmem:[#allocation3 + $0xc] sm:$0xf] %vm743_vm1, %v726_v49  ;;  %v1634_v49 = vld [vmem:[#allocation4] sm:$0xf] }
  0xb7   : > { %v914_v31 = vpop.permute.xlu0 %913  ;;  %796 = vst.msk [vmem:[#allocation3 + $0xc] sm:$0xf] %vm792_vm2, %v775_v61  ;;  %v1647_v3 = vshrl.u32 %v1634_v49, 16  ;;  %v1650_v15 = vshll.u32 %v1634_v49, 16  ;;  %v4892_v49 = vld [vmem:[%s6694_s4 + $0x10] sm:$0xff]  }
  0xb8   : > { %936 = vst.msk [vmem:[#allocation3 + $0x8] sm:$0xf] %vm933_vm3, %v914_v31  ;;  %v912_v52 = vpop.permute.xlu1 %911  ;;  %v1635_v31 = vld [vmem:[#allocation4 + $0x4] sm:$0xf] }
  0xb9   : > { %935 = vst.msk [vmem:[#allocation3 + $0x4] sm:$0xf] %vm933_vm3, %v912_v52  ;;  %v1649_v5 = vrot.slane %v1647_v3, 4  ;;  %v1652_v16 = vrot.slane %v1650_v15, 5  ;;  %v1597_v3 = vld [vmem:[#allocation4 + $0x18] sm:$0xf] }
  0xbb   : > { %v995_v33 = vpop.permute.xlu0 %994  ;;  %v1653_v52 = vor.u32 %v1652_v16, %v1649_v5 }
  0xbc   : > { %1019 = vst.msk [vmem:[#allocation3] sm:$0xf] %vm1018_vm4, %v995_v33  ;;  %v916_v42 = vpop.permute.xlu1 %915  ;;  %v1656_v33 = vshll.u32 %v1635_v31, 16 }
  0xbd   : > { %937 = vst.msk [vmem:[#allocation3 + $0xc] sm:$0xf] %vm933_vm3, %v916_v42  ;;  %v1660_v42 = vshrl.u32 %v1635_v31, 16 }
  0xbf   : > { %v999_v58 = vpop.permute.xlu0 %998 }
  0xc0   : > { %1021 = vst.msk [vmem:[#allocation3 + $0x8] sm:$0xf] %vm1018_vm4, %v999_v58  ;;  %v997_v38 = vpop.permute.xlu1 %996  ;;  %v1654_v58 = vrot.slane %v1653_v52, 4 }
  0xc1   : > { %1020 = vst.msk [vmem:[#allocation3 + $0x4] sm:$0xf] %vm1018_vm4, %v997_v38  ;;  %v1658_v38 = vrot.slane %v1656_v33, 5  ;;  %v1588_v33 = vld [vmem:[#allocation4 + $0xc] sm:$0xf] }
  0xc3   : > { %v1045_v40 = vpop.permute.xlu0 %1044 }
  0xc4   : > { %1069 = vst.msk [vmem:[#allocation3] sm:$0xf] %vm1068_vm5, %v1045_v40  ;;  %v1001_v4 = vpop.permute.xlu1 %1000  ;;  %v1662_v40 = vrot.slane %v1660_v42, 4 }
  0xc5   : > { %1022 = vst.msk [vmem:[#allocation3 + $0xc] sm:$0xf] %vm1018_vm4, %v1001_v4  ;;  %v1636_v4 = vld [vmem:[#allocation4 + $0x8] sm:$0x1] }
  0xc7   : > { %v1049_v51 = vpop.permute.xlu0 %1048 }
  0xc8   : > { %1071 = vst.msk [vmem:[#allocation3 + $0x8] sm:$0xf] %vm1068_vm5, %v1049_v51  ;;  %v1047_v6 = vpop.permute.xlu1 %1046  ;;  %v1659_v51 = vsel %vm5208_vm10, %v1654_v58, %v1658_v38 }
  0xc9   : > { %1070 = vst.msk [vmem:[#allocation3 + $0x4] sm:$0xf] %vm1068_vm5, %v1047_v6  ;;  %v1663_v6 = vor.u32 %v1662_v40, %v1658_v38  ;;  %1742 = vrot.lane.b32.xlu0 %v1659_v51, %s5042_s29 }
  0xcb   : > { %v1186_v55 = vpop.permute.xlu0 %1185 }
  0xcc   : > { %1210 = vst.msk [vmem:[#allocation3] sm:$0xf] %vm1209_vm8, %v1186_v55  ;;  %v1051_v7 = vpop.permute.xlu1 %1050  ;;  %v1666_v55 = vshll.u32 %v1636_v4, 16 }
  0xcd   : > { %1072 = vst.msk [vmem:[#allocation3 + $0xc] sm:$0xf] %vm1068_vm5, %v1051_v7  ;;  %v1775_v7 = vld [vmem:[#allocation4] sm:$0xe] }
  0xcf   : > { %v1190_v8 = vpop.permute.xlu0 %1189 }
  0xd0   : > { %1212 = vst.msk [vmem:[#allocation3 + $0x8] sm:$0xf] %vm1209_vm8, %v1190_v8  ;;  %v1188_v9 = vpop.permute.xlu1 %1187  ;;  %v1776_v8 = vld [vmem:[#allocation4 + $0x4] sm:$0xf] }
  0xd1   : > { %1211 = vst.msk [vmem:[#allocation3 + $0x4] sm:$0xf] %vm1209_vm8, %v1188_v9  ;;  %v4450_v9 = vrot.slane %v1775_v7, 9 }
  0xd3   : > { %v1271_v11 = vpop.permute.xlu0 %1270 }
  0xd4   : > { %1295 = vst.msk [vmem:[#allocation3] sm:$0xf] %vm1294_vm12, %v1271_v11  ;;  %v1192_v12 = vpop.permute.xlu1 %1191  ;;  %v1801_v11 = vrot.slane %v1776_v8, 5 }
  0xd5   : > { %1213 = vst.msk [vmem:[#allocation3 + $0xc] sm:$0xf] %vm1209_vm8, %v1192_v12  ;;  %v1664_v12 = vrot.slane %v1663_v6, 4  ;;  %v1601_v6 = vld [vmem:[#allocation4 + $0x20] sm:$0x1] }
  0xd7   : > { %v640_v14 = vpop.permute.xlu0 %639 }
  0xd8   : > { %660 = vst.msk [vmem:[#allocation3 + $0x10] sm:$0xf] %vm655_vm0, %v640_v14  ;;  %v1273_v57 = vpop.permute.xlu1 %1272  ;;  %v1668_v14 = vrot.slane %v1666_v55, 5 }
  0xd9   : > { %1296 = vst.msk [vmem:[#allocation3 + $0x4] sm:$0xf] %vm1294_vm12, %v1273_v57  ;;  %v1802_v57 = vsel %vm5192_vm7, %v4450_v9, %v1801_v11 }
  0xda   : > { %1827 = vrot.lane.b32.xlu0 %v1802_v57, %s6701_s30 }
  0xdb   : > { %v1275_v29 = vpop.permute.xlu0 %1274 }
  0xdc   : > { %1297 = vst.msk [vmem:[#allocation3 + $0x8] sm:$0xf] %vm1294_vm12, %v1275_v29  ;;  %v642_v13 = vpop.permute.xlu1 %641  ;;  %v1669_v29 = vsel %vm5208_vm10, %v1664_v12, %v1668_v14 }
  0xdd   : > { %661 = vst.msk [vmem:[#allocation3 + $0x14] sm:$0xf] %vm655_vm0, %v642_v13  ;;  %1744 = vrot.lane.b32.xlu1 %v1669_v29, %s5042_s29  ;;  %v1777_v13 = vld [vmem:[#allocation4 + $0x8] sm:$0x1] }
  0xdf   : > { %v644_v17 = vpop.permute.xlu0 %643 }
  0xe0   : > { %662 = vst.msk [vmem:[#allocation3 + $0x18] sm:$0xf] %vm655_vm0, %v644_v17  ;;  %v1277_v19 = vpop.permute.xlu1 %1276  ;;  %v4871_v20 = vld [vmem:[#allocation3] sm:$0xff]   ;;  %v1803_v17 = vrot.slane %v1801_v11, 4 }
  0xe1   : > { %1298 = vst.msk [vmem:[#allocation3 + $0xc] sm:$0xf] %vm1294_vm12, %v1277_v19  ;;  %4783 = vmatprep.mubr.msk.bf16.mxu0 %vm1338_vm13, %v4871_v20  ;;  %v1804_v19 = vrot.slane %v1777_v13, 5  ;;  %v1594_v13 = vld [vmem:[#allocation4 + $0x14] sm:$0x1] }
  0xe3   : > { %v728_v21 = vpop.permute.xlu0 %727  ;;  %v1805_v20 = vsel %vm5192_vm7, %v1803_v17, %v1804_v19 }
  0xe4   : > { %748 = vst.msk [vmem:[#allocation3 + $0x10] sm:$0xf] %vm743_vm1, %v728_v21  ;;  %v646_v22 = vpop.permute.xlu1 %645  ;;  %1829 = vrot.lane.b32.xlu1 %v1805_v20, %s6701_s30  ;;  %v4877_v21 = vld [vmem:[%s6694_s4 + $0x88] sm:$0xff]  }
  0xe5   : > { %663 = vst.msk [vmem:[#allocation3 + $0x1c] sm:$0xf] %vm655_vm0, %v646_v22  ;;  %4791 = vmatprep.subr.bf16.mxu0 %v4877_v21  ;;  %v4878_v22 = vld [vmem:[%s6694_s4 + $0x80] sm:$0xff]   ;;  %vm1766_vm0 = vcmask 519424  }
  0xe7   : > { %v732_v23 = vpop.permute.xlu0 %731 }
  0xe8   : > { %750 = vst.msk [vmem:[#allocation3 + $0x18] sm:$0xf] %vm743_vm1, %v732_v23  ;;  %v730_v26 = vpop.permute.xlu1 %729  ;;  %v4873_v46 = vld [vmem:[#allocation3 + $0x8] sm:$0xff]   ;;  %v5713_v23 = vld [vmem:[%s6692_s2] ss:$0 sm:$0xff] }
  0xe9   : > { %749 = vst.msk [vmem:[#allocation3 + $0x14] sm:$0xf] %vm743_vm1, %v730_v26  ;;  %4784 = vmatmul.mubr.msk.bf16.vlgmr.msra.gmra.mxu0 %vm1338_vm13, %v4873_v46  ;;  %v5718_v46 = vld [vmem:[%s6693_s3] ss:$0 sm:$0xff] }
  0xea   : > { %4792 = vmatpush3.bf16.msra.mxu0 %v4877_v21 }
  0xeb   : > { %v777_v53 = vpop.permute.xlu0 %776  ;;  %4793 = vmatprep.subr.bf16.mxu0 %v4878_v22 }
  0xec   : > { %797 = vst.msk [vmem:[#allocation3 + $0x10] sm:$0xf] %vm792_vm2, %v777_v53  ;;  %v734_v27 = vpop.permute.xlu1 %733  ;;  %v1618_v53 = vld [vmem:[#allocation4] sm:$0xf] }
  0xed   : > { %751 = vst.msk [vmem:[#allocation3 + $0x1c] sm:$0xf] %vm743_vm1, %v734_v27  ;;  %vm1851_vm1 = vcmask 781824  }
  0xee   : > { %4794 = vmatpush3.bf16.msra.mxu0 %v4878_v22  ;;  %1626 = vst.msk [vmem:[#allocation5] sm:$0xf] %vm1465_vm14, %v1618_v53 }
  0xef   : > { %v781_v28 = vpop.permute.xlu0 %780 }
  0xf0   : > { %799 = vst.msk [vmem:[#allocation3 + $0x18] sm:$0xf] %vm792_vm2, %v781_v28  ;;  %v779_v32 = vpop.permute.xlu1 %778 }
  0xf1   : > { %798 = vst.msk [vmem:[#allocation3 + $0x14] sm:$0xf] %vm792_vm2, %v779_v32 }
  0xf3   : > { %v918_v34 = vpop.permute.xlu0 %917 }
  0xf4   : > { %938 = vst.msk [vmem:[#allocation3 + $0x10] sm:$0xf] %vm933_vm3, %v918_v34  ;;  %v783_v35 = vpop.permute.xlu1 %782 }
  0xf5   : > { %800 = vst.msk [vmem:[#allocation3 + $0x1c] sm:$0xf] %vm792_vm2, %v783_v35  ;;  %vm5735_vm2 = vmand %vm1465_vm14, %vm472_vm9 }
  0xf7   : > { %v922_v10 = vpop.permute.xlu0 %921 }
  0xf8   : > { %940 = vst.msk [vmem:[#allocation3 + $0x18] sm:$0xf] %vm933_vm3, %v922_v10  ;;  %v920_v39 = vpop.permute.xlu1 %919 }
  0xf9   : > { %939 = vst.msk [vmem:[#allocation3 + $0x14] sm:$0xf] %vm933_vm3, %v920_v39  ;;  %v1619_v39 = vld [vmem:[#allocation4 + $0x4] sm:$0xf] }
  0xfa   : > { %1627 = vst.msk [vmem:[#allocation5 + $0xc] sm:$0xf] %vm1465_vm14, %v1619_v39 }
  0xfb   : > { %v1003_v48 = vpop.permute.xlu0 %1002 }
  0xfc   : > { %1023 = vst.msk [vmem:[#allocation3 + $0x10] sm:$0xf] %vm1018_vm4, %v1003_v48  ;;  %v924_v59 = vpop.permute.xlu1 %923 }
  0xfd   : > { %941 = vst.msk [vmem:[#allocation3 + $0x1c] sm:$0xf] %vm933_vm3, %v924_v59  ;;  %vm5744_vm3 = vmand %vm1468_vm15, %vm387_vm6 }
  0xff   : > { %v1007_v63 = vpop.permute.xlu0 %1006 }
 0x100   : > { %1025 = vst.msk [vmem:[#allocation3 + $0x18] sm:$0xf] %vm1018_vm4, %v1007_v63  ;;  %v1005_v2 = vpop.permute.xlu1 %1004 }
 0x101   : > { %1024 = vst.msk [vmem:[#allocation3 + $0x14] sm:$0xf] %vm1018_vm4, %v1005_v2 }
 0x103   : > { %v1053_v25 = vpop.permute.xlu0 %1052 }
 0x104   : > { %1073 = vst.msk [vmem:[#allocation3 + $0x10] sm:$0xf] %vm1068_vm5, %v1053_v25  ;;  %v1009_v37 = vpop.permute.xlu1 %1008 }
 0x105   : > { %1026 = vst.msk [vmem:[#allocation3 + $0x1c] sm:$0xf] %vm1018_vm4, %v1009_v37  ;;  %vm2594_vm4 = vcmask 261120  }
 0x107   : > { %v1057_v41 = vpop.permute.xlu0 %1056 }
 0x108   : > { %1075 = vst.msk [vmem:[#allocation3 + $0x18] sm:$0xf] %vm1068_vm5, %v1057_v41  ;;  %v1055_v47 = vpop.permute.xlu1 %1054 }
 0x109   : > { %1074 = vst.msk [vmem:[#allocation3 + $0x14] sm:$0xf] %vm1068_vm5, %v1055_v47 }
 0x10b   : > { %v1194_v56 = vpop.permute.xlu0 %1193 }
 0x10c   : > { %1214 = vst.msk [vmem:[#allocation3 + $0x10] sm:$0xf] %vm1209_vm8, %v1194_v56  ;;  %v1059_v24 = vpop.permute.xlu1 %1058 }
 0x10d   : > { %1076 = vst.msk [vmem:[#allocation3 + $0x1c] sm:$0xf] %vm1068_vm5, %v1059_v24  ;;  %vm1900_vm5 = vcmask 1044224  }
 0x10f   : > { %v1198_v43 = vpop.permute.xlu0 %1197 }
 0x110   : > { %1216 = vst.msk [vmem:[#allocation3 + $0x18] sm:$0xf] %vm1209_vm8, %v1198_v43  ;;  %v1196_v44 = vpop.permute.xlu1 %1195 }
 0x111   : > { %1215 = vst.msk [vmem:[#allocation3 + $0x14] sm:$0xf] %vm1209_vm8, %v1196_v44 }
 0x113   : > { %v1279_v54 = vpop.permute.xlu0 %1278 }
 0x114   : > { %1299 = vst.msk [vmem:[#allocation3 + $0x10] sm:$0xf] %vm1294_vm12, %v1279_v54  ;;  %v1200_v45 = vpop.permute.xlu1 %1199 }
 0x115   : > { %1217 = vst.msk [vmem:[#allocation3 + $0x1c] sm:$0xf] %vm1209_vm8, %v1200_v45  ;;  %vm2779_vm8 = vcmask 519168  }
 0x116   : > { %2784 = vst.msk [vmem:[#allocation6 + $0xc] sm:$0xf] %vm2779_vm8, %v5032_v0  ;;  %2780 = vst.msk [vmem:[#allocation6] sm:$0xf] %vm2779_vm8, %v5032_v0 }
 0x117   : > { %v1283_v50 = vpop.permute.xlu0 %1282  ;;  %2781 = vst.msk [vmem:[#allocation6 + $0x4] sm:$0xf] %vm2779_vm8, %v5032_v0  ;;  %2785 = vst.msk [vmem:[#allocation6 + $0x10] sm:$0xf] %vm2779_vm8, %v5032_v0 }
 0x118   : > { %1301 = vst.msk [vmem:[#allocation3 + $0x18] sm:$0xf] %vm1294_vm12, %v1283_v50  ;;  %v1281_v18 = vpop.permute.xlu1 %1280 }
 0x119   : > { %1300 = vst.msk [vmem:[#allocation3 + $0x14] sm:$0xf] %vm1294_vm12, %v1281_v18 }
 0x11a   : > { %2787 = vst.msk [vmem:[#allocation6 + $0x18] sm:$0xf] %vm2779_vm8, %v5032_v0  ;;  %2788 = vst.msk [vmem:[#allocation6 + $0x1c] sm:$0xf] %vm2779_vm8, %v5032_v0 }
 0x11b   : > { %2790 = vst.msk [vmem:[#allocation6 + $0x24] sm:$0xf] %vm2779_vm8, %v5032_v0  ;;  %2791 = vst.msk [vmem:[#allocation6 + $0x28] sm:$0xf] %vm2779_vm8, %v5032_v0 }
 0x11c   : > { %v1285_v60 = vpop.permute.xlu1 %1284  ;;  %2793 = vst.msk [vmem:[#allocation6 + $0x30] sm:$0xf] %vm2779_vm8, %v5032_v0  ;;  %2794 = vst.msk [vmem:[#allocation6 + $0x34] sm:$0xf] %vm2779_vm8, %v5032_v0 }
 0x11d   : > { %1302 = vst.msk [vmem:[#allocation3 + $0x1c] sm:$0xf] %vm1294_vm12, %v1285_v60  ;;  %vm2782_vm12 = vcmask 516096  }
 0x11e   : > { %2796 = vst.msk [vmem:[#allocation6 + $0x3c] sm:$0xf] %vm2779_vm8, %v5032_v0  ;;  %2797 = vst.msk [vmem:[#allocation6 + $0x40] sm:$0xf] %vm2779_vm8, %v5032_v0 }
 0x11f   : > { %2786 = vst.msk [vmem:[#allocation6 + $0x14] sm:$0x1] %vm2782_vm12, %v5032_v0  ;;  %2783 = vst.msk [vmem:[#allocation6 + $0x8] sm:$0x1] %vm2782_vm12, %v5032_v0 }
 0x120   : > { %v4874_v61 = vld [vmem:[#allocation3 + $0x10] sm:$0xff]   ;;  %2789 = vst.msk [vmem:[#allocation6 + $0x20] sm:$0x1] %vm2782_vm12, %v5032_v0  ;;  %2792 = vst.msk [vmem:[#allocation6 + $0x2c] sm:$0x1] %vm2782_vm12, %v5032_v0 }
 0x121   : > { %4787 = vmatprep.mubr.msk.bf16.mxu0 %vm1338_vm13, %v4874_v61  ;;  %2795 = vst.msk [vmem:[#allocation6 + $0x38] sm:$0x1] %vm2782_vm12, %v5032_v0  ;;  %2798 = vst.msk [vmem:[#allocation6 + $0x44] sm:$0x1] %vm2782_vm12, %v5032_v0 }
 0x124   : > { %v4875_v62 = vld [vmem:[#allocation3 + $0x18] sm:$0xff]  }
 0x125   : > { %4788 = vmatmul.mubr.msk.bf16.gmra.mxu0 %vm1338_vm13, %v4875_v62  ;;  %vm6197_vm13 = vmand %vm2779_vm8, %vm472_vm9 }
 0x126   : > { %vm6211_vm9 = vmand %vm2782_vm12, %vm387_vm6  ;;  %vm4050_vm6 = vcmask 523264  }
 0x13b   : > { %v1743_v35 = vpop.permute.xlu0 %1742 }
 0x13c   : > { %1767 = vst.msk [vmem:[#allocation5] sm:$0xf] %vm1766_vm0, %v1743_v35 }
 0x14c   : > { %v1828_v56 = vpop.permute.xlu0 %1827 }
 0x14d   : > { %1852 = vst.msk [vmem:[#allocation5] sm:$0xf] %vm1851_vm1, %v1828_v56 }
 0x14f   : > { %v1745_v24 = vpop.permute.xlu1 %1744 }
 0x150   : > { %1768 = vst.msk [vmem:[#allocation5 + $0xc] sm:$0xf] %vm1766_vm0, %v1745_v24 }
 0x156   : > { %v1830_v62 = vpop.permute.xlu1 %1829 }
 0x157   : > { %1853 = vst.msk [vmem:[#allocation5 + $0xc] sm:$0xf] %vm1851_vm1, %v1830_v62 }
 0x1a9   : > { %v4785_v26 = vpop.f32.mrf.mxu0 }
 0x1aa   : > { %v1432_v27 = vmul.f32 %v4785_v26, %v5713_v23 }
 0x1ab   : > { %v1392_v28 = vpop.f32.mrf.mxu0 }
 0x1ac   : > { %v1447_v32 = vadd.f32 %v5718_v46, %v1432_v27  ;;  %v1430_v34 = vmul.f32 %v5713_v23, %v1392_v28 }
 0x1ad   : > { %v4786_v10 = vpop.f32.mrf.mxu0 }
 0x1ae   : > { %v1455_v48 = vmax.f32 %v1447_v32, 0.0  ;;  %v1445_v59 = vadd.f32 %v5718_v46, %v1430_v34  ;;  %v1433_v63 = vmul.f32 %v4786_v10, %v5713_v23 }
 0x1af   : > { %v1395_v2 = vpop.f32.mrf.mxu0 }
 0x1b0   : > { %v4596_v25 = vpack.c.bf16 %v1455_v48, %v1455_v48  ;;  %v1453_v37 = vmax.f32 %v1445_v59, 0.0  ;;  %v1448_v41 = vadd.f32 %v5718_v46, %v1433_v63  ;;  %v1431_v47 = vmul.f32 %v5713_v23, %v1395_v2 }
 0x1b2   : > { %v1523_v43 = vshrl.u32 %v4596_v25, 16  ;;  %v4594_v44 = vpack.c.bf16 %v1453_v37, %v1453_v37  ;;  %v1456_v54 = vmax.f32 %v1448_v41, 0.0  ;;  %v1446_v45 = vadd.f32 %v5718_v46, %v1431_v47 }
 0x1b3   : > { %v1526_v18 = vshll.u32 %v4596_v25, 16 }
 0x1b4   : > { %v1525_v50 = vrot.slane %v1523_v43, 7  ;;  %v1506_v60 = vshrl.u32 %v4594_v44, 16  ;;  %v4597_v61 = vpack.c.bf16 %v1456_v54, %v1456_v54  ;;  %v1454_v15 = vmax.f32 %v1446_v45, 0.0 }
 0x1b5   : > { %v1509_v31 = vshll.u32 %v4594_v44, 16 }
 0x1b6   : > { %v1528_v5 = vor.u32 %v1526_v18, %v1525_v50  ;;  %v1508_v16 = vrot.slane %v1506_v60, 7  ;;  %v1531_v52 = vshrl.u32 %v4597_v61, 16  ;;  %v4595_v42 = vpack.c.bf16 %v1454_v15, %v1454_v15 }
 0x1b7   : > { %v1534_v4 = vshll.u32 %v4597_v61, 16  ;;  %v1529_v7 = vrot.slane %v1525_v50, 4 }
 0x1b8   : > { %v1598_v58 = vsel %vm5735_vm2, %v1528_v5, %v1597_v3  ;;  %v1511_v38 = vor.u32 %v1509_v31, %v1508_v16  ;;  %v1533_v40 = vrot.slane %v1531_v52, 7  ;;  %v1514_v55 = vshrl.u32 %v4595_v42, 16 }
 0x1b9   : > { %1599 = vst [vmem:[#allocation4 + $0x18] sm:$0xf] %v1598_v58  ;;  %v1517_v14 = vshll.u32 %v4595_v42, 16  ;;  %v1512_v17 = vrot.slane %v1508_v16, 4  ;;  %v4882_v58 = vld [vmem:[%s6694_s4 + $0x38] sm:$0xff]  }
 0x1ba   : > { %v1589_v8 = vsel %vm5735_vm2, %v1511_v38, %v1588_v33  ;;  %v1536_v9 = vor.u32 %v1534_v4, %v1533_v40  ;;  %v1538_v11 = vrot.slane %v1533_v40, 4  ;;  %v1516_v12 = vrot.slane %v1514_v55, 7  ;;  %v4881_v33 = vld [vmem:[%s6694_s4 + $0x78] sm:$0xff]  }
 0x1bb   : > { %1590 = vst [vmem:[#allocation4 + $0xc] sm:$0xf] %v1589_v8  ;;  %4647 = vmatprep.subr.bf16.mxu1 %v4881_v33 }
 0x1bc   : > { %v1537_v57 = vsel %vm5214_vm11, %v1529_v7, %v1536_v9  ;;  %v1602_v29 = vsel %vm5744_vm3, %v1538_v11, %v1601_v6  ;;  %v1519_v19 = vor.u32 %v1517_v14, %v1516_v12  ;;  %v1521_v20 = vrot.slane %v1516_v12, 4  ;;  %4648 = vmatpush3.bf16.msra.mxu1 %v4882_v58  ;;  %v4883_v14 = vld [vmem:[%s6694_s4 + $0x70] sm:$0xff]  }
 0x1bd   : > { %1600 = vst.msk [vmem:[#allocation4 + $0x1c] sm:$0xf] %vm1465_vm14, %v1537_v57  ;;  %1603 = vst [vmem:[#allocation4 + $0x20] sm:$0x1] %v1602_v29  ;;  %4649 = vmatprep.subr.bf16.mxu1 %v4883_v14 }
 0x1be   : > { %v1520_v21 = vsel %vm5214_vm11, %v1512_v17, %v1519_v19  ;;  %v1595_v22 = vsel %vm5744_vm3, %v1521_v20, %v1594_v13  ;;  %v4884_v13 = vld [vmem:[%s6694_s4 + $0x30] sm:$0xff]   ;;  %v4885_v17 = vld [vmem:[%s6694_s4 + $0x68] sm:$0xff]  }
 0x1bf   : > { %1591 = vst.msk [vmem:[#allocation4 + $0x10] sm:$0xf] %vm1465_vm14, %v1520_v21  ;;  %1596 = vst [vmem:[#allocation4 + $0x14] sm:$0x1] %v1595_v22 }
 0x1c0   : > { %v2118_v26 = vld [vmem:[#allocation4 + $0x18] sm:$0xf]  ;;  %4650 = vmatpush3.bf16.msra.mxu1 %v4884_v13 }
 0x1c1   : > { %2134 = vrot.lane.b32.xlu0 %v2118_v26, %s6701_s30  ;;  %v1862_v53 = vld [vmem:[#allocation4 + $0x18] sm:$0xf]  ;;  %4651 = vmatprep.subr.bf16.mxu1 %v4885_v17 }
 0x1c2   : > { %v2306_v28 = vld [vmem:[#allocation4 + $0x18] sm:$0xe]  ;;  %v1860_v59 = vld [vmem:[#allocation4 + $0xc] sm:$0xf] }
 0x1c3   : > { %v2036_v10 = vld [vmem:[#allocation4 + $0x18] sm:$0xe]  ;;  %v4458_v39 = vrot.slane %v2306_v28, 9 }
 0x1c4   : > { %v2119_v27 = vld [vmem:[#allocation4 + $0x1c] sm:$0xf]  ;;  %v2308_v35 = vld [vmem:[#allocation4 + $0x20] sm:$0x1]  ;;  %v4455_v56 = vrot.slane %v2036_v10, 9 }
 0x1c5   : > { %1880 = vrot.lane.b32.xlu0 %v1862_v53, %s5044_s11  ;;  %2136 = vrot.lane.b32.xlu1 %v2119_v27, %s6701_s30  ;;  %v2037_v32 = vld [vmem:[#allocation4 + $0x1c] sm:$0xf]  ;;  %v2335_v47 = vrot.slane %v2308_v35, 5  ;;  %v1781_v24 = vld [vmem:[#allocation4 + $0x18] sm:$0xe]  ;;  %v4886_v53 = vld [vmem:[%s6694_s4 + $0x28] sm:$0xff]  }
 0x1c6   : > { %v2307_v34 = vld [vmem:[#allocation4 + $0x1c] sm:$0xf]  ;;  %v2066_v2 = vrot.slane %v2037_v32, 5  ;;  %v2038_v43 = vld [vmem:[#allocation4 + $0x20] sm:$0x1]  ;;  %v4452_v61 = vrot.slane %v1781_v24, 9  ;;  %4652 = vmatpush3.bf16.msra.mxu1 %v4886_v53 }
 0x1c7   : > { %v2332_v48 = vrot.slane %v2307_v34, 5  ;;  %v1863_v63 = vld [vmem:[#allocation4 + $0x1c] sm:$0xf]  ;;  %v1861_v45 = vld [vmem:[#allocation4 + $0x10] sm:$0xf]  ;;  %v2069_v62 = vrot.slane %v2038_v43, 5 }
 0x1c8   : > { %v1782_v25 = vld [vmem:[#allocation4 + $0x1c] sm:$0xf]  ;;  %v2067_v54 = vsel %vm5192_vm7, %v4455_v56, %v2066_v2  ;;  %v2068_v18 = vrot.slane %v2066_v2, 4  ;;  %v5775_v60 = vld [vmem:[#allocation4 + $0x10] sm:$0xf] }
 0x1c9   : > { %1876 = vrot.lane.b32.xlu0 %v1860_v59, %s5044_s11  ;;  %1882 = vrot.lane.b32.xlu1 %v1863_v63, %s5044_s11  ;;  %v2333_v37 = vsel %vm5192_vm7, %v4458_v39, %v2332_v48  ;;  %v2334_v41 = vrot.slane %v2332_v48, 4  ;;  %v1815_v50 = vrot.slane %v1782_v25, 5  ;;  %v1783_v3 = vld [vmem:[#allocation4 + $0x20] sm:$0x1]  ;;  %v2059_v31 = vrot.slane %v5775_v60, 5  ;;  %v4887_v59 = vld [vmem:[%s6694_s4 + $0x60] sm:$0xff]  }
 0x1ca   : > { %2366 = vst.msk [vmem:[#allocation5 + $0x8] sm:$0xf] %vm1465_vm14, %v2333_v37  ;;  %v2070_v5 = vsel %vm5192_vm7, %v2068_v18, %v2069_v62  ;;  %v5784_v52 = vld [vmem:[#allocation4 + $0x10] sm:$0xf]  ;;  %v1818_v42 = vrot.slane %v1783_v3, 5  ;;  %4653 = vmatprep.subr.bf16.mxu1 %v4887_v59 }
 0x1cb   : > { %v2336_v44 = vsel %vm5192_vm7, %v2334_v41, %v2335_v47  ;;  %v1816_v15 = vsel %vm5192_vm7, %v4452_v61, %v1815_v50  ;;  %v1817_v16 = vrot.slane %v1815_v50, 4  ;;  %v2035_v40 = vld [vmem:[#allocation4 + $0x14] sm:$0x1]  ;;  %v2061_v6 = vrot.slane %v2059_v31, 4  ;;  %v1912_v7 = vld [vmem:[#allocation4 + $0x18] sm:$0xf] }
 0x1cc   : > { %2367 = vst.msk [vmem:[#allocation5 + $0x14] sm:$0xf] %vm1465_vm14, %v2336_v44  ;;  %v1808_v55 = vrot.slane %v5784_v52, 5  ;;  %v1913_v8 = vld [vmem:[#allocation4 + $0x1c] sm:$0xf]  ;;  %v2062_v9 = vrot.slane %v2035_v40, 5 }
 0x1cd   : > { %2089 = vrot.lane.b32.xlu0 %v2067_v54, %s5042_s29  ;;  %1878 = vrot.lane.b32.xlu1 %v1861_v45, %s5044_s11  ;;  %v1819_v4 = vsel %vm5192_vm7, %v1817_v16, %v1818_v42  ;;  %v1780_v11 = vld [vmem:[#allocation4 + $0x14] sm:$0x1]  ;;  %v1914_v12 = vld [vmem:[#allocation4 + $0x20] sm:$0x1]  ;;  %v1946_v57 = vshrl.u32 %v1912_v7, 16  ;;  %v1949_v21 = vshll.u32 %v1912_v7, 16 }
 0x1ce   : > { %v1910_v29 = vld [vmem:[#allocation4 + $0x10] sm:$0xf]  ;;  %v2063_v19 = vsel %vm5192_vm7, %v2061_v6, %v2062_v9  ;;  %v1810_v20 = vrot.slane %v1808_v55, 4  ;;  %v1955_v22 = vshll.u32 %v1913_v8, 16  ;;  %v1911_v26 = vld [vmem:[#allocation4 + $0x14] sm:$0x1] }
 0x1cf   : > { %v1909_v27 = vld [vmem:[#allocation4 + $0xc] sm:$0xf]  ;;  %v1948_v28 = vrot.slane %v1946_v57, 4  ;;  %v1959_v32 = vshrl.u32 %v1913_v8, 16  ;;  %v1623_v34 = vld [vmem:[#allocation4 + $0x1c] sm:$0xf] }
 0x1d0   : > { %v1622_v35 = vld [vmem:[#allocation4 + $0x18] sm:$0xf]  ;;  %v1811_v10 = vrot.slane %v1780_v11, 5  ;;  %v1951_v39 = vrot.slane %v1949_v21, 5  ;;  %v1957_v48 = vrot.slane %v1955_v22, 5  ;;  %v1965_v25 = vshll.u32 %v1914_v12, 16 }
 0x1d1   : > { %1835 = vrot.lane.b32.xlu0 %v1816_v15, %s6701_s30  ;;  %2091 = vrot.lane.b32.xlu1 %v2070_v5, %s5042_s29  ;;  %1631 = vst.msk [vmem:[#allocation5 + $0x3c] sm:$0xf] %vm1465_vm14, %v1623_v34  ;;  %1630 = vst.msk [vmem:[#allocation5 + $0x30] sm:$0xf] %vm1465_vm14, %v1622_v35  ;;  %v1621_v63 = vld [vmem:[#allocation4 + $0x10] sm:$0xf] }
 0x1d2   : > { %v1961_v2 = vrot.slane %v1959_v32, 4  ;;  %v1931_v37 = vshll.u32 %v1910_v29, 16  ;;  %v1935_v41 = vshrl.u32 %v1910_v29, 16  ;;  %1629 = vst.msk [vmem:[#allocation5 + $0x24] sm:$0xf] %vm1465_vm14, %v1621_v63  ;;  %v1812_v56 = vsel %vm5192_vm7, %v1810_v20, %v1811_v10  ;;  %v4889_v59 = vld [vmem:[%s6694_s4 + $0x58] sm:$0xff]  }
 0x1d3   : > { %v4876_v38 = vld [vmem:[#allocation5 + $0x8] ss:$12 sps:$4 sm:$0xff]   ;;  %v1620_v47 = vld [vmem:[#allocation4 + $0xc] sm:$0xf]  ;;  %v1952_v24 = vor.u32 %v1951_v39, %v1948_v28  ;;  %v1922_v43 = vshrl.u32 %v1909_v27, 16  ;;  %v1941_v50 = vshll.u32 %v1911_v26, 16 }
 0x1d4   : > { %4795 = vmatprep.mubr.msk.bf16.mxu0 %vm2594_vm4, %v4876_v38  ;;  %1628 = vst.msk [vmem:[#allocation5 + $0x18] sm:$0xf] %vm1465_vm14, %v1620_v47  ;;  %v1962_v44 = vor.u32 %v1961_v2, %v1957_v48  ;;  %v1933_v54 = vrot.slane %v1931_v37, 5  ;;  %v1937_v45 = vrot.slane %v1935_v41, 4  ;;  %v1925_v62 = vshll.u32 %v1909_v27, 16 }
 0x1d5   : > { %1837 = vrot.lane.b32.xlu1 %v1819_v4, %s6701_s30  ;;  %v1953_v18 = vrot.slane %v1952_v24, 4  ;;  %v1924_v61 = vrot.slane %v1922_v43, 4  ;;  %v1967_v15 = vrot.slane %v1965_v25, 5  ;;  %v1943_v38 = vrot.slane %v1941_v50, 5  ;;  %v2166_v53 = vld [vmem:[#allocation4 + $0x18] sm:$0xf] }
 0x1d6   : > { %v1963_v3 = vrot.slane %v1962_v44, 4  ;;  %v1938_v5 = vor.u32 %v1937_v45, %v1933_v54  ;;  %v1927_v33 = vrot.slane %v1925_v62, 5  ;;  %v2167_v34 = vld [vmem:[#allocation4 + $0x1c] sm:$0xf]  ;;  %v2179_v10 = vshrl.u32 %v2166_v53, 16 }
 0x1d7   : > { %v1958_v16 = vsel %vm5208_vm10, %v1953_v18, %v1957_v48  ;;  %v2182_v39 = vshll.u32 %v2166_v53, 16  ;;  %v4888_v48 = vld [vmem:[%s6694_s4 + $0x20] sm:$0xff]   ;;  %v1611_v37 = vld [vmem:[#allocation4 + $0x30] sm:$0xf]  ;;  %v2188_v47 = vshll.u32 %v2167_v34, 16 }
 0x1d8   : > { %2027 = vst.msk [vmem:[#allocation5 + $0x1c] sm:$0xf] %vm1465_vm14, %v1958_v16  ;;  %v1968_v42 = vsel %vm5208_vm10, %v1963_v3, %v1967_v15  ;;  %v1939_v58 = vrot.slane %v1938_v5, 4  ;;  %v1928_v40 = vor.u32 %v1927_v33, %v1924_v61  ;;  %4654 = vmatpush3.bf16.msra.mxu1 %v4888_v48  ;;  %v1604_v45 = vld [vmem:[#allocation4 + $0x24] sm:$0xf]  ;;  %v2181_v18 = vrot.slane %v2179_v10, 4 }
 0x1d9   : > { %2087 = vrot.lane.b32.xlu1 %v2063_v19, %s5042_s29  ;;  %2028 = vst.msk [vmem:[#allocation5 + $0x28] sm:$0xf] %vm1465_vm14, %v1968_v42  ;;  %4655 = vmatprep.subr.bf16.mxu1 %v4889_v59  ;;  %v2184_v61 = vrot.slane %v2182_v39, 5  ;;  %v1615_v16 = vld [vmem:[#allocation4 + $0x38] sm:$0x1]  ;;  %v5854_v42 = vrot.slane %v2188_v47, 5 }
 0x1da   : > { %v1944_v4 = vsel %vm5208_vm10, %v1939_v58, %v1943_v38  ;;  %v1929_v6 = vrot.slane %v1928_v40, 4  ;;  %v4890_v40 = vld [vmem:[%s6694_s4 + $0x18] sm:$0xff]   ;;  %v1642_v48 = vld [vmem:[#allocation4 + $0x20] sm:$0x1]  ;;  %v1778_v60 = vld [vmem:[#allocation4 + $0xc] sm:$0xe] }
 0x1db   : > { %2026 = vst.msk [vmem:[#allocation5 + $0x10] sm:$0xf] %vm1465_vm14, %v1944_v4  ;;  %v4891_v4 = vld [vmem:[%s6694_s4 + $0x50] sm:$0xff]  }
 0x1dc   : > { %v1934_v9 = vsel %vm5208_vm10, %v1929_v6, %v1933_v54  ;;  %v1641_v54 = vld [vmem:[#allocation4 + $0x1c] sm:$0xf]  ;;  %4656 = vmatpush3.bf16.msra.mxu1 %v4890_v40 }
 0x1dd   : > { %1833 = vrot.lane.b32.xlu1 %v1812_v56, %s6701_s30  ;;  %2025 = vst.msk [vmem:[#allocation5 + $0x4] sm:$0xf] %vm1465_vm14, %v1934_v9  ;;  %v2192_v56 = vshrl.u32 %v2167_v34, 16  ;;  %v1704_v38 = vshll.u32 %v1641_v54, 16  ;;  %4657 = vmatprep.subr.bf16.mxu1 %v4891_v4 }
 0x1df   : > { %v2194_v58 = vrot.slane %v2192_v56, 4  ;;  %v5876_v34 = vrot.slane %v1704_v38, 5  ;;  %v1714_v56 = vshll.u32 %v1642_v48, 16  ;;  %v4896_v48 = vld [vmem:[%s6694_s4] sm:$0xff]  }
 0x1e0   : > { %4658 = vmatpush3.bf16.msra.mxu1 %v4892_v49 }
 0x1e5   : > { %v4789_v7 = vpop.f32.mrf.mxu0 }
 0x1e6   : > { %v1436_v8 = vmul.f32 %v4789_v7, %v5713_v23 }
 0x1e7   : > { %v1408_v11 = vpop.f32.mrf.mxu0 }
 0x1e8   : > { %v1451_v12 = vadd.f32 %v5718_v46, %v1436_v8  ;;  %v1434_v14 = vmul.f32 %v5713_v23, %v1408_v11  ;;  %v2168_v11 = vld [vmem:[#allocation4 + $0x20] sm:$0x1] }
 0x1e9   : > { %v4790_v57 = vpop.f32.mrf.mxu0  ;;  %v2198_v53 = vshll.u32 %v2168_v11, 16 }
 0x1ea   : > { %v1459_v29 = vmax.f32 %v1451_v12, 0.0  ;;  %v1449_v13 = vadd.f32 %v5718_v46, %v1434_v14  ;;  %v1437_v17 = vmul.f32 %v4790_v57, %v5713_v23  ;;  %v1708_v57 = vshrl.u32 %v1641_v54, 16 }
 0x1eb   : > { %v1411_v19 = vpop.f32.mrf.mxu0 }
 0x1ec   : > { %v4600_v20 = vpack.c.bf16 %v1459_v29, %v1459_v29  ;;  %v1457_v21 = vmax.f32 %v1449_v13, 0.0  ;;  %v1452_v22 = vadd.f32 %v5718_v46, %v1437_v17  ;;  %v1435_v26 = vmul.f32 %v5713_v23, %v1411_v19  ;;  %v1640_v29 = vld [vmem:[#allocation4 + $0x18] sm:$0xf]  ;;  %v1608_v19 = vld [vmem:[#allocation4 + $0x2c] sm:$0x1] }
 0x1ed   : > { %v1710_v59 = vrot.slane %v1708_v57, 4 }
 0x1ee   : > { %v1557_v27 = vshrl.u32 %v4600_v20, 16  ;;  %v4598_v28 = vpack.c.bf16 %v1457_v21, %v1457_v21  ;;  %v1460_v32 = vmax.f32 %v1452_v22, 0.0  ;;  %v1450_v35 = vadd.f32 %v5718_v46, %v1435_v26 }
 0x1ef   : > { %v1560_v2 = vshll.u32 %v4600_v20, 16  ;;  %v4893_v20 = vld [vmem:[%s6694_s4 + $0x48] sm:$0xff]  }
 0x1f0   : > { %v1559_v63 = vrot.slane %v1557_v27, 7  ;;  %v1540_v23 = vshrl.u32 %v4598_v28, 16  ;;  %v4601_v25 = vpack.c.bf16 %v1460_v32, %v1460_v32  ;;  %v1458_v41 = vmax.f32 %v1450_v35, 0.0  ;;  %v2033_v27 = vld [vmem:[#allocation4 + $0xc] sm:$0xe]  ;;  %4659 = vmatprep.subr.bf16.mxu1 %v4893_v20 }
 0x1f1   : > { %v1543_v43 = vshll.u32 %v4598_v28, 16  ;;  %v2185_v28 = vor.u32 %v2184_v61, %v2181_v18  ;;  %v2195_v32 = vor.u32 %v2194_v58, %v5854_v42  ;;  %v1695_v35 = vshrl.u32 %v1640_v29, 16 }
 0x1f2   : > { %v1562_v46 = vor.u32 %v1560_v2, %v1559_v63  ;;  %v1542_v24 = vrot.slane %v1540_v23, 7  ;;  %v1565_v44 = vshrl.u32 %v4601_v25, 16  ;;  %v4599_v50 = vpack.c.bf16 %v1458_v41, %v1458_v41  ;;  %v1638_v2 = vld [vmem:[#allocation4 + $0x10] sm:$0xf]  ;;  %v1637_v41 = vld [vmem:[#allocation4 + $0xc] sm:$0xf] }
 0x1f3   : > { %v1568_v5 = vshll.u32 %v4601_v25, 16  ;;  %v1563_v6 = vrot.slane %v1559_v63, 4  ;;  %v1698_v63 = vshll.u32 %v1640_v29, 16  ;;  %v4454_v25 = vrot.slane %v2033_v27, 9 }
 0x1f4   : > { %v1612_v62 = vsel %vm5735_vm2, %v1562_v46, %v1611_v37  ;;  %v1545_v3 = vor.u32 %v1543_v43, %v1542_v24  ;;  %v1567_v15 = vrot.slane %v1565_v44, 7  ;;  %v1548_v33 = vshrl.u32 %v4599_v50, 16 }
 0x1f5   : > { %1613 = vst [vmem:[#allocation4 + $0x30] sm:$0xf] %v1612_v62  ;;  %v1551_v14 = vshll.u32 %v4599_v50, 16  ;;  %v1546_v21 = vrot.slane %v1542_v24, 4  ;;  %v2200_v37 = vrot.slane %v2198_v53, 5  ;;  %v2186_v47 = vrot.slane %v2185_v28, 4 }
 0x1f6   : > { %v1605_v7 = vsel %vm5735_vm2, %v1545_v3, %v1604_v45  ;;  %v1570_v8 = vor.u32 %v1568_v5, %v1567_v15  ;;  %v1572_v9 = vrot.slane %v1567_v15, 4  ;;  %v1550_v12 = vrot.slane %v1548_v33, 7  ;;  %v4894_v50 = vld [vmem:[%s6694_s4 + $0x8] sm:$0xff]   ;;  %v4895_v53 = vld [vmem:[%s6694_s4 + $0x40] sm:$0xff]  }
 0x1f7   : > { %1606 = vst [vmem:[#allocation4 + $0x24] sm:$0xf] %v1605_v7  ;;  %v1680_v51 = vshll.u32 %v1638_v2, 16  ;;  %v1684_v24 = vshrl.u32 %v1638_v2, 16  ;;  %v2196_v43 = vrot.slane %v2195_v32, 4  ;;  %v1711_v44 = vor.u32 %v1710_v59, %v5876_v34  ;;  %4660 = vmatpush3.bf16.msra.mxu1 %v4894_v50 }
 0x1f8   : > { %v1571_v13 = vsel %vm5214_vm11, %v1563_v6, %v1570_v8  ;;  %v1616_v17 = vsel %vm5744_vm3, %v1572_v9, %v1615_v16  ;;  %v1553_v22 = vor.u32 %v1551_v14, %v1550_v12  ;;  %v1555_v26 = vrot.slane %v1550_v12, 4  ;;  %4661 = vmatprep.subr.bf16.mxu1 %v4895_v53 }
 0x1f9   : > { %1614 = vst.msk [vmem:[#allocation4 + $0x34] sm:$0xf] %vm1465_vm14, %v1571_v13  ;;  %1617 = vst [vmem:[#allocation4 + $0x38] sm:$0x1] %v1616_v17  ;;  %v1697_v54 = vrot.slane %v1695_v35, 4  ;;  %v1700_v45 = vrot.slane %v1698_v63, 5  ;;  %v2060_v18 = vsel %vm5192_vm7, %v4454_v25, %v2059_v31  ;;  %v2191_v38 = vsel %vm5208_vm10, %v2186_v47, %v5854_v42 }
 0x1fa   : > { %v1554_v10 = vsel %vm5214_vm11, %v1546_v21, %v1553_v22  ;;  %v1609_v39 = vsel %vm5744_vm3, %v1555_v26, %v1608_v19  ;;  %v1671_v3 = vshrl.u32 %v1637_v41, 16  ;;  %v1674_v15 = vshll.u32 %v1637_v41, 16  ;;  %v1639_v42 = vld [vmem:[#allocation4 + $0x14] sm:$0x1] }
 0x1fb   : > { %1607 = vst.msk [vmem:[#allocation4 + $0x28] sm:$0xf] %vm1465_vm14, %v1554_v10  ;;  %1610 = vst [vmem:[#allocation4 + $0x2c] sm:$0x1] %v1609_v39  ;;  %v5897_v40 = vrot.slane %v1680_v51, 5  ;;  %v1686_v31 = vrot.slane %v1684_v24, 4  ;;  %v2201_v7 = vsel %vm5208_vm10, %v2196_v43, %v2200_v37  ;;  %v1701_v9 = vor.u32 %v1700_v45, %v1697_v54  ;;  %4662 = vmatpush3.bf16.msra.mxu1 %v4896_v48 }
 0x1fc   : > { %v2122_v23 = vld [vmem:[#allocation4 + $0x30] sm:$0xf]  ;;  %v1712_v8 = vrot.slane %v1711_v44, 4  ;;  %v4451_v13 = vrot.slane %v1778_v60, 9  ;;  %v1716_v17 = vrot.slane %v1714_v56, 5  ;;  %v1673_v19 = vrot.slane %v1671_v3, 4 }
 0x1fd   : > { %2142 = vrot.lane.b32.xlu0 %v2122_v23, %s6701_s30  ;;  %v2312_v46 = vld [vmem:[#allocation4 + $0x30] sm:$0xe]  ;;  %v1676_v49 = vrot.slane %v1674_v15, 5  ;;  %v1687_v27 = vor.u32 %v1686_v31, %v5897_v40  ;;  %v1690_v28 = vshll.u32 %v1639_v42, 16  ;;  %v1702_v10 = vrot.slane %v1701_v9, 4 }
 0x1fe   : > { %v2309_v5 = vld [vmem:[#allocation4 + $0x24] sm:$0xe]  ;;  %v4460_v33 = vrot.slane %v2312_v46, 9  ;;  %v1809_v32 = vsel %vm5192_vm7, %v4451_v13, %v1808_v55  ;;  %v1717_v35 = vsel %vm5208_vm10, %v1712_v8, %v1716_v17  ;;  %v2172_v59 = vld [vmem:[#allocation4 + $0x30] sm:$0xf] }
 0x1ff   : > { %v4459_v12 = vrot.slane %v2309_v5, 9  ;;  %v1677_v52 = vor.u32 %v1676_v49, %v1673_v19  ;;  %v1688_v63 = vrot.slane %v1687_v27, 4  ;;  %v1692_v2 = vrot.slane %v1690_v28, 5  ;;  %v2042_v41 = vld [vmem:[#allocation4 + $0x30] sm:$0xe] }
 0x200   : > { %v2123_v61 = vld [vmem:[#allocation4 + $0x34] sm:$0xf]  ;;  %v2314_v16 = vld [vmem:[#allocation4 + $0x38] sm:$0x1]  ;;  %v1707_v25 = vsel %vm5208_vm10, %v1702_v10, %v5876_v34  ;;  %v5941_v43 = vld [vmem:[#allocation4 + $0x24] sm:$0xe] }
 0x201   : > { %v2313_v62 = vld [vmem:[#allocation4 + $0x34] sm:$0xf]  ;;  %2085 = vrot.lane.b32.xlu0 %v2060_v18, %s5042_s29  ;;  %2144 = vrot.lane.b32.xlu1 %v2123_v61, %s6701_s30  ;;  %v2349_v29 = vrot.slane %v2314_v16, 5  ;;  %v5939_v46 = vrot.slane %v1677_v52, 4  ;;  %v2044_v51 = vld [vmem:[#allocation4 + $0x38] sm:$0x1] }
 0x202   : > { %v2346_v58 = vrot.slane %v2313_v62, 5  ;;  %v2310_v4 = vld [vmem:[#allocation4 + $0x28] sm:$0xf]  ;;  %v2311_v6 = vld [vmem:[#allocation4 + $0x2c] sm:$0x1]  ;;  %v2227_v44 = vshrl.u32 %v2172_v59, 16 }
 0x203   : > { %v2339_v14 = vrot.slane %v2310_v4, 5  ;;  %v2342_v22 = vrot.slane %v2311_v6, 5  ;;  %v2043_v55 = vld [vmem:[#allocation4 + $0x34] sm:$0xf]  ;;  %v2121_v37 = vld [vmem:[#allocation4 + $0x28] sm:$0xf] }
 0x204   : > { %v2347_v11 = vsel %vm5192_vm7, %v4460_v33, %v2346_v58  ;;  %v2348_v57 = vrot.slane %v2346_v58, 4  ;;  %v2173_v23 = vld [vmem:[#allocation4 + $0x34] sm:$0xf]  ;;  %v5933_v47 = vld [vmem:[#allocation4 + $0x28] sm:$0xf]  ;;  %v2080_v24 = vrot.slane %v2043_v55, 5  ;;  %v1693_v33 = vsel %vm5208_vm10, %v1688_v63, %v1692_v2 }
 0x205   : > { %2370 = vst.msk [vmem:[#allocation5 + $0x38] sm:$0xf] %vm1465_vm14, %v2347_v11  ;;  %2274 = vrot.lane.b32.xlu0 %v2191_v38, %s5044_s11  ;;  %2276 = vrot.lane.b32.xlu1 %v2201_v7, %s5044_s11  ;;  %v2340_v20 = vsel %vm5192_vm7, %v4459_v12, %v2339_v14  ;;  %v2341_v21 = vrot.slane %v2339_v14, 4  ;;  %v5935_v56 = vld [vmem:[#allocation4 + $0x28] sm:$0xf]  ;;  %v2230_v54 = vshll.u32 %v2172_v59, 16 }
 0x206   : > { %v2350_v26 = vsel %vm5192_vm7, %v2348_v57, %v2349_v29  ;;  %2368 = vst.msk [vmem:[#allocation5 + $0x20] sm:$0xf] %vm1465_vm14, %v2340_v20  ;;  %v2120_v45 = vld [vmem:[#allocation4 + $0x24] sm:$0xf]  ;;  %v1865_v34 = vld [vmem:[#allocation4 + $0x28] sm:$0xf]  ;;  %v1683_v29 = vsel %vm5208_vm10, %v5939_v46, %v5897_v40 }
 0x207   : > { %2371 = vst.msk [vmem:[#allocation5 + $0x44] sm:$0xf] %vm1465_vm14, %v2350_v26  ;;  %v2343_v39 = vsel %vm5192_vm7, %v2341_v21, %v2342_v22  ;;  %v2041_v50 = vld [vmem:[#allocation4 + $0x2c] sm:$0x1]  ;;  %v2073_v18 = vrot.slane %v5933_v47, 5  ;;  %v1822_v61 = vrot.slane %v5935_v56, 5 }
 0x208   : > { %2369 = vst.msk [vmem:[#allocation5 + $0x2c] sm:$0xf] %vm1465_vm14, %v2343_v39  ;;  %v2236_v62 = vshll.u32 %v2173_v23, 16  ;;  %v2240_v3 = vshrl.u32 %v2173_v23, 16  ;;  %v1919_v5 = vld [vmem:[#allocation4 + $0x34] sm:$0xf] }
 0x209   : > { %1831 = vrot.lane.b32.xlu0 %v1809_v32, %s6701_s30  ;;  %1752 = vrot.lane.b32.xlu1 %v1717_v35, %s5042_s29  ;;  %v2083_v58 = vrot.slane %v2044_v51, 5  ;;  %v4457_v38 = vrot.slane %v2042_v41, 9  ;;  %v1864_v60 = vld [vmem:[#allocation4 + $0x24] sm:$0xf]  ;;  %v2082_v31 = vrot.slane %v2080_v24, 4  ;;  %v4456_v4 = vrot.slane %v5941_v43, 9 }
 0x20a   : > { %v5951_v6 = vrot.slane %v2227_v44, 4  ;;  %v5953_v7 = vrot.slane %v2230_v54, 5  ;;  %v2170_v8 = vld [vmem:[#allocation4 + $0x28] sm:$0xf]  ;;  %v2075_v9 = vrot.slane %v2073_v18, 4  ;;  %v2076_v11 = vrot.slane %v2041_v50, 5 }
 0x20b   : > { %v5960_v12 = vrot.slane %v1822_v61, 4  ;;  %v2003_v14 = vshll.u32 %v1919_v5, 16  ;;  %v1918_v57 = vld [vmem:[#allocation4 + $0x30] sm:$0xf]  ;;  %v2081_v42 = vsel %vm5192_vm7, %v4457_v38, %v2080_v24  ;;  %v5968_v13 = vrot.slane %v2236_v62, 5 }
 0x20c   : > { %v2242_v17 = vrot.slane %v2240_v3, 4  ;;  %v1920_v19 = vld [vmem:[#allocation4 + $0x38] sm:$0x1]  ;;  %v1916_v49 = vld [vmem:[#allocation4 + $0x28] sm:$0xf]  ;;  %v2212_v20 = vshll.u32 %v2170_v8, 16  ;;  %v2084_v40 = vsel %vm5192_vm7, %v2082_v31, %v2083_v58  ;;  %v2233_v27 = vor.u32 %v5953_v7, %v5951_v6 }
 0x20d   : > { %1750 = vrot.lane.b32.xlu0 %v1707_v25, %s5042_s29  ;;  %2140 = vrot.lane.b32.xlu1 %v2121_v37, %s6701_s30  ;;  %v2216_v21 = vshrl.u32 %v2170_v8, 16  ;;  %v2005_v22 = vrot.slane %v2003_v14, 5  ;;  %v2007_v26 = vshrl.u32 %v1919_v5, 16  ;;  %v1917_v53 = vld [vmem:[#allocation4 + $0x2c] sm:$0x1]  ;;  %v1994_v28 = vshrl.u32 %v1918_v57, 16 }
 0x20e   : > { %v4880_v16 = vld [vmem:[#allocation5 + $0x38] ss:$12 sps:$4 sm:$0xff]   ;;  %v1997_v32 = vshll.u32 %v1918_v57, 16  ;;  %v1625_v35 = vld [vmem:[#allocation4 + $0x28] sm:$0xf]  ;;  %v2077_v39 = vsel %vm5192_vm7, %v2075_v9, %v2076_v11  ;;  %v2013_v52 = vshll.u32 %v1920_v19, 16  ;;  %v2243_v63 = vor.u32 %v2242_v17, %v5968_v13 }
 0x20f   : > { %v4879_v15 = vld [vmem:[#allocation5 + $0x20] ss:$12 sps:$4 sm:$0xff]   ;;  %v1624_v10 = vld [vmem:[#allocation4 + $0x24] sm:$0xf]  ;;  %v2009_v48 = vrot.slane %v2007_v26, 4  ;;  %v1979_v55 = vshll.u32 %v1916_v49, 16  ;;  %v2074_v31 = vsel %vm5192_vm7, %v4456_v4, %v2073_v18 }
 0x210   : > { %4796 = vmatmul.mubr.msk.bf16.vlgmr.msra.gmra.mxu0 %vm2594_vm4, %v4879_v15  ;;  %v1915_v59 = vld [vmem:[#allocation4 + $0x24] sm:$0xf]  ;;  %1633 = vst.msk [vmem:[#allocation5 + $0x54] sm:$0xf] %vm1465_vm14, %v1625_v35  ;;  %1632 = vst.msk [vmem:[#allocation5 + $0x48] sm:$0xf] %vm1465_vm14, %v1624_v10 }
 0x211   : > { %2138 = vrot.lane.b32.xlu0 %v2120_v45, %s6701_s30  ;;  %1886 = vrot.lane.b32.xlu1 %v1865_v34, %s5044_s11  ;;  %v2169_v2 = vld [vmem:[#allocation4 + $0x24] sm:$0xf]  ;;  %v1996_v23 = vrot.slane %v1994_v28, 4  ;;  %v1999_v25 = vrot.slane %v1997_v32, 5  ;;  %v1983_v37 = vshrl.u32 %v1916_v49, 16  ;;  %v5983_v41 = vrot.slane %v2212_v20, 5 }
 0x212   : > { %4799 = vmatprep.mubr.msk.bf16.mxu0 %vm2594_vm4, %v4880_v16  ;;  %v2218_v46 = vrot.slane %v2216_v21, 4  ;;  %v2010_v51 = vor.u32 %v2009_v48, %v2005_v22  ;;  %v1981_v24 = vrot.slane %v1979_v55, 5  ;;  %v1786_v44 = vld [vmem:[#allocation4 + $0x2c] sm:$0x1]  ;;  %v1989_v34 = vshll.u32 %v1917_v53, 16 }
 0x213   : > { %v2000_v54 = vor.u32 %v1999_v25, %v1996_v23  ;;  %v1985_v45 = vrot.slane %v1983_v37, 4  ;;  %v1970_v50 = vshrl.u32 %v1915_v59, 16  ;;  %v2174_v62 = vld [vmem:[#allocation4 + $0x38] sm:$0x1]  ;;  %v2203_v3 = vshrl.u32 %v2169_v2, 16 }
 0x214   : > { %v2011_v15 = vrot.slane %v2010_v51, 4  ;;  %v2015_v5 = vrot.slane %v2013_v52, 5  ;;  %v1973_v16 = vshll.u32 %v1915_v59, 16  ;;  %v1825_v6 = vrot.slane %v1786_v44, 5  ;;  %v2171_v18 = vld [vmem:[#allocation4 + $0x2c] sm:$0x1] }
 0x215   : > { %1884 = vrot.lane.b32.xlu0 %v1864_v60, %s5044_s11  ;;  %1748 = vrot.lane.b32.xlu1 %v1693_v33, %s5042_s29  ;;  %v2206_v33 = vshll.u32 %v2169_v2, 16  ;;  %v2001_v58 = vrot.slane %v2000_v54, 4  ;;  %v1986_v38 = vor.u32 %v1985_v45, %v1981_v24  ;;  %v1972_v60 = vrot.slane %v1970_v50, 4  ;;  %v1644_v4 = vld [vmem:[#allocation4 + $0x28] sm:$0xf] }
 0x216   : > { %v2016_v7 = vsel %vm5208_vm10, %v2011_v15, %v2015_v5  ;;  %v1975_v8 = vrot.slane %v1973_v16, 5  ;;  %v2246_v9 = vshll.u32 %v2174_v62, 16  ;;  %v1991_v57 = vrot.slane %v1989_v34, 5  ;;  %v1643_v20 = vld [vmem:[#allocation4 + $0x24] sm:$0xf] }
 0x217   : > { %2032 = vst.msk [vmem:[#allocation5 + $0x58] sm:$0xf] %vm1465_vm14, %v2016_v7  ;;  %v2006_v11 = vsel %vm5208_vm10, %v2001_v58, %v2005_v22  ;;  %v1987_v14 = vrot.slane %v1986_v38, 4  ;;  %v1826_v47 = vsel %vm5192_vm7, %v5960_v12, %v1825_v6  ;;  %v2234_v43 = vrot.slane %v2233_v27, 4  ;;  %v1784_v27 = vld [vmem:[#allocation4 + $0x24] sm:$0xe] }
 0x218   : > { %2031 = vst.msk [vmem:[#allocation5 + $0x4c] sm:$0xf] %vm1465_vm14, %v2006_v11  ;;  %v2219_v17 = vor.u32 %v2218_v46, %v5983_v41  ;;  %v2205_v19 = vrot.slane %v2203_v3, 4  ;;  %v2208_v49 = vrot.slane %v2206_v33, 5  ;;  %v2248_v22 = vrot.slane %v2246_v9, 5 }
 0x219   : > { %1746 = vrot.lane.b32.xlu0 %v1683_v29, %s5042_s29  ;;  %2099 = vrot.lane.b32.xlu1 %v2084_v40, %s5042_s29  ;;  %v2244_v29 = vrot.slane %v2243_v63, 4  ;;  %v1992_v21 = vsel %vm5208_vm10, %v1987_v14, %v1991_v57  ;;  %v2222_v26 = vshll.u32 %v2171_v18, 16  ;;  %v1728_v53 = vshll.u32 %v1644_v4, 16  ;;  %v2176_v40 = vld [vmem:[#allocation4 + $0x40] sm:$0xf] }
 0x21a   : > { %2030 = vst.msk [vmem:[#allocation5 + $0x40] sm:$0xf] %vm1465_vm14, %v1992_v21  ;;  %v1732_v28 = vshrl.u32 %v1644_v4, 16  ;;  %v1719_v32 = vshrl.u32 %v1643_v20, 16  ;;  %v1722_v35 = vshll.u32 %v1643_v20, 16  ;;  %v2220_v52 = vrot.slane %v2219_v17, 4 }
 0x21b   : > { %v2249_v48 = vsel %vm5208_vm10, %v2244_v29, %v2248_v22  ;;  %v2209_v55 = vor.u32 %v2208_v49, %v2205_v19  ;;  %v2224_v59 = vrot.slane %v2222_v26, 5  ;;  %v4453_v63 = vrot.slane %v1784_v27, 9  ;;  %v2125_v45 = vld [vmem:[#allocation4 + $0x40] sm:$0xf]  ;;  %v2177_v34 = vld [vmem:[#allocation4 + $0x44] sm:$0x1] }
 0x21c   : > { %v2260_v2 = vshll.u32 %v2176_v40, 16  ;;  %v2264_v23 = vshrl.u32 %v2176_v40, 16  ;;  %v1730_v25 = vrot.slane %v1728_v53, 5  ;;  %v1734_v37 = vrot.slane %v1732_v28, 4  ;;  %v1645_v5 = vld [vmem:[#allocation4 + $0x2c] sm:$0x1] }
 0x21d   : > { %2097 = vrot.lane.b32.xlu0 %v2081_v42, %s5042_s29  ;;  %2095 = vrot.lane.b32.xlu1 %v2077_v39, %s5042_s29  ;;  %v1976_v42 = vor.u32 %v1975_v8, %v1972_v60  ;;  %v2239_v39 = vsel %vm5208_vm10, %v2234_v43, %v5968_v13  ;;  %v1721_v46 = vrot.slane %v1719_v32, 4  ;;  %v1724_v51 = vrot.slane %v1722_v35, 5  ;;  %v2175_v13 = vld [vmem:[#allocation4 + $0x3c] sm:$0xf]  ;;  %v1867_v7 = vld [vmem:[#allocation4 + $0x34] sm:$0xf] }
 0x21e   : > { %v1823_v44 = vsel %vm5192_vm7, %v4453_v63, %v1822_v61  ;;  %v2210_v54 = vrot.slane %v2209_v55, 4  ;;  %v2262_v50 = vrot.slane %v2260_v2, 5  ;;  %v2266_v62 = vrot.slane %v2264_v23, 4  ;;  %v2124_v58 = vld [vmem:[#allocation4 + $0x3c] sm:$0xf] }
 0x21f   : > { %v1977_v12 = vrot.slane %v1976_v42, 4  ;;  %v2251_v3 = vshrl.u32 %v2175_v13, 16  ;;  %v2254_v15 = vshll.u32 %v2175_v13, 16  ;;  %v1735_v16 = vor.u32 %v1734_v37, %v1730_v25  ;;  %v2315_v11 = vld [vmem:[#allocation4 + $0x3c] sm:$0xe] }
 0x220   : > { %v1725_v33 = vor.u32 %v1724_v51, %v1721_v46  ;;  %v2215_v56 = vsel %vm5208_vm10, %v2210_v54, %v5983_v41  ;;  %v2270_v61 = vshll.u32 %v2177_v34, 16  ;;  %v1738_v38 = vshll.u32 %v1645_v5, 16  ;;  %v2316_v14 = vld [vmem:[#allocation4 + $0x40] sm:$0xf]  ;;  %v2317_v57 = vld [vmem:[#allocation4 + $0x44] sm:$0x1] }
 0x221   : > { %2093 = vrot.lane.b32.xlu0 %v2074_v31, %s5042_s29  ;;  %1841 = vrot.lane.b32.xlu1 %v1826_v47, %s6701_s30  ;;  %v1982_v10 = vsel %vm5208_vm10, %v1977_v12, %v1981_v24  ;;  %v2225_v24 = vsel %vm5208_vm10, %v2220_v52, %v2224_v59  ;;  %v2267_v60 = vor.u32 %v2266_v62, %v2262_v50  ;;  %v2253_v31 = vrot.slane %v2251_v3, 4  ;;  %v1866_v27 = vld [vmem:[#allocation4 + $0x30] sm:$0xf] }
 0x222   : > { %2029 = vst.msk [vmem:[#allocation5 + $0x34] sm:$0xf] %vm1465_vm14, %v1982_v10  ;;  %v2256_v6 = vrot.slane %v2254_v15, 5  ;;  %v1736_v8 = vrot.slane %v1735_v16, 4  ;;  %v1726_v9 = vrot.slane %v1725_v33, 4  ;;  %v4461_v41 = vrot.slane %v2315_v11, 9 }
 0x223   : > { %v2353_v47 = vrot.slane %v2316_v14, 5  ;;  %v2356_v43 = vrot.slane %v2317_v57, 5  ;;  %v1740_v29 = vrot.slane %v1738_v38, 5  ;;  %v2268_v18 = vrot.slane %v2267_v60, 4 }
 0x224   : > { %v2272_v4 = vrot.slane %v2270_v61, 5  ;;  %v2257_v42 = vor.u32 %v2256_v6, %v2253_v31  ;;  %v1731_v21 = vsel %vm5208_vm10, %v1726_v9, %v1730_v25 }
 0x225   : > { %2282 = vrot.lane.b32.xlu0 %v2239_v39, %s5044_s11  ;;  %2284 = vrot.lane.b32.xlu1 %v2249_v48, %s5044_s11  ;;  %v2354_v19 = vsel %vm5192_vm7, %v4461_v41, %v2353_v47  ;;  %v2355_v49 = vrot.slane %v2353_v47, 4  ;;  %v1741_v20 = vsel %vm5208_vm10, %v1736_v8, %v1740_v29 }
 0x226   : > { %2372 = vst.msk [vmem:[#allocation5 + $0x50] sm:$0xf] %vm1465_vm14, %v2354_v19  ;;  %v2273_v22 = vsel %vm5208_vm10, %v2268_v18, %v2272_v4  ;;  %v2258_v26 = vrot.slane %v2257_v42, 4 }
 0x227   : > { %v2357_v12 = vsel %vm5192_vm7, %v2355_v49, %v2356_v43 }
 0x228   : > { %2373 = vst.msk [vmem:[#allocation5 + $0x5c] sm:$0xf] %vm1465_vm14, %v2357_v12  ;;  %v2263_v28 = vsel %vm5208_vm10, %v2258_v26, %v2262_v50  ;;  %v2949_v12 = vld [vmem:[#allocation6 + $0x4] sm:$0xf]  ;;  %vm3080_vm14 = vcmask 1043968  }
 0x229   : > { %2280 = vrot.lane.b32.xlu1 %v2225_v24, %s5044_s11  ;;  %1839 = vrot.lane.b32.xlu0 %v1823_v44, %s6701_s30 }
 0x22d   : > { %2148 = vrot.lane.b32.xlu1 %v2125_v45, %s6701_s30  ;;  %2278 = vrot.lane.b32.xlu0 %v2215_v56, %s5044_s11 }
 0x22f   : > { %v4905_v10 = vld [vmem:[#allocation5 + $0x50] ss:$12 sps:$4 sm:$0xff]  }
 0x230   : > { %4800 = vmatmul.mubr.msk.bf16.gmra.mxu0 %vm2594_vm4, %v4905_v10  ;;  %v2950_v10 = vld [vmem:[#allocation6 + $0x8] sm:$0x1] }
 0x231   : > { %1890 = vrot.lane.b32.xlu1 %v1867_v7, %s5044_s11  ;;  %2146 = vrot.lane.b32.xlu0 %v2124_v58, %s6701_s30 }
 0x233   : > { %v2135_v17 = vpop.permute.xlu0 %2134 }
 0x235   : > { %1756 = vrot.lane.b32.xlu1 %v1741_v20, %s5042_s29  ;;  %1754 = vrot.lane.b32.xlu0 %v1731_v21, %s5042_s29  ;;  %v2948_v21 = vld [vmem:[#allocation6] sm:$0xf]  ;;  %s4416_s29 = sshll.u32 %s350_s25, 5 }
 0x236   : > { %v2964_v26 = vshll.u32 %v2948_v21, 16 }
 0x237   : > { %v1881_v53 = vpop.permute.xlu0 %1880  ;;  %v2137_v40 = vpop.permute.xlu1 %2136 }
 0x239   : > { %2288 = vrot.lane.b32.xlu1 %v2273_v22, %s5044_s11  ;;  %1888 = vrot.lane.b32.xlu0 %v1866_v27, %s5044_s11  ;;  %v2961_v22 = vshrl.u32 %v2948_v21, 16  ;;  %v4919_v21 = vld [vmem:[%s6697_s7 + $0x50] sm:$0xff]  }
 0x23b   : > { %v1877_v32 = vpop.permute.xlu0 %1876  ;;  %v1883_v35 = vpop.permute.xlu1 %1882  ;;  %v2963_v27 = vrot.slane %v2961_v22, 4 }
 0x23c   : > { %1901 = vst.msk [vmem:[#allocation5] sm:$0xf] %vm1900_vm5, %v1877_v32 }
 0x23d   : > { %2286 = vrot.lane.b32.xlu0 %v2263_v28, %s5044_s11  ;;  %v2966_v28 = vrot.slane %v2964_v26, 5  ;;  %s352_s11 = scalar_lea.vmem [#allocation8], %s4416_s29  ;;  %s5045_s29 = smov [#allocation8]  }
 0x23e   : > { %s4350_s27 = sshll.u32 %s352_s11, 4  ;;  %s6646_s27 = int_to_ptr.vmem [resolvable:$true] %s4350_s27 }
 0x23f   : > { %v2090_v39 = vpop.permute.xlu0 %2089  ;;  %v1879_v48 = vpop.permute.xlu1 %1878  ;;  %s4970_s21 = scalar_lea.vmem %s6646_s27, 512 }
 0x240   : > { %2111 = vst.msk [vmem:[#allocation5 + $0x1c] sm:$0xf] %vm1766_vm0, %v2090_v39  ;;  %v2967_v39 = vor.u32 %v2966_v28, %v2963_v27  ;;  %p4971_p11 = scmp.ne.s32.totalorder %s6646_s27, %s4970_s21 }
 0x241   : > { %1902 = vst.msk [vmem:[#allocation5 + $0xc] sm:$0xf] %vm1900_vm5, %v1879_v48 }
 0x242   : > { %p4972_p12 = pnand %p4971_p11, %p5139_p5 }
 0x243   : > { %v2092_v52 = vpop.permute.xlu1 %2091  ;;  %v1836_v63 = vpop.permute.xlu0 %1835 }
 0x244   : > { %2112 = vst.msk [vmem:[#allocation5 + $0x28] sm:$0xf] %vm1766_vm0, %v2092_v52  ;;  %v2980_v52 = vshll.u32 %v2950_v10, 16  ;;  %p4973_p13 = pneg %p4972_p12 }
 0x247   : > { %v1838_v55 = vpop.permute.xlu1 %1837 }
 0x248   : > { %v4897_v45 = vld [vmem:[#allocation5] ss:$12 sps:$4 sm:$0xff]  }
 0x24b   : > { %v2088_v59 = vpop.permute.xlu1 %2087 }
 0x24c   : > { %2110 = vst.msk [vmem:[#allocation5 + $0x10] sm:$0xf] %vm1766_vm0, %v2088_v59 }
 0x24d   : > { %2159 = vst.msk [vmem:[#allocation5 + $0x10] sm:$0xf] %vm1851_vm1, %v2137_v40  ;;  %v2974_v40 = vshrl.u32 %v2949_v12, 16 }
 0x24f   : > { %v1834_v2 = vpop.permute.xlu1 %1833 }
 0x26f   : > { %v2143_v23 = vpop.permute.xlu0 %2142 }
 0x273   : > { %v2086_v25 = vpop.permute.xlu0 %2085  ;;  %v2145_v37 = vpop.permute.xlu1 %2144 }
 0x274   : > { %2109 = vst.msk [vmem:[#allocation5 + $0x4] sm:$0xf] %vm1766_vm0, %v2086_v25  ;;  %v4910_v25 = vld [vmem:[%s6697_s7 + $0x38] sm:$0xff]  }
 0x275   : > { %2158 = vst.msk [vmem:[#allocation5 + $0x4] sm:$0xf] %vm1851_vm1, %v2135_v17 }
 0x277   : > { %v2275_v46 = vpop.permute.xlu0 %2274  ;;  %v2277_v51 = vpop.permute.xlu1 %2276 }
 0x278   : > { %2298 = vst.msk [vmem:[#allocation5 + $0x4] sm:$0xf] %vm1900_vm5, %v2275_v46  ;;  %2299 = vst.msk [vmem:[#allocation5 + $0x10] sm:$0xf] %vm1900_vm5, %v2277_v51  ;;  %v2932_v46 = vld [vmem:[#allocation6] sm:$0xf] }
 0x279   : > { %v4912_v51 = vld [vmem:[%s6697_s7 + $0x30] sm:$0xff]   ;;  %2940 = vst.msk [vmem:[#allocation7] sm:$0xf] %vm2779_vm8, %v2932_v46 }
 0x27b   : > { %v1832_v13 = vpop.permute.xlu0 %1831  ;;  %v1753_v24 = vpop.permute.xlu1 %1752 }
 0x27c   : > { %1772 = vst.msk [vmem:[#allocation5 + $0x3c] sm:$0xf] %vm1766_vm0, %v1753_v24 }
 0x27d   : > { %1857 = vst.msk [vmem:[#allocation5 + $0x3c] sm:$0xf] %vm1851_vm1, %v1838_v55  ;;  %v2968_v55 = vrot.slane %v2967_v39, 4 }
 0x27f   : > { %v1751_v44 = vpop.permute.xlu0 %1750  ;;  %v2141_v54 = vpop.permute.xlu1 %2140  ;;  %v4899_v34 = vld [vmem:[#allocation5 + $0x4] ss:$12 sps:$4 sm:$0xff]  }
 0x280   : > { %1771 = vst.msk [vmem:[#allocation5 + $0x30] sm:$0xf] %vm1766_vm0, %v1751_v44  ;;  %2639 = vmatprep.mubr.bf16.mxu1 %v4899_v34  ;;  %v4913_v44 = vld [vmem:[%s6697_s7 + $0x68] sm:$0xff]  }
 0x281   : > { %2161 = vst.msk [vmem:[#allocation5 + $0x28] sm:$0xf] %vm1851_vm1, %v2141_v54  ;;  %1856 = vst.msk [vmem:[#allocation5 + $0x30] sm:$0xf] %vm1851_vm1, %v1836_v63  ;;  %2640 = vmatmul.mubr.bf16.vlgmr.msra.gmra.mxu1 %v4897_v45  ;;  %v2982_v63 = vrot.slane %v2980_v52, 5 }
 0x282   : > { %v3089_v54 = vld [vmem:[#allocation6] sm:$0xe]  ;;  %v3090_v45 = vld [vmem:[#allocation6 + $0x4] sm:$0xf] }
 0x283   : > { %v2139_v50 = vpop.permute.xlu0 %2138  ;;  %v1887_v62 = vpop.permute.xlu1 %1886  ;;  %v4506_v34 = vrot.slane %v3089_v54, 9 }
 0x284   : > { %2160 = vst.msk [vmem:[#allocation5 + $0x1c] sm:$0xf] %vm1851_vm1, %v2139_v50  ;;  %v3115_v50 = vrot.slane %v3090_v45, 5 }
 0x285   : > { %1906 = vst.msk [vmem:[#allocation5 + $0x3c] sm:$0xf] %vm1900_vm5, %v1887_v62  ;;  %v4914_v62 = vld [vmem:[%s6697_s7 + $0x28] sm:$0xff]  }
 0x286   : > { %v3117_v22 = vrot.slane %v3115_v50, 4 }
 0x287   : > { %v1885_v3 = vpop.permute.xlu0 %1884  ;;  %v1749_v15 = vpop.permute.xlu1 %1748 }
 0x288   : > { %1905 = vst.msk [vmem:[#allocation5 + $0x30] sm:$0xf] %vm1900_vm5, %v1885_v3  ;;  %v3116_v3 = vsel %vm5192_vm7, %v4506_v34, %v3115_v50 }
 0x289   : > { %1770 = vst.msk [vmem:[#allocation5 + $0x24] sm:$0xf] %vm1766_vm0, %v1749_v15 }
 0x28a   : > { %1855 = vst.msk [vmem:[#allocation5 + $0x24] sm:$0xf] %vm1851_vm1, %v1834_v2 }
 0x28b   : > { %1904 = vst.msk [vmem:[#allocation5 + $0x24] sm:$0xf] %vm1900_vm5, %v1883_v35  ;;  %v1747_v5 = vpop.permute.xlu0 %1746  ;;  %v2100_v16 = vpop.permute.xlu1 %2099  ;;  %v2976_v35 = vrot.slane %v2974_v40, 4 }
 0x28c   : > { %1769 = vst.msk [vmem:[#allocation5 + $0x18] sm:$0xf] %vm1766_vm0, %v1747_v5  ;;  %2116 = vst.msk [vmem:[#allocation5 + $0x58] sm:$0xf] %vm1766_vm0, %v2100_v16  ;;  %v4915_v16 = vld [vmem:[%s6697_s7 + $0x60] sm:$0xff]  }
 0x28d   : > { %1854 = vst.msk [vmem:[#allocation5 + $0x18] sm:$0xf] %vm1851_vm1, %v1832_v13  ;;  %v2933_v13 = vld [vmem:[#allocation6 + $0x4] sm:$0xf] }
 0x28e   : > { %1903 = vst.msk [vmem:[#allocation5 + $0x18] sm:$0xf] %vm1900_vm5, %v1881_v53  ;;  %v2970_v53 = vshll.u32 %v2949_v12, 16  ;;  %v3091_v12 = vld [vmem:[#allocation6 + $0x8] sm:$0x1] }
 0x28f   : > { %v2098_v33 = vpop.permute.xlu0 %2097  ;;  %v2096_v56 = vpop.permute.xlu1 %2095  ;;  %2941 = vst.msk [vmem:[#allocation7 + $0x14] sm:$0xf] %vm2779_vm8, %v2933_v13  ;;  %3149 = vst.msk [vmem:[#allocation7 + $0x4] sm:$0xf] %vm2779_vm8, %v3116_v3  ;;  %v3118_v40 = vrot.slane %v3091_v12, 5  ;;  %v4923_v13 = vld [vmem:[%s6697_s7 + $0x40] sm:$0xff]  }
 0x290   : > { %2115 = vst.msk [vmem:[#allocation5 + $0x4c] sm:$0xf] %vm1766_vm0, %v2098_v33  ;;  %2114 = vst.msk [vmem:[#allocation5 + $0x40] sm:$0xf] %vm1766_vm0, %v2096_v56  ;;  %v2972_v32 = vrot.slane %v2970_v53, 5 }
 0x291   : > { %2163 = vst.msk [vmem:[#allocation5 + $0x40] sm:$0xf] %vm1851_vm1, %v2145_v37  ;;  %v4911_v37 = vld [vmem:[%s6697_s7 + $0x70] sm:$0xff]   ;;  %v2902_v53 = vld [vmem:[#allocation6 + $0xc] sm:$0xf] }
 0x292   : > { %v2977_v48 = vor.u32 %v2976_v35, %v2972_v32  ;;  %v2973_v0 = vsel %vm5208_vm10, %v2968_v55, %v2972_v32  ;;  %v3119_v32 = vsel %vm5192_vm7, %v3117_v22, %v3118_v40  ;;  %v2908_v55 = vld [vmem:[#allocation6 + $0x14] sm:$0x1] }
 0x293   : > { %v2094_v61 = vpop.permute.xlu0 %2093  ;;  %v1842_v58 = vpop.permute.xlu1 %1841  ;;  %3056 = vrot.lane.b32.xlu0 %v2973_v0, %s6701_s30  ;;  %3150 = vst.msk [vmem:[#allocation7 + $0x18] sm:$0xf] %vm2779_vm8, %v3119_v32 }
 0x294   : > { %2113 = vst.msk [vmem:[#allocation5 + $0x34] sm:$0xf] %vm1766_vm0, %v2094_v61  ;;  %v2978_v59 = vrot.slane %v2977_v48, 4  ;;  %v4916_v61 = vld [vmem:[%s6697_s7 + $0x20] sm:$0xff]   ;;  %v4920_v48 = vld [vmem:[%s6697_s7 + $0x10] sm:$0xff]  }
 0x295   : > { %2162 = vst.msk [vmem:[#allocation5 + $0x34] sm:$0xf] %vm1851_vm1, %v2143_v23  ;;  %v4902_v47 = vld [vmem:[#allocation5 + $0x18] ss:$12 sps:$4 sm:$0xff]   ;;  %v4909_v23 = vld [vmem:[%s6697_s7 + $0x78] sm:$0xff]  }
 0x296   : > { %v2983_v2 = vsel %vm5208_vm10, %v2978_v59, %v2982_v63  ;;  %4693 = vmatprep.subr.bf16.mxu0 %v4909_v23 }
 0x297   : > { %v2283_v38 = vpop.permute.xlu0 %2282  ;;  %v2285_v60 = vpop.permute.xlu1 %2284  ;;  %3058 = vrot.lane.b32.xlu1 %v2983_v2, %s6701_s30  ;;  %4694 = vmatpush3.bf16.msra.mxu0 %v4910_v25  ;;  %v4921_v25 = vld [vmem:[%s6697_s7 + $0x48] sm:$0xff]  }
 0x298   : > { %2302 = vst.msk [vmem:[#allocation5 + $0x34] sm:$0xf] %vm1900_vm5, %v2283_v38  ;;  %2303 = vst.msk [vmem:[#allocation5 + $0x40] sm:$0xf] %vm1900_vm5, %v2285_v60  ;;  %4695 = vmatprep.subr.bf16.mxu0 %v4911_v37  ;;  %v6175_v38 = vld [vmem:[%s6695_s5] ss:$0 sm:$0xff] }
 0x299   : > { %v4922_v37 = vld [vmem:[%s6697_s7 + $0x8] sm:$0xff]  }
 0x29b   : > { %v2281_v31 = vpop.permute.xlu1 %2280  ;;  %v1840_v6 = vpop.permute.xlu0 %1839  ;;  %4696 = vmatpush3.bf16.msra.mxu0 %v4912_v51 }
 0x29c   : > { %2301 = vst.msk [vmem:[#allocation5 + $0x28] sm:$0xf] %vm1900_vm5, %v2281_v31  ;;  %4697 = vmatprep.subr.bf16.mxu0 %v4913_v44  ;;  %v4917_v31 = vld [vmem:[%s6697_s7 + $0x58] sm:$0xff]   ;;  %v4924_v44 = vld [vmem:[%s6697_s7] sm:$0xff]  }
 0x29f   : > { %v2149_v7 = vpop.permute.xlu1 %2148  ;;  %v2279_v8 = vpop.permute.xlu0 %2278  ;;  %v4903_v43 = vld [vmem:[#allocation5 + $0x34] ss:$12 sps:$4 sm:$0xff]   ;;  %4698 = vmatpush3.bf16.msra.mxu0 %v4914_v62 }
 0x2a0   : > { %2165 = vst.msk [vmem:[#allocation5 + $0x58] sm:$0xf] %vm1851_vm1, %v2149_v7  ;;  %v2382_v4 = vld [vmem:[#allocation5 + $0x30] sm:$0xff]  ;;  %v2384_v42 = vld [vmem:[#allocation5 + $0x3c] sm:$0xff]  ;;  %4699 = vmatprep.subr.bf16.mxu0 %v4915_v16  ;;  %v4928_v16 = vld [vmem:[%s6697_s7 + $0xf8] sm:$0xff]  }
 0x2a1   : > { %2300 = vst.msk [vmem:[#allocation5 + $0x1c] sm:$0xf] %vm1900_vm5, %v2279_v8  ;;  %v4468_v19 = vcombine.low %v2382_v4, %v2384_v42  ;;  %v6183_v7 = vld [vmem:[%s6696_s6] ss:$0 sm:$0xff]  ;;  %4733 = vmatprep.subr.bf16.mxu1 %v4928_v16 }
 0x2a3   : > { %v1891_v9 = vpop.permute.xlu1 %1890  ;;  %v2147_v11 = vpop.permute.xlu0 %2146  ;;  %4700 = vmatpush3.bf16.msra.mxu0 %v4916_v61 }
 0x2a4   : > { %2164 = vst.msk [vmem:[#allocation5 + $0x4c] sm:$0xf] %vm1851_vm1, %v2147_v11  ;;  %4701 = vmatprep.subr.bf16.mxu0 %v4917_v31 }
 0x2a7   : > { %v1757_v14 = vpop.permute.xlu1 %1756  ;;  %v1755_v57 = vpop.permute.xlu0 %1754 }
 0x2a8   : > { %v4900_v41 = vld [vmem:[#allocation5 + $0x1c] ss:$12 sps:$4 sm:$0xff]   ;;  %1774 = vst.msk [vmem:[#allocation5 + $0x54] sm:$0xf] %vm1766_vm0, %v1757_v14  ;;  %1773 = vst.msk [vmem:[#allocation5 + $0x48] sm:$0xf] %vm1766_vm0, %v1755_v57 }
 0x2a9   : > { %1859 = vst.msk [vmem:[#allocation5 + $0x54] sm:$0xf] %vm1851_vm1, %v1842_v58  ;;  %1858 = vst.msk [vmem:[#allocation5 + $0x48] sm:$0xf] %vm1851_vm1, %v1840_v6  ;;  %2647 = vmatprep.mubr.bf16.mxu1 %v4900_v41 }
 0x2aa   : > { %1908 = vst.msk [vmem:[#allocation5 + $0x54] sm:$0xf] %vm1900_vm5, %v1891_v9  ;;  %2648 = vmatmul.mubr.bf16.gmra.mxu1 %v4902_v47 }
 0x2ab   : > { %v2289_v29 = vpop.permute.xlu1 %2288  ;;  %v1889_v18 = vpop.permute.xlu0 %1888  ;;  %2655 = vmatprep.mubr.bf16.mxu1 %v4903_v43 }
 0x2ac   : > { %2305 = vst.msk [vmem:[#allocation5 + $0x58] sm:$0xf] %vm1900_vm5, %v2289_v29  ;;  %1907 = vst.msk [vmem:[#allocation5 + $0x48] sm:$0xf] %vm1900_vm5, %v1889_v18 }
 0x2af   : > { %v2287_v17 = vpop.permute.xlu0 %2286 }
 0x2b0   : > { %2304 = vst.msk [vmem:[#allocation5 + $0x4c] sm:$0xf] %vm1900_vm5, %v2287_v17 }
 0x2b2   : > { %2656 = vmatmul.mubr.bf16.gmra.mxu1 %v4468_v19 }
 0x2b3   : > { %v4908_v20 = vld [vmem:[#allocation5 + $0x48] ss:$12 sps:$4 sm:$0xff]  }
 0x2b7   : > { %v4906_v49 = vld [vmem:[#allocation5 + $0x4c] ss:$12 sps:$4 sm:$0xff]  }
 0x2b8   : > { %2663 = vmatprep.mubr.bf16.mxu1 %v4906_v49 }
 0x2ba   : > { %2664 = vmatmul.mubr.bf16.gmra.mxu1 %v4908_v20  ;;  %v4918_v20 = vld [vmem:[%s6697_s7 + $0x18] sm:$0xff]  }
 0x2bb   : > { %4702 = vmatpush3.bf16.msra.mxu0 %v4918_v20 }
 0x2bc   : > { %4703 = vmatprep.subr.bf16.mxu0 %v4919_v21 }
 0x2bf   : > { %4704 = vmatpush3.bf16.msra.mxu0 %v4920_v48 }
 0x2c0   : > { %4705 = vmatprep.subr.bf16.mxu0 %v4921_v25 }
 0x2c3   : > { %4706 = vmatpush3.bf16.msra.mxu0 %v4922_v37 }
 0x2c4   : > { %4707 = vmatprep.subr.bf16.mxu0 %v4923_v13 }
 0x2c7   : > { %4708 = vmatpush3.bf16.msra.mxu0 %v4924_v44 }
 0x2d0   : > { %v6152_v24 = vpop.f32.mrf.mxu0 }
 0x2d2   : > { %v2706_v15 = vpop.f32.mrf.mxu0 }
 0x2d4   : > { %v6170_v58 = vpop.f32.mrf.mxu0 }
 0x2d6   : > { %v2709_v14 = vpop.f32.mrf.mxu0 }
 0x2f0   : > { %v6263_v16 = vpop.f32.mrf.mxu0 }
 0x305   : > { %v3057_v59 = vpop.permute.xlu0 %3056 }
 0x306   : > { %3081 = vst.msk [vmem:[#allocation7] sm:$0xf] %vm3080_vm14, %v3057_v59 }
 0x309   : > { %v3059_v63 = vpop.permute.xlu1 %3058 }
 0x30a   : > { %3082 = vst.msk [vmem:[#allocation7 + $0x14] sm:$0xf] %vm3080_vm14, %v3059_v63 }
 0x341   : > { %v4663_v5 = vpop.f32.mrf.mxu1 }
 0x343   : > { %v4664_v33 = vpop.f32.mrf.mxu1 }
 0x344   : > { %v4665_v56 = vadd.f32 %v4664_v33, %v4663_v5  ;;  %v4929_v33 = vld [vmem:[%s6697_s7 + $0xb8] sm:$0xff]  }
 0x345   : > { %v4666_v60 = vpop.f32.mrf.mxu1  ;;  %4734 = vmatpush3.bf16.msra.mxu1 %v4929_v33 }
 0x346   : > { %v2707_v6 = vadd.f32 %v4665_v56, %v2706_v15 }
 0x347   : > { %v4667_v8 = vpop.f32.mrf.mxu1 }
 0x348   : > { %v2744_v9 = vmul.f32 %v6175_v38, %v2707_v6  ;;  %v4668_v11 = vadd.f32 %v4667_v8, %v4666_v60 }
 0x34a   : > { %v2759_v57 = vadd.f32 %v6183_v7, %v2744_v9  ;;  %v2710_v41 = vadd.f32 %v4668_v11, %v2709_v14 }
 0x34c   : > { %v2767_v47 = vmax.f32 %v2759_v57, 0.0  ;;  %v2745_v43 = vmul.f32 %v6175_v38, %v2710_v41 }
 0x34e   : > { %v4602_v29 = vpack.c.bf16 %v2767_v47, %v2767_v47  ;;  %v2760_v18 = vadd.f32 %v6183_v7, %v2745_v43 }
 0x350   : > { %v2820_v4 = vshrl.u32 %v4602_v29, 16  ;;  %v2768_v42 = vmax.f32 %v2760_v18, 0.0  ;;  %v2823_v17 = vshll.u32 %v4602_v29, 16 }
 0x352   : > { %v2822_v19 = vrot.slane %v2820_v4, 7  ;;  %v4603_v49 = vpack.c.bf16 %v2768_v42, %v2768_v42 }
 0x354   : > { %v2825_v27 = vor.u32 %v2823_v17, %v2822_v19  ;;  %v2828_v28 = vshrl.u32 %v4603_v49, 16  ;;  %v2831_v39 = vshll.u32 %v4603_v49, 16  ;;  %v2826_v0 = vrot.slane %v2822_v19, 4 }
 0x356   : > { %v2903_v35 = vsel %vm6197_vm13, %v2825_v27, %v2902_v53  ;;  %v2830_v10 = vrot.slane %v2828_v28, 7 }
 0x357   : > { %2904 = vst [vmem:[#allocation6 + $0xc] sm:$0xf] %v2903_v35 }
 0x358   : > { %v2833_v2 = vor.u32 %v2831_v39, %v2830_v10  ;;  %v2835_v23 = vrot.slane %v2830_v10, 4 }
 0x35a   : > { %v2834_v46 = vsel %vm5214_vm11, %v2826_v0, %v2833_v2  ;;  %v2909_v51 = vsel %vm6211_vm9, %v2835_v23, %v2908_v55 }
 0x35b   : > { %2905 = vst.msk [vmem:[#allocation6 + $0x10] sm:$0xf] %vm2779_vm8, %v2834_v46  ;;  %2910 = vst [vmem:[#allocation6 + $0x14] sm:$0x1] %v2909_v51 }
 0x35e   : > { %v3157_v54 = vld [vmem:[#allocation6 + $0xc] sm:$0xf] }
 0x35f   : > { %v2951_v45 = vld [vmem:[#allocation6 + $0xc] sm:$0xf]  ;;  %3173 = vrot.lane.b32.xlu0 %v3157_v54, %s6701_s30 }
 0x360   : > { %v3329_v34 = vld [vmem:[#allocation6 + $0xc] sm:$0xe]  ;;  %v2985_v50 = vshrl.u32 %v2951_v45, 16  ;;  %v2988_v62 = vshll.u32 %v2951_v45, 16 }
 0x361   : > { %v3205_v3 = vld [vmem:[#allocation6 + $0xc] sm:$0xf]  ;;  %v4510_v9 = vrot.slane %v3329_v34, 9 }
 0x362   : > { %v3218_v15 = vshrl.u32 %v3205_v3, 16  ;;  %v2934_v5 = vld [vmem:[#allocation6 + $0xc] sm:$0xf]  ;;  %v2987_v56 = vrot.slane %v2985_v50, 4  ;;  %v2990_v61 = vrot.slane %v2988_v62, 5  ;;  %v3221_v60 = vshll.u32 %v3205_v3, 16 }
 0x363   : > { %2942 = vst.msk [vmem:[#allocation7 + $0x28] sm:$0xf] %vm2779_vm8, %v2934_v5  ;;  %v3158_v31 = vld [vmem:[#allocation6 + $0x10] sm:$0xf]  ;;  %v3331_v8 = vld [vmem:[#allocation6 + $0x14] sm:$0x1] }
 0x364   : > { %v3330_v6 = vld [vmem:[#allocation6 + $0x10] sm:$0xf]  ;;  %3175 = vrot.lane.b32.xlu1 %v3158_v31, %s6701_s30  ;;  %v2991_v57 = vor.u32 %v2990_v61, %v2987_v56  ;;  %v2953_v41 = vld [vmem:[#allocation6 + $0x14] sm:$0x1]  ;;  %v3358_v47 = vrot.slane %v3331_v8, 5  ;;  %v3220_v4 = vrot.slane %v3218_v15, 4 }
 0x365   : > { %v3355_v11 = vrot.slane %v3330_v6, 5  ;;  %v2952_v14 = vld [vmem:[#allocation6 + $0x10] sm:$0xf]  ;;  %v3092_v42 = vld [vmem:[#allocation6 + $0xc] sm:$0xe]  ;;  %v3223_v20 = vrot.slane %v3221_v60, 5 }
 0x366   : > { %v2994_v43 = vshll.u32 %v2952_v14, 16  ;;  %v2998_v29 = vshrl.u32 %v2952_v14, 16  ;;  %v3206_v18 = vld [vmem:[#allocation6 + $0x10] sm:$0xf]  ;;  %v2992_v49 = vrot.slane %v2991_v57, 4  ;;  %v3004_v53 = vshll.u32 %v2953_v41, 16  ;;  %v2722_v14 = vpop.f32.mrf.mxu0 }
 0x367   : > { %v3356_v17 = vsel %vm5192_vm7, %v4510_v9, %v3355_v11  ;;  %v3357_v19 = vrot.slane %v3355_v11, 4  ;;  %v3207_v21 = vld [vmem:[#allocation6 + $0x14] sm:$0x1]  ;;  %v3227_v40 = vshll.u32 %v3206_v18, 16  ;;  %v2935_v27 = vld [vmem:[#allocation6 + $0x10] sm:$0xf]  ;;  %v3224_v32 = vor.u32 %v3223_v20, %v3220_v4 }
 0x368   : > { %3381 = vrot.lane.b32.xlu0 %v3356_v17, %s6701_s30  ;;  %v2996_v12 = vrot.slane %v2994_v43, 5  ;;  %v3000_v22 = vrot.slane %v2998_v29, 4  ;;  %v3231_v35 = vshrl.u32 %v3206_v18, 16  ;;  %2943 = vst.msk [vmem:[#allocation7 + $0x3c] sm:$0xf] %vm2779_vm8, %v2935_v27  ;;  %v3237_v63 = vshll.u32 %v3207_v21, 16 }
 0x369   : > { %v3359_v28 = vsel %vm5192_vm7, %v3357_v19, %v3358_v47  ;;  %v3093_v10 = vld [vmem:[#allocation6 + $0x10] sm:$0xf]  ;;  %v3229_v59 = vrot.slane %v3227_v40, 5  ;;  %v3225_v0 = vrot.slane %v3224_v32, 4  ;;  %v4507_v23 = vrot.slane %v3092_v42, 9  ;;  %v4802_v19 = vpop.f32.mrf.mxu0 }
 0x36a   : > { %3383 = vrot.lane.b32.xlu1 %v3359_v28, %s6701_s30  ;;  %v4669_v39 = vpop.f32.mrf.mxu1  ;;  %v2997_v48 = vsel %vm5208_vm10, %v2992_v49, %v2996_v12  ;;  %v3001_v55 = vor.u32 %v3000_v22, %v2996_v12  ;;  %v3233_v2 = vrot.slane %v3231_v35, 4  ;;  %v3122_v25 = vrot.slane %v3093_v10, 5  ;;  %v3094_v37 = vld [vmem:[#allocation6 + $0x14] sm:$0x1]  ;;  %v3439_v29 = vld [vmem:[#allocation6 + $0x3c] sm:$0xf] }
 0x36b   : > { %v3006_v13 = vrot.slane %v3004_v53, 5  ;;  %v3230_v54 = vsel %vm5208_vm10, %v3225_v0, %v3229_v59  ;;  %v3125_v15 = vrot.slane %v3094_v37, 5  ;;  %v3239_v56 = vrot.slane %v3237_v63, 5  ;;  %v3440_v4 = vld [vmem:[#allocation6 + $0x40] sm:$0xf] }
 0x36c   : > { %3060 = vrot.lane.b32.xlu0 %v2997_v48, %s6701_s30  ;;  %v4670_v46 = vpop.f32.mrf.mxu1  ;;  %v3002_v51 = vrot.slane %v3001_v55, 4  ;;  %v3234_v45 = vor.u32 %v3233_v2, %v3229_v59  ;;  %v3123_v34 = vsel %vm5192_vm7, %v4507_v23, %v3122_v25  ;;  %3321 = vst.msk [vmem:[#allocation7 + $0x8] sm:$0xf] %vm2779_vm8, %v3230_v54  ;;  %v3124_v3 = vrot.slane %v3122_v25, 4  ;;  %v2725_v55 = vpop.f32.mrf.mxu0  ;;  %v4930_v59 = vld [vmem:[%s6697_s7 + $0xf0] sm:$0xff]  }
 0x36d   : > { %v4671_v44 = vadd.f32 %v4670_v46, %v4669_v39  ;;  %3151 = vst.msk [vmem:[#allocation7 + $0x2c] sm:$0xf] %vm2779_vm8, %v3123_v34  ;;  %v3515_v21 = vshrl.u32 %v3439_v29, 16  ;;  %v3518_v12 = vshll.u32 %v3439_v29, 16  ;;  %v3524_v40 = vshll.u32 %v3440_v4, 16  ;;  %v4931_v63 = vld [vmem:[%s6697_s7 + $0xb0] sm:$0xff]   ;;  %4735 = vmatprep.subr.bf16.mxu1 %v4930_v59 }
 0x36e   : > { %v3007_v50 = vsel %vm5208_vm10, %v3002_v51, %v3006_v13  ;;  %v4672_v62 = vpop.f32.mrf.mxu1  ;;  %v3235_v33 = vrot.slane %v3234_v45, 4  ;;  %v3126_v60 = vsel %vm5192_vm7, %v3124_v3, %v3125_v15  ;;  %v3528_v32 = vshrl.u32 %v3440_v4, 16  ;;  %v2911_v0 = vld [vmem:[#allocation6 + $0x18] sm:$0xf]  ;;  %v3441_v46 = vld [vmem:[#allocation6 + $0x44] sm:$0x1]  ;;  %4736 = vmatpush3.bf16.msra.mxu1 %v4931_v63 }
 0x36f   : > { %v2715_v5 = vadd.f32 %v6152_v24, %v4671_v44  ;;  %3062 = vrot.lane.b32.xlu1 %v3007_v50, %s6701_s30  ;;  %3152 = vst.msk [vmem:[#allocation7 + $0x40] sm:$0xf] %vm2779_vm8, %v3126_v60  ;;  %v3517_v25 = vrot.slane %v3515_v21, 4  ;;  %v3520_v37 = vrot.slane %v3518_v12, 5  ;;  %v6284_v44 = vrot.slane %v3524_v40, 5  ;;  %v4934_v4 = vld [vmem:[%s6697_s7 + $0xe0] sm:$0xff]  }
 0x370   : > { %v4673_v61 = vpop.f32.mrf.mxu1  ;;  %v3240_v8 = vsel %vm5208_vm10, %v3235_v33, %v3239_v56  ;;  %v3534_v33 = vshll.u32 %v3441_v46, 16  ;;  %v4932_v56 = vld [vmem:[%s6697_s7 + $0xe8] sm:$0xff]   ;;  %v2915_v60 = vld [vmem:[#allocation6 + $0x20] sm:$0x1] }
 0x371   : > { %v2746_v31 = vmul.f32 %v6175_v38, %v2715_v5  ;;  %v4674_v6 = vadd.f32 %v4673_v61, %v4672_v62  ;;  %3322 = vst.msk [vmem:[#allocation7 + $0x1c] sm:$0xf] %vm2779_vm8, %v3240_v8  ;;  %v3530_v62 = vrot.slane %v3528_v32, 4  ;;  %v4933_v61 = vld [vmem:[%s6697_s7 + $0xa8] sm:$0xff]   ;;  %4737 = vmatprep.subr.bf16.mxu1 %v4932_v56 }
 0x372   : > { %v4675_v9 = vpop.f32.mrf.mxu1  ;;  %4738 = vmatpush3.bf16.msra.mxu1 %v4933_v61 }
 0x373   : > { %v2761_v24 = vadd.f32 %v6183_v7, %v2746_v31  ;;  %v2718_v11 = vadd.f32 %v6170_v58, %v4674_v6  ;;  %4739 = vmatprep.subr.bf16.mxu1 %v4934_v4 }
 0x374   : > { %v4676_v57 = vpop.f32.mrf.mxu1 }
 0x375   : > { %v2769_v41 = vmax.f32 %v2761_v24, 0.0  ;;  %v2747_v47 = vmul.f32 %v6175_v38, %v2718_v11  ;;  %v4677_v43 = vadd.f32 %v4676_v57, %v4675_v9  ;;  %v3521_v24 = vor.u32 %v3520_v37, %v3517_v25  ;;  %v2922_v37 = vld [vmem:[#allocation6 + $0x2c] sm:$0x1] }
 0x376   : > { %v4678_v18 = vpop.f32.mrf.mxu1 }
 0x377   : > { %v4604_v42 = vpack.c.bf16 %v2769_v41, %v2769_v41  ;;  %v2762_v17 = vadd.f32 %v6183_v7, %v2747_v47  ;;  %v2723_v49 = vadd.f32 %v4677_v43, %v2722_v14  ;;  %v6312_v40 = vrot.slane %v3521_v24, 4 }
 0x378   : > { %v4679_v20 = vpop.f32.mrf.mxu1 }
 0x379   : > { %v2837_v22 = vshrl.u32 %v4604_v42, 16  ;;  %v2770_v53 = vmax.f32 %v2762_v17, 0.0  ;;  %v2748_v58 = vmul.f32 %v6175_v38, %v2723_v49  ;;  %v4680_v27 = vadd.f32 %v4679_v20, %v4678_v18 }
 0x37a   : > { %v4681_v28 = vpop.f32.mrf.mxu1  ;;  %v2840_v10 = vshll.u32 %v4604_v42, 16  ;;  %v3531_v18 = vor.u32 %v3530_v62, %v6284_v44  ;;  %v3527_v36 = vsel %vm5208_vm10, %v6312_v40, %v6284_v44 }
 0x37b   : > { %v2839_v35 = vrot.slane %v2837_v22, 7  ;;  %v4605_v39 = vpack.c.bf16 %v2770_v53, %v2770_v53  ;;  %v2763_v48 = vadd.f32 %v6183_v7, %v2748_v58  ;;  %v2726_v2 = vadd.f32 %v4680_v27, %v2725_v55  ;;  %v4935_v22 = vld [vmem:[%s6697_s7 + $0xa0] sm:$0xff]   ;;  %v2918_v53 = vld [vmem:[#allocation6 + $0x24] sm:$0xf] }
 0x37c   : > { %v4682_v23 = vpop.f32.mrf.mxu1  ;;  %v6314_v27 = vrot.slane %v3534_v33, 5  ;;  %4740 = vmatpush3.bf16.msra.mxu1 %v4935_v22  ;;  %v4942_v22 = vld [vmem:[%s6697_s7 + $0xc8] sm:$0xff]  }
 0x37d   : > { %v2842_v51 = vor.u32 %v2840_v10, %v2839_v35  ;;  %v2845_v13 = vshrl.u32 %v4605_v39, 16  ;;  %v2771_v54 = vmax.f32 %v2763_v48, 0.0  ;;  %v2749_v45 = vmul.f32 %v6175_v38, %v2726_v2  ;;  %v4936_v10 = vld [vmem:[%s6697_s7 + $0xd8] sm:$0xff]  }
 0x37e   : > { %v4683_v34 = vadd.f32 %v4682_v23, %v4681_v28  ;;  %v4684_v50 = vpop.f32.mrf.mxu1  ;;  %v2848_v5 = vshll.u32 %v4605_v39, 16  ;;  %v2843_v11 = vrot.slane %v2839_v35, 4  ;;  %v6316_v35 = vrot.slane %v3531_v18, 4  ;;  %4741 = vmatprep.subr.bf16.mxu1 %v4936_v10 }
 0x37f   : > { %v2912_v3 = vsel %vm6197_vm13, %v2842_v51, %v2911_v0  ;;  %v2847_v15 = vrot.slane %v2845_v13, 7  ;;  %v4606_v31 = vpack.c.bf16 %v2771_v54, %v2771_v54  ;;  %v2764_v6 = vadd.f32 %v6183_v7, %v2749_v45 }
 0x380   : > { %2913 = vst [vmem:[#allocation6 + $0x18] sm:$0xf] %v2912_v3  ;;  %v2731_v8 = vadd.f32 %v6263_v16, %v4683_v34  ;;  %v4685_v9 = vpop.f32.mrf.mxu1  ;;  %v4940_v3 = vld [vmem:[%s6697_s7 + $0xd0] sm:$0xff]   ;;  %v3537_v52 = vsel %vm5208_vm10, %v6316_v35, %v6314_v27 }
 0x381   : > { %v2850_v14 = vor.u32 %v2848_v5, %v2847_v15  ;;  %v2852_v57 = vrot.slane %v2847_v15, 4  ;;  %v4686_v41 = vadd.f32 %v4685_v9, %v4684_v50  ;;  %v2854_v47 = vshrl.u32 %v4606_v31, 16 }
 0x382   : > { %v2772_v43 = vmax.f32 %v2764_v6, 0.0  ;;  %v2750_v29 = vmul.f32 %v6175_v38, %v2731_v8  ;;  %v2857_v20 = vshll.u32 %v4606_v31, 16 }
 0x383   : > { %v2851_v16 = vsel %vm5214_vm11, %v2843_v11, %v2850_v14  ;;  %v2916_v42 = vsel %vm6211_vm9, %v2852_v57, %v2915_v60  ;;  %v2734_v17 = vadd.f32 %v4802_v19, %v4686_v41  ;;  %v2856_v49 = vrot.slane %v2854_v47, 7 }
 0x384   : > { %2914 = vst.msk [vmem:[#allocation6 + $0x1c] sm:$0xf] %vm2779_vm8, %v2851_v16  ;;  %2917 = vst [vmem:[#allocation6 + $0x20] sm:$0x1] %v2916_v42  ;;  %v4607_v21 = vpack.c.bf16 %v2772_v43, %v2772_v43  ;;  %v2765_v12 = vadd.f32 %v6183_v7, %v2750_v29  ;;  %v2925_v43 = vld [vmem:[#allocation6 + $0x30] sm:$0xf] }
 0x385   : > { %v2751_v58 = vmul.f32 %v6175_v38, %v2734_v17  ;;  %v2859_v19 = vor.u32 %v2857_v20, %v2856_v49  ;;  %v2860_v28 = vrot.slane %v2856_v49, 4  ;;  %v4941_v42 = vld [vmem:[%s6697_s7 + $0x90] sm:$0xff]  }
 0x386   : > { %v2862_v32 = vshrl.u32 %v4607_v21, 16  ;;  %v2865_v39 = vshll.u32 %v4607_v21, 16  ;;  %v2773_v48 = vmax.f32 %v2765_v12, 0.0  ;;  %v2929_v21 = vld [vmem:[#allocation6 + $0x38] sm:$0x1] }
 0x387   : > { %v2766_v55 = vadd.f32 %v6183_v7, %v2751_v58  ;;  %v3159_v59 = vld [vmem:[#allocation6 + $0x18] sm:$0xf]  ;;  %v2919_v63 = vsel %vm6197_vm13, %v2859_v19, %v2918_v53  ;;  %v4937_v7 = vld [vmem:[%s6697_s7 + $0x98] sm:$0xff]  }
 0x388   : > { %v3332_v38 = vld [vmem:[#allocation6 + $0x18] sm:$0xe]  ;;  %v2864_v0 = vrot.slane %v2862_v32, 7  ;;  %3177 = vrot.lane.b32.xlu0 %v3159_v59, %s6701_s30  ;;  %2920 = vst [vmem:[#allocation6 + $0x24] sm:$0xf] %v2919_v63  ;;  %v4608_v46 = vpack.c.bf16 %v2773_v48, %v2773_v48  ;;  %4742 = vmatpush3.bf16.msra.mxu1 %v4937_v7 }
 0x389   : > { %v4511_v2 = vrot.slane %v3332_v38, 9  ;;  %v3430_v23 = vld [vmem:[#allocation6 + $0x18] sm:$0xf]  ;;  %v2774_v51 = vmax.f32 %v2766_v55, 0.0  ;;  %4743 = vmatprep.subr.bf16.mxu1 %v4940_v3 }
 0x38a   : > { %v6325_v25 = vld [vmem:[#allocation6 + $0x18] sm:$0xf]  ;;  %v3443_v13 = vshrl.u32 %v3430_v23, 16  ;;  %v3446_v54 = vshll.u32 %v3430_v23, 16  ;;  %v2867_v45 = vor.u32 %v2865_v39, %v2864_v0  ;;  %v2869_v34 = vrot.slane %v2864_v0, 4 }
 0x38b   : > { %v3009_v50 = vshrl.u32 %v6325_v25, 16  ;;  %v3012_v62 = vshll.u32 %v6325_v25, 16  ;;  %v2871_v15 = vshrl.u32 %v4608_v46, 16  ;;  %v2874_v5 = vshll.u32 %v4608_v46, 16  ;;  %v3160_v56 = vld [vmem:[#allocation6 + $0x1c] sm:$0xf] }
 0x38c   : > { %v4609_v33 = vpack.c.bf16 %v2774_v51, %v2774_v51  ;;  %v3333_v61 = vld [vmem:[#allocation6 + $0x1c] sm:$0xf]  ;;  %v2868_v60 = vsel %vm5214_vm11, %v2860_v28, %v2867_v45  ;;  %v2923_v31 = vsel %vm6211_vm9, %v2869_v34, %v2922_v37  ;;  %3179 = vrot.lane.b32.xlu1 %v3160_v56, %s6701_s30  ;;  %v3334_v8 = vld [vmem:[#allocation6 + $0x20] sm:$0x1]  ;;  %v3445_v24 = vrot.slane %v3443_v13, 4  ;;  %4744 = vmatpush3.bf16.msra.mxu1 %v4941_v42 }
 0x38d   : > { %v3362_v6 = vrot.slane %v3333_v61, 5  ;;  %v3431_v9 = vld [vmem:[#allocation6 + $0x1c] sm:$0xf]  ;;  %2921 = vst.msk [vmem:[#allocation6 + $0x28] sm:$0xf] %vm2779_vm8, %v2868_v60  ;;  %v2873_v11 = vrot.slane %v2871_v15, 7  ;;  %4745 = vmatprep.subr.bf16.mxu1 %v4942_v22 }
 0x38e   : > { %2924 = vst [vmem:[#allocation6 + $0x2c] sm:$0x1] %v2923_v31  ;;  %v2879_v14 = vshrl.u32 %v4609_v33, 16  ;;  %v2882_v57 = vshll.u32 %v4609_v33, 16  ;;  %v3365_v41 = vrot.slane %v3334_v8, 5  ;;  %v3448_v4 = vrot.slane %v3446_v54, 5 }
 0x38f   : > { %v3432_v47 = vld [vmem:[#allocation6 + $0x20] sm:$0x1]  ;;  %v3363_v29 = vsel %vm5192_vm7, %v4511_v2, %v3362_v6  ;;  %v3364_v18 = vrot.slane %v3362_v6, 4  ;;  %v3452_v16 = vshll.u32 %v3431_v9, 16  ;;  %v2876_v17 = vor.u32 %v2874_v5, %v2873_v11  ;;  %v6350_v53 = vld [vmem:[#allocation6 + $0x24] sm:$0xe] }
 0x390   : > { %v2877_v49 = vrot.slane %v2873_v11, 4  ;;  %v2881_v20 = vrot.slane %v2879_v14, 7  ;;  %3385 = vrot.lane.b32.xlu0 %v3363_v29, %s6701_s30  ;;  %v3456_v12 = vshrl.u32 %v3431_v9, 16  ;;  %v3449_v19 = vor.u32 %v3448_v4, %v3445_v24  ;;  %v2955_v10 = vld [vmem:[#allocation6 + $0x1c] sm:$0xf] }
 0x391   : > { %v3366_v58 = vsel %vm5192_vm7, %v3364_v18, %v3365_v41  ;;  %v3454_v28 = vrot.slane %v3452_v16, 5  ;;  %v3462_v32 = vshll.u32 %v3432_v47, 16  ;;  %v4515_v39 = vrot.slane %v6350_v53, 9  ;;  %v2956_v38 = vld [vmem:[#allocation6 + $0x20] sm:$0x1]  ;;  %v4943_v56 = vld [vmem:[%s6697_s7 + $0x88] sm:$0xff]  }
 0x392   : > { %v2926_v48 = vsel %vm6197_vm13, %v2876_v17, %v2925_v43  ;;  %v2884_v55 = vor.u32 %v2882_v57, %v2881_v20  ;;  %v2886_v59 = vrot.slane %v2881_v20, 4  ;;  %3387 = vrot.lane.b32.xlu1 %v3366_v58, %s6701_s30  ;;  %v3161_v63 = vld [vmem:[#allocation6 + $0x24] sm:$0xf]  ;;  %v3450_v0 = vrot.slane %v3449_v19, 4  ;;  %4746 = vmatpush3.bf16.msra.mxu1 %v4943_v56  ;;  %v6397_v16 = vld [vmem:[%s6697_s7 + $0x118] sm:$0xff]  }
 0x393   : > { %2927 = vst [vmem:[#allocation6 + $0x30] sm:$0xf] %v2926_v48  ;;  %v3458_v2 = vrot.slane %v3456_v12, 4  ;;  %v3464_v23 = vrot.slane %v3462_v32, 5  ;;  %v3011_v25 = vrot.slane %v3009_v50, 4  ;;  %v3014_v26 = vrot.slane %v3012_v62, 5  ;;  %4803 = vmatprep.subr.bf16.mxu0 %v6397_v16 }
 0x394   : > { %v2885_v37 = vsel %vm5214_vm11, %v2877_v49, %v2884_v55  ;;  %v2930_v46 = vsel %vm6211_vm9, %v2886_v59, %v2929_v21  ;;  %3181 = vrot.lane.b32.xlu0 %v3161_v63, %s6701_s30  ;;  %v3018_v51 = vshll.u32 %v2955_v10, 16  ;;  %v3335_v13 = vld [vmem:[#allocation6 + $0x24] sm:$0xe]  ;;  %v6363_v7 = vld [vmem:[#allocation6 + $0x28] sm:$0xf]  ;;  %v3455_v3 = vsel %vm5208_vm10, %v3450_v0, %v3454_v28 }
 0x395   : > { %v3433_v54 = vld [vmem:[#allocation6 + $0x24] sm:$0xf]  ;;  %v6365_v45 = vld [vmem:[#allocation6 + $0x2c] sm:$0x1]  ;;  %2928 = vst.msk [vmem:[#allocation6 + $0x34] sm:$0xf] %vm2779_vm8, %v2885_v37  ;;  %v3459_v50 = vor.u32 %v3458_v2, %v3454_v28  ;;  %v3015_v15 = vor.u32 %v3014_v26, %v3011_v25 }
 0x396   : > { %2931 = vst [vmem:[#allocation6 + $0x38] sm:$0x1] %v2930_v46  ;;  %v3162_v34 = vld [vmem:[#allocation6 + $0x28] sm:$0xf]  ;;  %v3603_v62 = vrot.slane %v6363_v7, 5  ;;  %v3020_v5 = vrot.slane %v3018_v51, 5 }
 0x397   : > { %3183 = vrot.lane.b32.xlu1 %v3162_v34, %s6701_s30  ;;  %v3336_v33 = vld [vmem:[#allocation6 + $0x28] sm:$0xf]  ;;  %v3606_v61 = vrot.slane %v6365_v45, 5  ;;  %v3460_v60 = vrot.slane %v3459_v50, 4  ;;  %v3022_v31 = vshrl.u32 %v2955_v10, 16  ;;  %v3028_v6 = vshll.u32 %v2956_v38, 16 }
 0x398   : > { %v6384_v8 = vld [vmem:[#allocation6 + $0x2c] sm:$0x1]  ;;  %v2957_v9 = vld [vmem:[#allocation6 + $0x24] sm:$0xf]  ;;  %v6388_v24 = vrot.slane %v3603_v62, 4  ;;  %3538 = vrot.lane.b32.xlu0 %v3455_v3, %s6701_s30  ;;  %v3016_v11 = vrot.slane %v3015_v15, 4 }
 0x399   : > { %v4512_v14 = vrot.slane %v3335_v13, 9  ;;  %v3369_v57 = vrot.slane %v3336_v33, 5  ;;  %v3434_v41 = vld [vmem:[#allocation6 + $0x28] sm:$0xf]  ;;  %v3465_v47 = vsel %vm5208_vm10, %v3460_v60, %v3464_v23  ;;  %v3024_v43 = vrot.slane %v3022_v31, 4  ;;  %v4945_v28 = vld [vmem:[%s6697_s7 + $0xc0] sm:$0xff]  }
 0x39a   : > { %v3372_v29 = vrot.slane %v6384_v8, 5  ;;  %v3467_v18 = vshrl.u32 %v3433_v54, 16  ;;  %v3435_v4 = vld [vmem:[#allocation6 + $0x2c] sm:$0x1]  ;;  %v3021_v42 = vsel %vm5208_vm10, %v3016_v11, %v3020_v5  ;;  %v3030_v17 = vrot.slane %v3028_v6, 5  ;;  %v4946_v38 = vld [vmem:[%s6697_s7 + $0x80] sm:$0xff]   ;;  %4747 = vmatprep.subr.bf16.mxu1 %v4945_v28 }
 0x39b   : > { %3540 = vrot.lane.b32.xlu1 %v3465_v47, %s6701_s30  ;;  %v3371_v49 = vrot.slane %v3369_v57, 4  ;;  %v3470_v20 = vshll.u32 %v3433_v54, 16  ;;  %v3025_v21 = vor.u32 %v3024_v43, %v3020_v5  ;;  %v3476_v22 = vshll.u32 %v3434_v41, 16  ;;  %v2958_v19 = vld [vmem:[#allocation6 + $0x28] sm:$0xf]  ;;  %4748 = vmatpush3.bf16.msra.mxu1 %v4946_v38 }
 0x39c   : > { %v3469_v12 = vrot.slane %v3467_v18, 4  ;;  %v3480_v58 = vshrl.u32 %v3434_v41, 16  ;;  %3064 = vrot.lane.b32.xlu0 %v3021_v42, %s6701_s30  ;;  %v3370_v32 = vsel %vm5192_vm7, %v4512_v14, %v3369_v57  ;;  %v3486_v48 = vshll.u32 %v3435_v4, 16  ;;  %v2959_v59 = vld [vmem:[#allocation6 + $0x2c] sm:$0x1] }
 0x39d   : > { %v3472_v10 = vrot.slane %v3470_v20, 5  ;;  %v3033_v55 = vshrl.u32 %v2957_v9, 16  ;;  %v3026_v63 = vrot.slane %v3025_v21, 4  ;;  %v6412_v0 = vrot.slane %v3476_v22, 5  ;;  %v3436_v25 = vld [vmem:[#allocation6 + $0x30] sm:$0xf] }
 0x39e   : > { %v3482_v2 = vrot.slane %v3480_v58, 4  ;;  %v3036_v23 = vshll.u32 %v2957_v9, 16  ;;  %v6414_v46 = vrot.slane %v3486_v48, 5  ;;  %v3042_v51 = vshll.u32 %v2958_v19, 16  ;;  %v3437_v3 = vld [vmem:[#allocation6 + $0x34] sm:$0xf] }
 0x39f   : > { %v3473_v37 = vor.u32 %v3472_v10, %v3469_v12  ;;  %v3035_v26 = vrot.slane %v3033_v55, 4  ;;  %v3031_v13 = vsel %vm5208_vm10, %v3026_v63, %v3030_v17  ;;  %v3046_v50 = vshrl.u32 %v2958_v19, 16  ;;  %v3438_v60 = vld [vmem:[#allocation6 + $0x38] sm:$0x1]  ;;  %v3163_v31 = vld [vmem:[#allocation6 + $0x30] sm:$0xf] }
 0x3a0   : > { %v3483_v54 = vor.u32 %v3482_v2, %v6412_v0  ;;  %v3038_v34 = vrot.slane %v3036_v23, 5  ;;  %3066 = vrot.lane.b32.xlu1 %v3031_v13, %s6701_s30  ;;  %3389 = vrot.lane.b32.xlu0 %v3370_v32, %s6701_s30  ;;  %v6421_v5 = vrot.slane %v3042_v51, 5  ;;  %v3052_v33 = vshll.u32 %v2959_v59, 16  ;;  %v3338_v14 = vld [vmem:[#allocation6 + $0x30] sm:$0xe] }
 0x3a1   : > { %v3474_v15 = vrot.slane %v3473_v37, 4  ;;  %v3491_v56 = vshrl.u32 %v3436_v25, 16  ;;  %v3048_v9 = vrot.slane %v3046_v50, 4  ;;  %v3494_v11 = vshll.u32 %v3436_v25, 16  ;;  %v3208_v57 = vld [vmem:[#allocation6 + $0x18] sm:$0xf] }
 0x3a2   : > { %v6423_v6 = vrot.slane %v3483_v54, 4  ;;  %v3039_v8 = vor.u32 %v3038_v34, %v3035_v26  ;;  %v3373_v41 = vsel %vm5192_vm7, %v3371_v49, %v3372_v29  ;;  %v3500_v18 = vshll.u32 %v3437_v3, 16  ;;  %v3339_v4 = vld [vmem:[#allocation6 + $0x34] sm:$0xf]  ;;  %v6430_v42 = vld [vmem:[#allocation6 + $0x38] sm:$0x1] }
 0x3a3   : > { %v3479_v47 = vsel %vm5208_vm10, %v3474_v15, %v6412_v0  ;;  %v3493_v43 = vrot.slane %v3491_v56, 4  ;;  %v3049_v20 = vor.u32 %v3048_v9, %v6421_v5  ;;  %v6433_v21 = vrot.slane %v3052_v33, 5  ;;  %v3209_v22 = vld [vmem:[#allocation6 + $0x1c] sm:$0xf]  ;;  %v3414_v58 = vld [vmem:[#allocation6 + $0x18] sm:$0xf] }
 0x3a4   : > { %v3040_v17 = vrot.slane %v3039_v8, 4  ;;  %v3496_v12 = vrot.slane %v3494_v11, 5  ;;  %3391 = vrot.lane.b32.xlu1 %v3373_v41, %s6701_s30  ;;  %3185 = vrot.lane.b32.xlu0 %v3163_v31, %s6701_s30  ;;  %v6437_v29 = vrot.slane %v3500_v18, 5  ;;  %v3504_v49 = vshrl.u32 %v3437_v3, 16  ;;  %v3210_v32 = vld [vmem:[#allocation6 + $0x20] sm:$0x1] }
 0x3a5   : > { %v3510_v19 = vshll.u32 %v3438_v60, 16  ;;  %v4513_v28 = vrot.slane %v3338_v14, 9  ;;  %3422 = vst.msk [vmem:[#allocation7 + $0xc] sm:$0xf] %vm2779_vm8, %v3414_v58  ;;  %v3415_v10 = vld [vmem:[#allocation6 + $0x1c] sm:$0xf]  ;;  %v3489_v48 = vsel %vm5208_vm10, %v6423_v6, %v6414_v46  ;;  %v3607_v44 = vsel %vm5192_vm7, %v6388_v24, %v3606_v61 }
 0x3a6   : > { %v6444_v55 = vrot.slane %v3049_v20, 4  ;;  %v3497_v59 = vor.u32 %v3496_v12, %v3493_v43  ;;  %v3376_v38 = vrot.slane %v3339_v4, 5  ;;  %v3095_v63 = vld [vmem:[#allocation6 + $0x18] sm:$0xe]  ;;  %3423 = vst.msk [vmem:[#allocation7 + $0x20] sm:$0xf] %vm2779_vm8, %v3415_v10  ;;  %v3045_v25 = vsel %vm5208_vm10, %v3040_v17, %v6421_v5 }
 0x3a7   : > { %v2936_v0 = vld [vmem:[#allocation6 + $0x18] sm:$0xf]  ;;  %v2937_v2 = vld [vmem:[#allocation6 + $0x1c] sm:$0xf]  ;;  %v3164_v23 = vld [vmem:[#allocation6 + $0x34] sm:$0xf] }
 0x3a8   : > { %v3506_v37 = vrot.slane %v3504_v49, 4  ;;  %v6450_v26 = vrot.slane %v3510_v19, 5  ;;  %v3242_v51 = vshrl.u32 %v3208_v57, 16  ;;  %2944 = vst.msk [vmem:[#allocation7 + $0x50] sm:$0xf] %vm2779_vm8, %v2936_v0  ;;  %v3055_v46 = vsel %vm5208_vm10, %v6444_v55, %v6433_v21  ;;  %3187 = vrot.lane.b32.xlu1 %v3164_v23, %s6701_s30  ;;  %3542 = vrot.lane.b32.xlu0 %v3479_v47, %s6701_s30 }
 0x3a9   : > { %2945 = vst.msk [vmem:[#allocation7 + $0x64] sm:$0xf] %vm2779_vm8, %v2937_v2  ;;  %v6458_v13 = vrot.slane %v3497_v59, 4  ;;  %v6462_v54 = vsel %vm5192_vm7, %v4513_v28, %v3376_v38  ;;  %v3379_v34 = vrot.slane %v6430_v42, 5  ;;  %v3096_v50 = vld [vmem:[#allocation6 + $0x1c] sm:$0xf] }
 0x3aa   : > { %v3097_v3 = vld [vmem:[#allocation6 + $0x20] sm:$0x1]  ;;  %v3507_v15 = vor.u32 %v3506_v37, %v6437_v29  ;;  %v3244_v5 = vrot.slane %v3242_v51, 4  ;;  %v3245_v33 = vshll.u32 %v3208_v57, 16  ;;  %v3251_v56 = vshll.u32 %v3209_v22, 16 }
 0x3ab   : > { %v3211_v60 = vld [vmem:[#allocation6 + $0x24] sm:$0xf]  ;;  %v3503_v31 = vsel %vm5208_vm10, %v6458_v13, %v6437_v29  ;;  %v6472_v6 = vrot.slane %v3376_v38, 4  ;;  %v3255_v8 = vshrl.u32 %v3209_v22, 16  ;;  %v3261_v9 = vshll.u32 %v3210_v32, 16 }
 0x3ac   : > { %v3212_v11 = vld [vmem:[#allocation6 + $0x28] sm:$0xf]  ;;  %v6474_v14 = vrot.slane %v3507_v15, 4  ;;  %v3247_v41 = vrot.slane %v3245_v33, 5  ;;  %v3253_v47 = vrot.slane %v3251_v56, 5  ;;  %v4508_v43 = vrot.slane %v3095_v63, 9  ;;  %3544 = vrot.lane.b32.xlu1 %v3489_v48, %s6701_s30  ;;  %3068 = vrot.lane.b32.xlu0 %v3045_v25, %s6701_s30 }
 0x3ad   : > { %v3213_v18 = vld [vmem:[#allocation6 + $0x2c] sm:$0x1]  ;;  %v3416_v4 = vld [vmem:[#allocation6 + $0x24] sm:$0xf]  ;;  %v3257_v57 = vrot.slane %v3255_v8, 4  ;;  %v3263_v17 = vrot.slane %v3261_v9, 5 }
 0x3ae   : > { %v3129_v20 = vrot.slane %v3096_v50, 5  ;;  %v3132_v21 = vrot.slane %v3097_v3, 5  ;;  %v3098_v12 = vld [vmem:[#allocation6 + $0x24] sm:$0xe]  ;;  %3424 = vst.msk [vmem:[#allocation7 + $0x34] sm:$0xf] %vm2779_vm8, %v3416_v4  ;;  %v3513_v22 = vsel %vm5208_vm10, %v6474_v14, %v6450_v26  ;;  %v3248_v29 = vor.u32 %v3247_v41, %v3244_v5 }
 0x3af   : > { %v3417_v58 = vld [vmem:[#allocation6 + $0x28] sm:$0xf]  ;;  %v3266_v49 = vshrl.u32 %v3211_v60, 16  ;;  %v3269_v19 = vshll.u32 %v3211_v60, 16  ;;  %v6483_v32 = vld [vmem:[#allocation6 + $0x2c] sm:$0x1]  ;;  %v3258_v59 = vor.u32 %v3257_v57, %v3253_v47 }
 0x3b0   : > { %v3099_v28 = vld [vmem:[#allocation6 + $0x28] sm:$0xf]  ;;  %3425 = vst.msk [vmem:[#allocation7 + $0x48] sm:$0xf] %vm2779_vm8, %v3417_v58  ;;  %v2938_v10 = vld [vmem:[#allocation6 + $0x24] sm:$0xf]  ;;  %v3130_v48 = vsel %vm5192_vm7, %v4508_v43, %v3129_v20  ;;  %3070 = vrot.lane.b32.xlu1 %v3055_v46, %s6701_s30  ;;  %3546 = vrot.lane.b32.xlu0 %v3503_v31, %s6701_s30 }
 0x3b1   : > { %v2939_v55 = vld [vmem:[#allocation6 + $0x28] sm:$0xf]  ;;  %v3131_v38 = vrot.slane %v3129_v20, 4  ;;  %v3275_v63 = vshll.u32 %v3212_v11, 16  ;;  %2946 = vst.msk [vmem:[#allocation7 + $0x78] sm:$0xf] %vm2779_vm8, %v2938_v10 }
 0x3b2   : > { %2947 = vst.msk [vmem:[#allocation7 + $0x8c] sm:$0xf] %vm2779_vm8, %v2939_v55  ;;  %v3418_v0 = vld [vmem:[#allocation6 + $0x30] sm:$0xf]  ;;  %v3419_v2 = vld [vmem:[#allocation6 + $0x34] sm:$0xf] }
 0x3b3   : > { %v3249_v23 = vrot.slane %v3248_v29, 4  ;;  %3153 = vst.msk [vmem:[#allocation7 + $0x54] sm:$0xf] %vm2779_vm8, %v3130_v48  ;;  %v3268_v25 = vrot.slane %v3266_v49, 4  ;;  %v3271_v37 = vrot.slane %v3269_v19, 5  ;;  %v3279_v26 = vshrl.u32 %v3212_v11, 16 }
 0x3b4   : > { %3426 = vst.msk [vmem:[#allocation7 + $0x5c] sm:$0xf] %vm2779_vm8, %v3418_v0  ;;  %3427 = vst.msk [vmem:[#allocation7 + $0x70] sm:$0xf] %vm2779_vm8, %v3419_v2  ;;  %v3214_v51 = vld [vmem:[#allocation6 + $0x30] sm:$0xf]  ;;  %v3133_v50 = vsel %vm5192_vm7, %v3131_v38, %v3132_v21  ;;  %3548 = vrot.lane.b32.xlu1 %v3513_v22, %s6701_s30  ;;  %3393 = vrot.lane.b32.xlu0 %v6462_v54, %s6701_s30 }
 0x3b5   : > { %v3259_v13 = vrot.slane %v3258_v59, 4  ;;  %v3277_v3 = vrot.slane %v3275_v63, 5  ;;  %v3285_v15 = vshll.u32 %v3213_v18, 16  ;;  %v3215_v5 = vld [vmem:[#allocation6 + $0x34] sm:$0xf]  ;;  %v3254_v33 = vsel %vm5208_vm10, %v3249_v23, %v3253_v47 }
 0x3b6   : > { %3154 = vst.msk [vmem:[#allocation7 + $0x68] sm:$0xf] %vm2779_vm8, %v3133_v50  ;;  %v3272_v56 = vor.u32 %v3271_v37, %v3268_v25  ;;  %v3281_v60 = vrot.slane %v3279_v26, 4  ;;  %v4509_v8 = vrot.slane %v3098_v12, 9  ;;  %v3216_v9 = vld [vmem:[#allocation6 + $0x38] sm:$0x1]  ;;  %v3380_v25 = vsel %vm5192_vm7, %v6472_v6, %v3379_v34 }
 0x3b7   : > { %v3420_v11 = vld [vmem:[#allocation6 + $0x3c] sm:$0xf]  ;;  %3323 = vst.msk [vmem:[#allocation7 + $0x30] sm:$0xf] %vm2779_vm8, %v3254_v33  ;;  %v3264_v14 = vsel %vm5208_vm10, %v3259_v13, %v3263_v17  ;;  %v3287_v41 = vrot.slane %v3285_v15, 5  ;;  %v3136_v43 = vrot.slane %v3099_v28, 5  ;;  %v3604_v6 = vsel %vm5192_vm7, %v4515_v39, %v3603_v62 }
 0x3b8   : > { %v3139_v46 = vrot.slane %v6483_v32, 5  ;;  %3428 = vst.msk [vmem:[#allocation7 + $0x84] sm:$0xf] %vm2779_vm8, %v3420_v11  ;;  %v3421_v31 = vld [vmem:[#allocation6 + $0x40] sm:$0xf]  ;;  %v3273_v47 = vrot.slane %v3272_v56, 4  ;;  %v3282_v18 = vor.u32 %v3281_v60, %v3277_v3  ;;  %3395 = vrot.lane.b32.xlu1 %v3380_v25, %s6701_s30  ;;  %3550 = vrot.lane.b32.xlu0 %v3527_v36, %s6701_s30 }
 0x3b9   : > { %3324 = vst.msk [vmem:[#allocation7 + $0x44] sm:$0xf] %vm2779_vm8, %v3264_v14  ;;  %v3290_v4 = vshrl.u32 %v3214_v51, 16  ;;  %v3293_v57 = vshll.u32 %v3214_v51, 16  ;;  %3429 = vst.msk [vmem:[#allocation7 + $0x98] sm:$0xf] %vm2779_vm8, %v3421_v31  ;;  %v3137_v21 = vsel %vm5192_vm7, %v4509_v8, %v3136_v43 }
 0x3ba   : > { %v3570_v20 = vld [vmem:[#allocation6 + $0x18] sm:$0xe]  ;;  %v3138_v17 = vrot.slane %v3136_v43, 4  ;;  %v3299_v12 = vshll.u32 %v3215_v5, 16  ;;  %v3303_v58 = vshrl.u32 %v3215_v5, 16  ;;  %v3278_v49 = vsel %vm5208_vm10, %v3273_v47, %v3277_v3 }
 0x3bb   : > { %v3571_v29 = vld [vmem:[#allocation6 + $0x1c] sm:$0xf]  ;;  %v3283_v19 = vrot.slane %v3282_v18, 4  ;;  %3155 = vst.msk [vmem:[#allocation7 + $0x7c] sm:$0xf] %vm2779_vm8, %v3137_v21  ;;  %v3292_v28 = vrot.slane %v3290_v4, 4 }
 0x3bc   : > { %v3295_v32 = vrot.slane %v3293_v57, 5  ;;  %v3572_v10 = vld [vmem:[#allocation6 + $0x20] sm:$0x1]  ;;  %3325 = vst.msk [vmem:[#allocation7 + $0x58] sm:$0xf] %vm2779_vm8, %v3278_v49  ;;  %v3140_v55 = vsel %vm5192_vm7, %v3138_v17, %v3139_v46  ;;  %v3301_v59 = vrot.slane %v3299_v12, 5  ;;  %3552 = vrot.lane.b32.xlu1 %v3537_v52, %s6701_s30 }
 0x3bd   : > { %v3305_v48 = vrot.slane %v3303_v58, 4  ;;  %v3309_v22 = vshll.u32 %v3216_v9, 16  ;;  %v3288_v54 = vsel %vm5208_vm10, %v3283_v19, %v3287_v41  ;;  %3156 = vst.msk [vmem:[#allocation7 + $0x90] sm:$0xf] %vm2779_vm8, %v3140_v55  ;;  %v4514_v63 = vrot.slane %v3570_v20, 9  ;;  %v4952_v46 = vld [vmem:[%s6697_s7 + $0x110] sm:$0xff]  }
 0x3be   : > { %v3296_v38 = vor.u32 %v3295_v32, %v3292_v28  ;;  %v3596_v0 = vrot.slane %v3571_v29, 5  ;;  %v3576_v2 = vld [vmem:[#allocation6 + $0x30] sm:$0xe]  ;;  %v3577_v23 = vld [vmem:[#allocation6 + $0x34] sm:$0xf]  ;;  %v3599_v51 = vrot.slane %v3572_v10, 5 }
 0x3bf   : > { %3326 = vst.msk [vmem:[#allocation7 + $0x6c] sm:$0xf] %vm2779_vm8, %v3288_v54  ;;  %v3306_v37 = vor.u32 %v3305_v48, %v3301_v59  ;;  %v3311_v26 = vrot.slane %v3309_v22, 5  ;;  %v3578_v13 = vld [vmem:[#allocation6 + $0x38] sm:$0x1]  ;;  %v4516_v40 = vrot.slane %v3576_v2, 9 }
 0x3c0   : > { %v3297_v42 = vrot.slane %v3296_v38, 4  ;;  %v3597_v50 = vsel %vm5192_vm7, %v4514_v63, %v3596_v0  ;;  %v3598_v34 = vrot.slane %v3596_v0, 4  ;;  %3632 = vst.msk [vmem:[#allocation7 + $0x38] sm:$0xf] %vm2779_vm8, %v3604_v6  ;;  %v3610_v36 = vrot.slane %v3577_v23, 5  ;;  %v4954_v47 = vld [vmem:[%s6697_s7 + $0x108] sm:$0xff]  }
 0x3c1   : > { %v3307_v3 = vrot.slane %v3306_v37, 4  ;;  %3630 = vst.msk [vmem:[#allocation7 + $0x10] sm:$0xf] %vm2779_vm8, %v3597_v50  ;;  %v3579_v15 = vld [vmem:[#allocation6 + $0x3c] sm:$0xe]  ;;  %v3613_v7 = vrot.slane %v3578_v13, 5 }
 0x3c2   : > { %v3302_v53 = vsel %vm5208_vm10, %v3297_v42, %v3301_v59  ;;  %v3600_v39 = vsel %vm5192_vm7, %v3598_v34, %v3599_v51  ;;  %3633 = vst.msk [vmem:[#allocation7 + $0x4c] sm:$0xf] %vm2779_vm8, %v3607_v44  ;;  %v3580_v62 = vld [vmem:[#allocation6 + $0x40] sm:$0xf]  ;;  %v3581_v45 = vld [vmem:[#allocation6 + $0x44] sm:$0x1]  ;;  %v3611_v24 = vsel %vm5192_vm7, %v4516_v40, %v3610_v36 }
 0x3c3   : > { %v4517_v5 = vrot.slane %v3579_v15, 9  ;;  %3327 = vst.msk [vmem:[#allocation7 + $0x80] sm:$0xf] %vm2779_vm8, %v3302_v53  ;;  %v3312_v61 = vsel %vm5208_vm10, %v3307_v3, %v3311_v26  ;;  %3631 = vst.msk [vmem:[#allocation7 + $0x24] sm:$0xf] %vm2779_vm8, %v3600_v39  ;;  %v3612_v33 = vrot.slane %v3610_v36, 4 }
 0x3c4   : > { %v3617_v56 = vrot.slane %v3580_v62, 5  ;;  %3328 = vst.msk [vmem:[#allocation7 + $0x94] sm:$0xf] %vm2779_vm8, %v3312_v61  ;;  %3634 = vst.msk [vmem:[#allocation7 + $0x60] sm:$0xf] %vm2779_vm8, %v3611_v24  ;;  %v3620_v60 = vrot.slane %v3581_v45, 5 }
 0x3c5   : > { %v3614_v8 = vsel %vm5192_vm7, %v3612_v33, %v3613_v7  ;;  %v4925_v43 = vld [vmem:[#allocation7] ss:$20 sps:$4 sm:$0xff]   ;;  %v4959_v18 = vld [vmem:[%s6697_s7 + $0x100] sm:$0xff]   ;;  %s4974_s30 = sshll.u32 %s5045_s29, 4  ;;  %s4975_s30 = int_to_ptr.vmem [resolvable:$false] %s4974_s30 }
 0x3c6   : > { %v3618_v9 = vsel %vm5192_vm7, %v4517_v5, %v3617_v56  ;;  %v3619_v11 = vrot.slane %v3617_v56, 4  ;;  %3635 = vst.msk [vmem:[#allocation7 + $0x74] sm:$0xf] %vm2779_vm8, %v3614_v8  ;;  %s4976_s28 = scalar_lea.vmem %s4975_s30, 1024  ;;  %p4977_p0 = scmp.lt.s32.totalorder %s6646_s27, %s4975_s30 }
 0x3c7   : > { %3636 = vst.msk [vmem:[#allocation7 + $0x88] sm:$0xf] %vm2779_vm8, %v3618_v9  ;;  %p4978_p1 = scmp.lt.s32.totalorder %s4976_s28, %s4970_s21 }
 0x3c8   : > { %v3621_v30 = vsel %vm5192_vm7, %v3619_v11, %v3620_v60 }
 0x3c9   : > { %3637 = vst.msk [vmem:[#allocation7 + $0x9c] sm:$0xf] %vm2779_vm8, %v3621_v30  ;;  %v4964_v5 = vld [vmem:[#allocation7 + $0x38] ss:$20 sps:$4 sm:$0xff]   ;;  %p4979_p2 = por %p4978_p1, %p4977_p0 }
 0x3ca   : > { %v4960_v39 = vld [vmem:[#allocation7 + $0x10] ss:$20 sps:$4 sm:$0xff]  }
 0x3cb   : > { %p4980_p3 = pnand %p4979_p2, %p4973_p13 }
 0x3cd   : > { %v4965_v61 = vld [vmem:[#allocation7 + $0x60] ss:$20 sps:$4 sm:$0xff]  }
 0x3d0   : > { %v4969_v56 = vld [vmem:[#allocation7 + $0x88] ss:$20 sps:$4 sm:$0xff]  }
 0x3d1   : > { %v3174_v27 = vpop.permute.xlu0 %3173 }
 0x3d2   : > { %3197 = vst.msk [vmem:[#allocation7 + $0x4] sm:$0xf] %vm3080_vm14, %v3174_v27 }
 0x3d6   : > { %v3176_v35 = vpop.permute.xlu1 %3175 }
 0x3d7   : > { %3198 = vst.msk [vmem:[#allocation7 + $0x18] sm:$0xf] %vm3080_vm14, %v3176_v35 }
 0x3da   : > { %v3382_v52 = vpop.permute.xlu0 %3381 }
 0x3db   : > { %3405 = vst.msk [vmem:[#allocation7 + $0x8] sm:$0xf] %vm3080_vm14, %v3382_v52 }
 0x3dc   : > { %v3384_v14 = vpop.permute.xlu1 %3383 }
 0x3dd   : > { %3406 = vst.msk [vmem:[#allocation7 + $0x1c] sm:$0xf] %vm3080_vm14, %v3384_v14 }
 0x3de   : > { %v3061_v41 = vpop.permute.xlu0 %3060  ;;  %v4927_v1 = vld [vmem:[#allocation7 + $0x4] ss:$20 sps:$4 sm:$0xff]  }
 0x3df   : > { %3083 = vst.msk [vmem:[#allocation7 + $0x28] sm:$0xf] %vm3080_vm14, %v3061_v41  ;;  %4095 = vmatprep.mubr.bf16.mxu0 %v4927_v1 }
 0x3e0   : > { %4096 = vmatmul.mubr.bf16.vlgmr.msra.gmra.mxu0 %v4925_v43 }
 0x3e1   : > { %v3063_v31 = vpop.permute.xlu1 %3062  ;;  %4804 = vmatpush3.bf16.msra.mxu0 %v6397_v16 }
 0x3e2   : > { %3084 = vst.msk [vmem:[#allocation7 + $0x3c] sm:$0xf] %vm3080_vm14, %v3063_v31  ;;  %4805 = vmatprep.subr.bf16.mxu0 %v4952_v46 }
 0x3e4   : > { %v4947_v59 = vld [vmem:[#allocation7 + $0x8] ss:$20 sps:$4 sm:$0xff]  }
 0x3e5   : > { %4806 = vmatpush3.bf16.msra.mxu0 %v4952_v46 }
 0x3e6   : > { %4807 = vmatprep.subr.bf16.mxu0 %v4954_v47 }
 0x3e9   : > { %4808 = vmatpush3.bf16.msra.mxu0 %v4954_v47 }
 0x3ea   : > { %4809 = vmatprep.subr.bf16.mxu0 %v4959_v18 }
 0x3ed   : > { %4810 = vmatpush3.bf16.msra.mxu0 %v4959_v18 }
 0x3fa   : > { %v3178_v4 = vpop.permute.xlu0 %3177 }
 0x3fb   : > { %3199 = vst.msk [vmem:[#allocation7 + $0x2c] sm:$0xf] %vm3080_vm14, %v3178_v4 }
 0x3fe   : > { %v3180_v57 = vpop.permute.xlu1 %3179 }
 0x3ff   : > { %3200 = vst.msk [vmem:[#allocation7 + $0x40] sm:$0xf] %vm3080_vm14, %v3180_v57 }
 0x402   : > { %v3386_v16 = vpop.permute.xlu0 %3385  ;;  %v3644_v17 = vld [vmem:[#allocation7 + $0x28] sm:$0xff] }
 0x403   : > { %3407 = vst.msk [vmem:[#allocation7 + $0x30] sm:$0xf] %vm3080_vm14, %v3386_v16 }
 0x404   : > { %v3388_v20 = vpop.permute.xlu1 %3387 }
 0x405   : > { %3408 = vst.msk [vmem:[#allocation7 + $0x44] sm:$0xf] %vm3080_vm14, %v3388_v20 }
 0x406   : > { %v3182_v21 = vpop.permute.xlu0 %3181  ;;  %v3647_v12 = vld [vmem:[#allocation7 + $0x3c] sm:$0xff] }
 0x407   : > { %3201 = vst.msk [vmem:[#allocation7 + $0x54] sm:$0xf] %vm3080_vm14, %v3182_v21  ;;  %v4938_v58 = vld [vmem:[#allocation7 + $0x2c] ss:$20 sps:$4 sm:$0xff]   ;;  %v4523_v49 = vcombine.low %v3644_v17, %v3647_v12 }
 0x408   : > { %4103 = vmatprep.mubr.bf16.mxu0 %v4938_v58 }
 0x409   : > { %v3184_v29 = vpop.permute.xlu1 %3183  ;;  %4104 = vmatmul.mubr.bf16.gmra.mxu0 %v4523_v49 }
 0x40a   : > { %3202 = vst.msk [vmem:[#allocation7 + $0x68] sm:$0xf] %vm3080_vm14, %v3184_v29  ;;  %v3539_v19 = vpop.permute.xlu0 %3538 }
 0x40b   : > { %3562 = vst.msk [vmem:[#allocation7 + $0xc] sm:$0xf] %vm3080_vm14, %v3539_v19 }
 0x40d   : > { %v3541_v28 = vpop.permute.xlu1 %3540 }
 0x40e   : > { %3563 = vst.msk [vmem:[#allocation7 + $0x20] sm:$0xf] %vm3080_vm14, %v3541_v28  ;;  %v3065_v32 = vpop.permute.xlu0 %3064 }
 0x40f   : > { %3085 = vst.msk [vmem:[#allocation7 + $0x50] sm:$0xf] %vm3080_vm14, %v3065_v32 }
 0x411   : > { %v4950_v0 = vld [vmem:[#allocation7 + $0x54] ss:$20 sps:$4 sm:$0xff]  }
 0x412   : > { %v3067_v10 = vpop.permute.xlu1 %3066  ;;  %v3390_v55 = vpop.permute.xlu0 %3389  ;;  %4111 = vmatprep.mubr.bf16.mxu0 %v4950_v0 }
 0x413   : > { %3086 = vst.msk [vmem:[#allocation7 + $0x64] sm:$0xf] %vm3080_vm14, %v3067_v10  ;;  %3409 = vst.msk [vmem:[#allocation7 + $0x58] sm:$0xf] %vm3080_vm14, %v3390_v55 }
 0x415   : > { %v4949_v48 = vld [vmem:[#allocation7 + $0xc] ss:$20 sps:$4 sm:$0xff]  }
 0x416   : > { %v3392_v22 = vpop.permute.xlu1 %3391  ;;  %v3186_v54 = vpop.permute.xlu0 %3185  ;;  %4160 = vmatprep.mubr.bf16.mxu1 %v4949_v48 }
 0x417   : > { %3410 = vst.msk [vmem:[#allocation7 + $0x6c] sm:$0xf] %vm3080_vm14, %v3392_v22  ;;  %3203 = vst.msk [vmem:[#allocation7 + $0x7c] sm:$0xf] %vm3080_vm14, %v3186_v54  ;;  %4161 = vmatmul.mubr.bf16.vlgmr.msra.gmra.mxu1 %v4947_v59  ;;  %v6624_v54 = vld [vmem:[%s6698_s8] ss:$0 sm:$0xff] }
 0x41a   : > { %v3188_v38 = vpop.permute.xlu1 %3187  ;;  %v3543_v63 = vpop.permute.xlu0 %3542  ;;  %v4953_v2 = vld [vmem:[#allocation7 + $0x50] ss:$20 sps:$4 sm:$0xff]  }
 0x41b   : > { %3204 = vst.msk [vmem:[#allocation7 + $0x90] sm:$0xf] %vm3080_vm14, %v3188_v38  ;;  %3564 = vst.msk [vmem:[#allocation7 + $0x34] sm:$0xf] %vm3080_vm14, %v3543_v63  ;;  %4112 = vmatmul.mubr.bf16.gmra.mxu0 %v4953_v2 }
 0x41e   : > { %v3545_v23 = vpop.permute.xlu1 %3544  ;;  %v3069_v25 = vpop.permute.xlu0 %3068  ;;  %v4963_v45 = vld [vmem:[#allocation7 + $0x58] ss:$20 sps:$4 sm:$0xff]  }
 0x41f   : > { %3565 = vst.msk [vmem:[#allocation7 + $0x48] sm:$0xf] %vm3080_vm14, %v3545_v23  ;;  %3087 = vst.msk [vmem:[#allocation7 + $0x78] sm:$0xf] %vm3080_vm14, %v3069_v25 }
 0x422   : > { %v3071_v37 = vpop.permute.xlu1 %3070  ;;  %v3547_v26 = vpop.permute.xlu0 %3546  ;;  %v3645_v42 = vld [vmem:[#allocation7 + $0x30] sm:$0xff] }
 0x423   : > { %3088 = vst.msk [vmem:[#allocation7 + $0x8c] sm:$0xf] %vm3080_vm14, %v3071_v37  ;;  %3566 = vst.msk [vmem:[#allocation7 + $0x5c] sm:$0xf] %vm3080_vm14, %v3547_v26  ;;  %v4957_v15 = vld [vmem:[#allocation7 + $0x7c] ss:$20 sps:$4 sm:$0xff]  }
 0x424   : > { %4119 = vmatprep.mubr.bf16.mxu0 %v4957_v15  ;;  %v4579_v26 = vld [vmem:[%s6699_s9] ss:$0 sm:$0xff] }
 0x426   : > { %v3549_v51 = vpop.permute.xlu1 %3548  ;;  %v3394_v13 = vpop.permute.xlu0 %3393  ;;  %v3648_v50 = vld [vmem:[#allocation7 + $0x44] sm:$0xff]  ;;  %v3656_v3 = vld [vmem:[#allocation7 + $0x78] sm:$0xff] }
 0x427   : > { %v4955_v34 = vld [vmem:[#allocation7 + $0x34] ss:$20 sps:$4 sm:$0xff]   ;;  %3567 = vst.msk [vmem:[#allocation7 + $0x70] sm:$0xf] %vm3080_vm14, %v3549_v51  ;;  %3411 = vst.msk [vmem:[#allocation7 + $0x80] sm:$0xf] %vm3080_vm14, %v3394_v13  ;;  %v4525_v6 = vcombine.low %v3645_v42, %v3648_v50 }
 0x428   : > { %4168 = vmatprep.mubr.bf16.mxu1 %v4955_v34 }
 0x429   : > { %4169 = vmatmul.mubr.bf16.gmra.mxu1 %v4525_v6 }
 0x42a   : > { %v3396_v44 = vpop.permute.xlu1 %3395  ;;  %v3551_v40 = vpop.permute.xlu0 %3550  ;;  %v3659_v36 = vld [vmem:[#allocation7 + $0x8c] sm:$0xff] }
 0x42b   : > { %3412 = vst.msk [vmem:[#allocation7 + $0x94] sm:$0xf] %vm3080_vm14, %v3396_v44  ;;  %3568 = vst.msk [vmem:[#allocation7 + $0x84] sm:$0xf] %vm3080_vm14, %v3551_v40  ;;  %v4533_v53 = vcombine.low %v3656_v3, %v3659_v36 }
 0x42d   : > { %4120 = vmatmul.mubr.bf16.gmra.mxu0 %v4533_v53 }
 0x42e   : > { %v3553_v7 = vpop.permute.xlu1 %3552  ;;  %4811 = vmatprep.mubr.msk.bf16.mxu0 %vm4050_vm6, %v4960_v39  ;;  %v4961_v62 = vld [vmem:[#allocation7 + $0x5c] ss:$20 sps:$4 sm:$0xff]  }
 0x42f   : > { %3569 = vst.msk [vmem:[#allocation7 + $0x98] sm:$0xf] %vm3080_vm14, %v3553_v7  ;;  %4176 = vmatprep.mubr.bf16.mxu1 %v4961_v62 }
 0x431   : > { %4177 = vmatmul.mubr.bf16.gmra.mxu1 %v4963_v45 }
 0x432   : > { %v4968_v33 = vld [vmem:[#allocation7 + $0x80] ss:$20 sps:$4 sm:$0xff]  }
 0x435   : > { %4812 = vmatmul.mubr.msk.bf16.vlgmr.msra.gmra.mxu0 %vm4050_vm6, %v4964_v5 }
 0x436   : > { %4815 = vmatprep.mubr.msk.bf16.mxu0 %vm4050_vm6, %v4965_v61  ;;  %v4966_v24 = vld [vmem:[#allocation7 + $0x84] ss:$20 sps:$4 sm:$0xff]  }
 0x437   : > { %4184 = vmatprep.mubr.bf16.mxu1 %v4966_v24 }
 0x439   : > { %4185 = vmatmul.mubr.bf16.gmra.mxu1 %v4968_v33 }
 0x43d   : > { %4816 = vmatmul.mubr.msk.bf16.gmra.mxu0 %vm4050_vm6, %v4969_v56 }
 0x4a0   : > { %v4709_v60 = vpop.f32.mrf.mxu0 }
 0x4a2   : > { %v4710_v8 = vpop.f32.mrf.mxu0 }
 0x4a3   : > { %v4711_v10 = vadd.f32 %v4710_v8, %v4709_v60 }
 0x4a4   : > { %v4712_v9 = vpop.f32.mrf.mxu0 }
 0x4a6   : > { %v4713_v11 = vpop.f32.mrf.mxu0 }
 0x4a7   : > { %v4714_v42 = vadd.f32 %v4713_v11, %v4712_v9 }
 0x4c9   : > { %v4715_v30 = vpop.f32.mrf.mxu0 }
 0x4cb   : > { %v4716_v27 = vpop.f32.mrf.mxu0 }
 0x4cc   : > { %v4717_v49 = vadd.f32 %v4716_v27, %v4715_v30 }
 0x4cd   : > { %v4718_v35 = vpop.f32.mrf.mxu0 }
 0x4cf   : > { %v4719_v14 = vpop.f32.mrf.mxu0 }
 0x4d0   : > { %v4720_v38 = vadd.f32 %v4719_v14, %v4718_v35 }
 0x4d7   : > { %v4749_v52 = vpop.f32.mrf.mxu1 }
 0x4d9   : > { %v4750_v41 = vpop.f32.mrf.mxu1 }
 0x4da   : > { %v4751_v19 = vadd.f32 %v4750_v41, %v4749_v52 }
 0x4db   : > { %v4721_v43 = vpop.f32.mrf.mxu0  ;;  %v4752_v1 = vpop.f32.mrf.mxu1 }
 0x4dc   : > { %v4163_v0 = vadd.f32 %v4751_v19, %v4711_v10 }
 0x4dd   : > { %v4722_v46 = vpop.f32.mrf.mxu0  ;;  %v4753_v31 = vpop.f32.mrf.mxu1 }
 0x4de   : > { %v4754_v2 = vadd.f32 %v4753_v31, %v4752_v1  ;;  %v4723_v39 = vadd.f32 %v4722_v46, %v4721_v43 }
 0x4df   : > { %v4724_v47 = vpop.f32.mrf.mxu0 }
 0x4e0   : > { %v4166_v15 = vadd.f32 %v4754_v2, %v4714_v42 }
 0x4e1   : > { %v4725_v4 = vpop.f32.mrf.mxu0 }
 0x4e2   : > { %v4726_v56 = vadd.f32 %v4725_v4, %v4724_v47 }
 0x4e9   : > { %v4755_v18 = vpop.f32.mrf.mxu1 }
 0x4eb   : > { %v4756_v57 = vpop.f32.mrf.mxu1 }
 0x4ec   : > { %v4757_v12 = vadd.f32 %v4756_v57, %v4755_v18 }
 0x4ed   : > { %v4727_v16 = vpop.f32.mrf.mxu0  ;;  %v4758_v20 = vpop.f32.mrf.mxu1 }
 0x4ee   : > { %v4171_v59 = vadd.f32 %v4757_v12, %v4717_v49 }
 0x4ef   : > { %v4728_v21 = vpop.f32.mrf.mxu0  ;;  %v4759_v17 = vpop.f32.mrf.mxu1 }
 0x4f0   : > { %v4760_v55 = vadd.f32 %v4759_v17, %v4758_v20  ;;  %v4729_v7 = vadd.f32 %v4728_v21, %v4727_v16 }
 0x4f1   : > { %v4730_v58 = vpop.f32.mrf.mxu0  ;;  %v4761_v29 = vpop.f32.mrf.mxu1 }
 0x4f2   : > { %v4174_v13 = vadd.f32 %v4760_v55, %v4720_v38 }
 0x4f3   : > { %v4731_v28 = vpop.f32.mrf.mxu0  ;;  %v4762_v32 = vpop.f32.mrf.mxu1 }
 0x4f4   : > { %v4763_v6 = vadd.f32 %v4762_v32, %v4761_v29  ;;  %v4732_v11 = vadd.f32 %v4731_v28, %v4730_v58 }
 0x4f5   : > { %v4764_v48 = vpop.f32.mrf.mxu1  ;;  %v4813_v22 = vpop.f32.mrf.mxu0 }
 0x4f6   : > { %v4236_v63 = vadd.f32 %v4813_v22, %v4171_v59  ;;  %v4179_v9 = vadd.f32 %v4763_v6, %v4723_v39 }
 0x4f7   : > { %v4765_v23 = vpop.f32.mrf.mxu1  ;;  %v4227_v25 = vpop.f32.mrf.mxu0 }
 0x4f8   : > { %v4267_v37 = vmul.f32 %v6624_v54, %v4236_v63  ;;  %v4228_v51 = vadd.f32 %v4227_v25, %v4163_v0  ;;  %v4766_v5 = vadd.f32 %v4765_v23, %v4764_v48 }
 0x4f9   : > { %v4767_v50 = vpop.f32.mrf.mxu1  ;;  %v4814_v34 = vpop.f32.mrf.mxu0 }
 0x4fa   : > { %v4239_v3 = vadd.f32 %v4814_v34, %v4174_v13  ;;  %v4282_v44 = vadd.f32 %v4579_v26, %v4267_v37  ;;  %v4265_v40 = vmul.f32 %v6624_v54, %v4228_v51  ;;  %v4182_v57 = vadd.f32 %v4766_v5, %v4726_v56 }
 0x4fb   : > { %v4768_v36 = vpop.f32.mrf.mxu1  ;;  %v4230_v53 = vpop.f32.mrf.mxu0 }
 0x4fc   : > { %v4268_v62 = vmul.f32 %v6624_v54, %v4239_v3  ;;  %v4769_v45 = vadd.f32 %v4768_v36, %v4767_v50  ;;  %v4231_v61 = vadd.f32 %v4230_v53, %v4166_v15  ;;  %v4290_v30 = vmax.f32 %v4282_v44, 0.0 }
 0x4fd   : > { %v4770_v24 = vpop.f32.mrf.mxu1  ;;  %v4817_v33 = vpop.f32.mrf.mxu0  ;;  %v4280_v27 = vadd.f32 %v4579_v26, %v4265_v40 }
 0x4fe   : > { %v4283_v60 = vadd.f32 %v4579_v26, %v4268_v62  ;;  %v4187_v8 = vadd.f32 %v4769_v45, %v4729_v7  ;;  %v4266_v35 = vmul.f32 %v6624_v54, %v4231_v61 }
 0x4ff   : > { %v4771_v52 = vpop.f32.mrf.mxu1  ;;  %v4243_v14 = vpop.f32.mrf.mxu0  ;;  %v4288_v21 = vmax.f32 %v4280_v27, 0.0 }
 0x500   : > { %v4291_v41 = vmax.f32 %v4283_v60, 0.0  ;;  %v4252_v43 = vadd.f32 %v4817_v33, %v4187_v8  ;;  %v4772_v1 = vadd.f32 %v4771_v52, %v4770_v24  ;;  %v4244_v46 = vadd.f32 %v4243_v14, %v4179_v9 }
 0x501   : > { %v4281_v31 = vadd.f32 %v4579_v26, %v4266_v35  ;;  %v4818_v18 = vpop.f32.mrf.mxu0 }
 0x502   : > { %v4627_v47 = vpack.c.bf16 %v4291_v41, %v4290_v30  ;;  %v4271_v4 = vmul.f32 %v6624_v54, %v4252_v43  ;;  %v4269_v16 = vmul.f32 %v6624_v54, %v4244_v46  ;;  %v4190_v20 = vadd.f32 %v4772_v1, %v4732_v11 }
 0x503   : > { %v4289_v17 = vmax.f32 %v4281_v31, 0.0  ;;  %v4246_v12 = vpop.f32.mrf.mxu0 }
 0x504   : > { %4639 = vst [vmem:[%s352_s11 + $0x8] sm:$0xff] %v4627_v47   ;;  %v4255_v58 = vadd.f32 %v4818_v18, %v4190_v20  ;;  %v4247_v29 = vadd.f32 %v4246_v12, %v4182_v57  ;;  %v4286_v19 = vadd.f32 %v4579_v26, %v4271_v4  ;;  %v4284_v28 = vadd.f32 %v4579_v26, %v4269_v16 }
 0x505   : > { %v4622_v49 = vpack.c.bf16 %v4289_v17, %v4288_v21 }
 0x506   : > { %v4272_v32 = vmul.f32 %v6624_v54, %v4255_v58  ;;  %v4270_v10 = vmul.f32 %v6624_v54, %v4247_v29  ;;  %v4294_v48 = vmax.f32 %v4286_v19, 0.0  ;;  %v4292_v22 = vmax.f32 %v4284_v28, 0.0 }
 0x507   : > { %4623 = vst [vmem:[%s352_s11] sm:$0xff] %v4622_v49  }
 0x508   : > { %v4287_v55 = vadd.f32 %v4579_v26, %v4272_v32  ;;  %v4285_v59 = vadd.f32 %v4579_v26, %v4270_v10 }
 0x50a   : > { %v4295_v38 = vmax.f32 %v4287_v55, 0.0  ;;  %v4293_v63 = vmax.f32 %v4285_v59, 0.0 }
 0x50c   : > { %v4637_v0 = vpack.c.bf16 %v4295_v38, %v4294_v48  ;;  %v4632_v2 = vpack.c.bf16 %v4293_v63, %v4292_v22 }
 0x50e   : > { %4641 = vst [vmem:[%s352_s11 + $0x18] sm:$0xff] %v4637_v0   ;;  %4640 = vst [vmem:[%s352_s11 + $0x10] sm:$0xff] %v4632_v2  }
 0x50f   : > { %4983 = shalt.err (!%p4980_p3)
}
 0x510   : > { %s4984_s11 = scalar_lea.hbm %s6644_s20, 512  ;;  %s4988_s12 = scalar_lea.hbm %s6700_s10, 1024 }
 0x511   : > { %p4985_p4 = scmp.ne.s32.totalorder %s6644_s20, %s4984_s11  ;;  %p4989_p9 = scmp.lt.s32.totalorder %s6644_s20, %s6700_s10 }
 0x512   : > { %p4990_p10 = scmp.lt.s32.totalorder %s4988_s12, %s4984_s11 }
 0x513   : > { %p4986_p7 = pnand %p4985_p4, %p5139_p5 }
 0x514   : > { %p4991_p11 = por %p4990_p10, %p4989_p9 }
 0x515   : > { %p4987_p8 = pneg %p4986_p7 }
 0x517   : > { %p4992_p12 = pnand %p4991_p11, %p4987_p8 }
 0x519   : > { %4995 = shalt.err (!%p4992_p12)
}
 0x51a   : > { %s6723_s30 = smov 4   ;;  %s6724_s21 = smov 64  }
 0x51b   : > { %4819 = dma.vmem_to_hbm [thread:$0]  (%p5139_p5), %s6646_s27, 512, %s6644_s20, %s4337_s17, %s6724_s21, %s6724_s21, %s6723_s30  }
 0x51c PF: > { %p4825_p13 = scmp.ge.s32.totalorder %s5030_s16, 2  ;;  %s4365_s28 = sand.u32 1, %s5018_s13  }
 0x51d   : > { %s4366_s18 = scalar_lea.sflag [#allocation9], %s4365_s28 }
 0x51e   : > { %p4822_p0 = pnand %p4825_p13, %p5143_p6 }
 0x520   : > { %p4823_p1 = pneg %p4822_p0 }
 0x522   : > { %5013 = dma.done.wait (%p4823_p1), %s4366_s18, 512  }
 0x523   : > { %5015 = vsyncadd (%p4823_p1), %s4366_s18, 4294966784  ;;  %p20_p2 = scmp.ge.s32.totalorder %s5126_s19, 4   ;;  %s6725_s13 = smov %s5022_s14 }
 0x524   : > { %s6726_s14 = smov %s5026_s15  ;;  %s6727_s15 = smov %s5137_s22 }
 0x525   : > { %s6728_s16 = smov %s5126_s19  ;;  %22 = sbr.rel (!%p20_p2) target bundleno = 3 (0x3), region = 101 }
 0x52a   :  { %4371 = vsyncpa [#allocation9], 1 }
 0x52b   :  { %4373 = vsyncpa [#allocation9 + $0x1], 1 }

</bundles_post_ra>
